<compile_context>
chip_gen: v7x
topology: tpu7x:2x2x1
jax: 0.10.0
libtpu: 0.0.40
codegen_flags: <defaults>
</compile_context>

<pallas_src>
import numpy as np
import jax
import jax.numpy as jnp
from jax.experimental import pallas as pl
from jax.experimental.pallas import tpu as pltpu


def adaptive_pool_matrix(in_size: int, out_size: int) -> np.ndarray:
  """Averaging matrix with torch AdaptiveAvgPool semantics (floor/ceil windows)."""
  m = np.zeros((out_size, in_size), np.float32)
  for i in range(out_size):
    start = (i * in_size) // out_size
    end = -((-(i + 1) * in_size) // out_size)  # ceil((i+1)*in/out)
    m[i, start:end] = 1.0 / float(end - start)
  return m


def _round_up(x: int, m: int) -> int:
  return -(-x // m) * m


def fpn_branch_kernel(x_ref, p2_ref, w1_ref, b1_ref, w2_ref, b2_ref,
                      w3_ref, b3_ref, out_ref, pool_ref):
  """One batch-block of B samples per grid step.

  x_ref  : (B, cin, H*W)      f32   channels-major flattened input
  p2_ref : (H*W, 49)          f32   transposed kron(P_h, P_w) pooling matrix
  w1_ref : (9*cin, hidden)    bf16  im2col-reshaped conv1 weights
  w2_ref : (9, hidden, hidden) bf16 conv2 weights, k = dh*3+dw
  w3_ref : (9, hidden, coutp) bf16  conv3 weights (output lanes zero-padded)
  b*_ref : (1, co)            f32
  out_ref: (1, B, coutp)      f32   lane-dense output slab
  pool_ref: (B, 7, 7, cin)    bf16  VMEM scratch holding the pooled maps
  """
  B, cin, hw = x_ref.shape
  hidden = w1_ref.shape[1]
  coutp = w3_ref.shape[2]

  # ---- AdaptiveAvgPool2d((7,7)): ONE (B*cin, HW) x (HW, 49) f32 matmul -------
  x_flat = x_ref[...].reshape(B * cin, hw)                       # f32
  pooled = jnp.dot(x_flat, p2_ref[...],
                   preferred_element_type=jnp.float32)           # (B*cin, 49)
  pooled = pooled.reshape(B, cin, 49)
  # channels -> lane dim: tiny per-sample 2-D transpose written straight into
  # VMEM scratch so vreg live ranges stay bounded when B is large.
  for b in range(B):
    pool_ref[b] = pooled[b].T.astype(jnp.bfloat16).reshape(7, 7, cin)
  t1 = pool_ref[...]                                             # (B,7,7,cin)

  # ---- conv1 + ReLU: batched im2col, ONE matmul (M=B*25, K=9*cin) ------------
  cols = jnp.concatenate(
      [t1[:, dh:dh + 5, dw:dw + 5, :] for dh in range(3) for dw in range(3)],
      axis=-1)                                                   # (B,5,5,9*cin)
  patches1 = cols.reshape(B * 25, 9 * cin)
  h1 = jnp.maximum(
      jnp.dot(patches1, w1_ref[...], preferred_element_type=jnp.float32)
      + b1_ref[...], 0.0).astype(jnp.bfloat16)                   # (B*25, hidden)
  t2 = h1.reshape(B, 5, 5, hidden)

  # ---- conv2 + ReLU: 9-shifted-accumulate (K = N = hidden, MXU-native) -------
  acc2 = jnp.zeros((B * 9, hidden), jnp.float32)
  for k in range(9):
    dh, dw = divmod(k, 3)
    lhs = t2[:, dh:dh + 3, dw:dw + 3, :].reshape(B * 9, hidden)
    acc2 = acc2 + jnp.dot(lhs, w2_ref[k], preferred_element_type=jnp.float32)
  h2 = jnp.maximum(acc2 + b2_ref[...], 0.0).astype(jnp.bfloat16)  # (B*9, hidden)
  t3 = h2.reshape(B, 3, 3, hidden)

  # ---- conv3 + ReLU: 9-shifted-accumulate, M = B -----------------------------
  acc3 = jnp.zeros((B, coutp), jnp.float32)
  for k in range(9):
    dh, dw = divmod(k, 3)
    acc3 = acc3 + jnp.dot(t3[:, dh, dw, :], w3_ref[k],
                          preferred_element_type=jnp.float32)
  h3 = jnp.maximum(acc3 + b3_ref[...], 0.0)                      # (B, coutp) f32

  # lane-dense store (coutp is a multiple of 128).
  out_ref[...] = h3.reshape(out_ref.shape)


def fpn_branch_forward(x_nchw, params, *, batch_block=None, max_block=32):
  N, cin, H, W = x_nchw.shape
  w1, b1 = params["w1"], params["b1"]
  w2, b2 = params["w2"], params["b2"]
  w3, b3 = params["w3"], params["b3"]
  # Weight layout contract: HWIO (3, 3, ci, co).
  assert w1.shape[:2] == (3, 3) and w1.shape[2] == cin, "conv1 weights must be HWIO"
  hidden = w1.shape[-1]
  assert w2.shape == (3, 3, hidden, hidden), "conv2 weights must be HWIO"
  assert w3.shape[:3] == (3, 3, hidden), "conv3 weights must be HWIO"
  cout = w3.shape[-1]
  coutp = _round_up(cout, 128)          # lane-dense output store

  # Batch block: one (or a few) big grid steps so the conv matmul M dims fill
  # the MXU; pad the batch minimally instead of falling back to B=1.
  if batch_block is not None:
    B = int(batch_block)
  else:
    bt = min(N, max_block)
    g0 = -(-N // bt)
    B = -(-N // g0)
  G = -(-N // B)
  Npad = G * B
  if Npad != N:
    x_nchw = jnp.pad(x_nchw, ((0, Npad - N), (0, 0), (0, 0), (0, 0)))

  # Channels-major flatten of NCHW (free reshape, no big transpose); f32 so the
  # adaptive pool runs at full precision.
  x_cm = x_nchw.reshape(Npad, cin, H * W).astype(jnp.float32)

  # torch AdaptiveAvgPool2d((7,7)) as an (H*W, 49) averaging matrix (f32).
  ph = adaptive_pool_matrix(H, 7)
  pw = adaptive_pool_matrix(W, 7)
  p2t = jnp.asarray(np.kron(ph, pw).T, jnp.float32)              # (H*W, 49)

  # conv1 weights in im2col layout (row = (dh*3+dw)*cin + c); conv2/conv3 as
  # (9, ci, co) for the shifted-accumulate form; conv3 zero-padded to coutp.
  w1r = w1.reshape(9 * cin, hidden).astype(jnp.bfloat16)
  w2r = w2.reshape(9, hidden, hidden).astype(jnp.bfloat16)
  w3p = jnp.pad(w3.astype(jnp.float32), ((0, 0), (0, 0), (0, 0), (0, coutp - cout)))
  w3r = w3p.reshape(9, hidden, coutp).astype(jnp.bfloat16)
  b1f = b1.reshape(1, hidden).astype(jnp.float32)
  b2f = b2.reshape(1, hidden).astype(jnp.float32)
  b3f = jnp.pad(b3.reshape(1, cout).astype(jnp.float32), ((0, 0), (0, coutp - cout)))

  flops_per_sample = 2 * (cin * H * W * 49 + 25 * 9 * cin * hidden
                          + 9 * 9 * hidden * hidden + 9 * hidden * coutp)
  bytes_accessed = (Npad * cin * H * W * 4 + H * W * 49 * 4
                    + (9 * cin * hidden + 9 * hidden * hidden
                       + 9 * hidden * coutp) * 2
                    + Npad * coutp * 4)

  out = pl.pallas_call(
      fpn_branch_kernel,
      out_shape=jax.ShapeDtypeStruct((G, B, coutp), jnp.float32),
      grid=(G,),
      in_specs=[
          pl.BlockSpec((B, cin, H * W), lambda n: (n, 0, 0)),
          pl.BlockSpec((H * W, 49), lambda n: (0, 0)),
          pl.BlockSpec((9 * cin, hidden), lambda n: (0, 0)),
          pl.BlockSpec((1, hidden), lambda n: (0, 0)),
          pl.BlockSpec((9, hidden, hidden), lambda n: (0, 0, 0)),
          pl.BlockSpec((1, hidden), lambda n: (0, 0)),
          pl.BlockSpec((9, hidden, coutp), lambda n: (0, 0, 0)),
          pl.BlockSpec((1, coutp), lambda n: (0, 0)),
      ],
      out_specs=pl.BlockSpec((1, B, coutp), lambda n: (n, 0, 0)),
      scratch_shapes=[pltpu.VMEM((B, 7, 7, cin), jnp.bfloat16)],
      compiler_params=pltpu.CompilerParams(
          dimension_semantics=("parallel",)),
      cost_estimate=pl.CostEstimate(
          flops=int(Npad * flops_per_sample), transcendentals=0,
          bytes_accessed=int(bytes_accessed)),
  )(x_cm, p2t, w1r, b1f, w2r, b2f, w3r, b3f)

  return out.reshape(Npad, coutp)[:N, :cout]


def fpn_branch_reference(x_nchw, params):
  """Pure-JAX f32 reference (no Pallas) mirroring the PyTorch forward."""
  N, _, H, W = x_nchw.shape
  ph = jnp.asarray(adaptive_pool_matrix(H, 7))
  pw = jnp.asarray(adaptive_pool_matrix(W, 7))
  y = jnp.einsum("ih,jw,nchw->ncij", ph, pw, x_nchw)
  for w, b in ((params["w1"], params["b1"]),
               (params["w2"], params["b2"]),
               (params["w3"], params["b3"])):
    w_oihw = jnp.transpose(w, (3, 2, 0, 1))
    y = jax.lax.conv_general_dilated(
        y, w_oihw, window_strides=(1, 1), padding="VALID",
        dimension_numbers=("NCHW", "OIHW", "NCHW"))
    y = jnp.maximum(y + b.reshape(1, -1, 1, 1), 0.0)
  return y.reshape(N, -1)


if __name__ == "__main__":
  in_channels, hidden_channels, out_channels, out_features = 4, 128, 16, 32
  N, H, W = 2, 16, 16

  key = jax.random.PRNGKey(0)
  k = jax.random.split(key, 8)

  def conv_w(kk, ci, co):
    return (jax.random.normal(kk, (3, 3, ci, co), jnp.float32)
            / np.sqrt(9.0 * ci)).astype(jnp.float32)

  params = {
      "w1": conv_w(k[0], in_channels, hidden_channels),
      "b1": 0.05 * jax.random.normal(k[1], (1, hidden_channels), jnp.float32),
      "w2": conv_w(k[2], hidden_channels, hidden_channels),
      "b2": 0.05 * jax.random.normal(k[3], (1, hidden_channels), jnp.float32),
      "w3": conv_w(k[4], hidden_channels, out_channels),
      "b3": 0.05 * jax.random.normal(k[5], (1, out_channels), jnp.float32),
      # Declared by the module's __init__ but never used in forward().
      "linear_w": 0.1 * jax.random.normal(
          k[6], (out_features, out_channels), jnp.float32),
      "linear_b": jnp.zeros((out_features,), jnp.float32),
  }

  x = jax.random.normal(k[7], (N, in_channels, H, W), jnp.float32)

  out = jax.block_until_ready(fpn_branch_forward(x, params))
  ref = jax.block_until_ready(fpn_branch_reference(x, params))
  # bf16 MXU conv operands with f32 accumulation -> relaxed tolerance vs f32 ref.
  np.testing.assert_allclose(np.asarray(out), np.asarray(ref),
                             rtol=2e-2, atol=2e-2)
  print("KERNEL_OK")
</pallas_src>

<mosaic_0001>
module attributes {stable_mosaic.version = 11 : i64} {
  func.func @fpn_branch_kernel(%arg0: i32, %arg1: memref<2x4x256xf32, #tpu.memory_space<vmem>>, %arg2: memref<256x49xf32, #tpu.memory_space<vmem>>, %arg3: memref<36x128xbf16, #tpu.memory_space<vmem>>, %arg4: memref<1x128xf32, #tpu.memory_space<vmem>>, %arg5: memref<9x128x128xbf16, #tpu.memory_space<vmem>>, %arg6: memref<1x128xf32, #tpu.memory_space<vmem>>, %arg7: memref<9x128x128xbf16, #tpu.memory_space<vmem>>, %arg8: memref<1x128xf32, #tpu.memory_space<vmem>>, %arg9: memref<1x2x128xf32, #tpu.memory_space<vmem>>, %arg10: memref<2x7x7x4xbf16, #tpu.memory_space<vmem>>) attributes {dimension_semantics = [#tpu.dimension_semantics<parallel>], iteration_bounds = array<i64: 1>, scalar_prefetch = 0 : i64, scratch_operands = 1 : i64, tpu.core_type = #tpu.core_type<tc>, window_params = [{transform_indices = @transform_0, window_bounds = array<i64: 2, 4, 256>}, {pipeline_mode = #tpu.pipeline_mode<synchronous>, transform_indices = @transform_1, window_bounds = array<i64: 256, 49>}, {pipeline_mode = #tpu.pipeline_mode<synchronous>, transform_indices = @transform_2, window_bounds = array<i64: 36, 128>}, {pipeline_mode = #tpu.pipeline_mode<synchronous>, transform_indices = @transform_3, window_bounds = array<i64: 1, 128>}, {pipeline_mode = #tpu.pipeline_mode<synchronous>, transform_indices = @transform_4, window_bounds = array<i64: 9, 128, 128>}, {pipeline_mode = #tpu.pipeline_mode<synchronous>, transform_indices = @transform_5, window_bounds = array<i64: 1, 128>}, {pipeline_mode = #tpu.pipeline_mode<synchronous>, transform_indices = @transform_6, window_bounds = array<i64: 9, 128, 128>}, {pipeline_mode = #tpu.pipeline_mode<synchronous>, transform_indices = @transform_7, window_bounds = array<i64: 1, 128>}, {transform_indices = @transform_8, window_bounds = array<i64: 1, 2, 128>}]} {
    %c0 = arith.constant 0 : index
    %c0_0 = arith.constant 0 : index
    %c0_1 = arith.constant 0 : index
    %0 = vector.load %arg1[%c0, %c0_0, %c0_1] : memref<2x4x256xf32, #tpu.memory_space<vmem>>, vector<2x4x256xf32>
    %1 = vector.shape_cast %0 : vector<2x4x256xf32> to vector<8x256xf32>
    %c0_2 = arith.constant 0 : index
    %c0_3 = arith.constant 0 : index
    %2 = vector.load %arg2[%c0_2, %c0_3] : memref<256x49xf32, #tpu.memory_space<vmem>>, vector<256x49xf32>
    %cst = arith.constant dense<0.000000e+00> : vector<8x49xf32>
    %3 = tpu.matmul %1, %2, %cst {dimension_numbers = #tpu.dot_dimension_numbers<[1], [0], [0], [1], [0, 0, 1, 1], [], []>} : vector<8x256xf32>, vector<256x49xf32>, vector<8x49xf32> -> vector<8x49xf32>
    %4 = vector.shape_cast %3 : vector<8x49xf32> to vector<2x4x49xf32>
    %5 = vector.extract_strided_slice %4 {offsets = [0, 0, 0], sizes = [1, 4, 49], strides = [1, 1, 1]} : vector<2x4x49xf32> to vector<1x4x49xf32>
    %6 = vector.shape_cast %5 : vector<1x4x49xf32> to vector<4x49xf32>
    %7 = tpu.transpose %6, [1, 0] : vector<4x49xf32> -> vector<49x4xf32>
    %8 = arith.truncf %7 : vector<49x4xf32> to vector<49x4xbf16>
    %9 = vector.shape_cast %8 : vector<49x4xbf16> to vector<7x7x4xbf16>
    %c0_4 = arith.constant 0 : index
    %c0_5 = arith.constant 0 : index
    %c0_6 = arith.constant 0 : index
    %c0_7 = arith.constant 0 : index
    %10 = vector.load %arg10[%c0_4, %c0_5, %c0_6, %c0_7] : memref<2x7x7x4xbf16, #tpu.memory_space<vmem>>, vector<1x7x7x4xbf16>
    %11 = vector.shape_cast %10 : vector<1x7x7x4xbf16> to vector<7x7x4xbf16>
    %12 = vector.shape_cast %9 : vector<7x7x4xbf16> to vector<1x7x7x4xbf16>
    tpu.vector_store %arg10[%c0_4, %c0_5, %c0_6, %c0_7], %12 {strides = array<i32>} : memref<2x7x7x4xbf16, #tpu.memory_space<vmem>>, vector<1x7x7x4xbf16>,
    %13 = vector.extract_strided_slice %4 {offsets = [1, 0, 0], sizes = [1, 4, 49], strides = [1, 1, 1]} : vector<2x4x49xf32> to vector<1x4x49xf32>
    %14 = vector.shape_cast %13 : vector<1x4x49xf32> to vector<4x49xf32>
    %15 = tpu.transpose %14, [1, 0] : vector<4x49xf32> -> vector<49x4xf32>
    %16 = arith.truncf %15 : vector<49x4xf32> to vector<49x4xbf16>
    %17 = vector.shape_cast %16 : vector<49x4xbf16> to vector<7x7x4xbf16>
    %c1 = arith.constant 1 : index
    %c0_8 = arith.constant 0 : index
    %c0_9 = arith.constant 0 : index
    %c0_10 = arith.constant 0 : index
    %18 = vector.load %arg10[%c1, %c0_8, %c0_9, %c0_10] : memref<2x7x7x4xbf16, #tpu.memory_space<vmem>>, vector<1x7x7x4xbf16>
    %19 = vector.shape_cast %18 : vector<1x7x7x4xbf16> to vector<7x7x4xbf16>
    %20 = vector.shape_cast %17 : vector<7x7x4xbf16> to vector<1x7x7x4xbf16>
    tpu.vector_store %arg10[%c1, %c0_8, %c0_9, %c0_10], %20 {strides = array<i32>} : memref<2x7x7x4xbf16, #tpu.memory_space<vmem>>, vector<1x7x7x4xbf16>,
    %c0_11 = arith.constant 0 : index
    %c0_12 = arith.constant 0 : index
    %c0_13 = arith.constant 0 : index
    %c0_14 = arith.constant 0 : index
    %21 = vector.load %arg10[%c0_11, %c0_12, %c0_13, %c0_14] : memref<2x7x7x4xbf16, #tpu.memory_space<vmem>>, vector<2x7x7x4xbf16>
    %22 = vector.extract_strided_slice %21 {offsets = [0, 0, 0, 0], sizes = [2, 5, 5, 4], strides = [1, 1, 1, 1]} : vector<2x7x7x4xbf16> to vector<2x5x5x4xbf16>
    %23 = vector.extract_strided_slice %21 {offsets = [0, 0, 1, 0], sizes = [2, 5, 5, 4], strides = [1, 1, 1, 1]} : vector<2x7x7x4xbf16> to vector<2x5x5x4xbf16>
    %24 = vector.extract_strided_slice %21 {offsets = [0, 0, 2, 0], sizes = [2, 5, 5, 4], strides = [1, 1, 1, 1]} : vector<2x7x7x4xbf16> to vector<2x5x5x4xbf16>
    %25 = vector.extract_strided_slice %21 {offsets = [0, 1, 0, 0], sizes = [2, 5, 5, 4], strides = [1, 1, 1, 1]} : vector<2x7x7x4xbf16> to vector<2x5x5x4xbf16>
    %26 = vector.extract_strided_slice %21 {offsets = [0, 1, 1, 0], sizes = [2, 5, 5, 4], strides = [1, 1, 1, 1]} : vector<2x7x7x4xbf16> to vector<2x5x5x4xbf16>
    %27 = vector.extract_strided_slice %21 {offsets = [0, 1, 2, 0], sizes = [2, 5, 5, 4], strides = [1, 1, 1, 1]} : vector<2x7x7x4xbf16> to vector<2x5x5x4xbf16>
    %28 = vector.extract_strided_slice %21 {offsets = [0, 2, 0, 0], sizes = [2, 5, 5, 4], strides = [1, 1, 1, 1]} : vector<2x7x7x4xbf16> to vector<2x5x5x4xbf16>
    %29 = vector.extract_strided_slice %21 {offsets = [0, 2, 1, 0], sizes = [2, 5, 5, 4], strides = [1, 1, 1, 1]} : vector<2x7x7x4xbf16> to vector<2x5x5x4xbf16>
    %30 = vector.extract_strided_slice %21 {offsets = [0, 2, 2, 0], sizes = [2, 5, 5, 4], strides = [1, 1, 1, 1]} : vector<2x7x7x4xbf16> to vector<2x5x5x4xbf16>
    %31 = tpu.concatenate %22, %23, %24, %25, %26, %27, %28, %29, %30 in 3 : vector<2x5x5x4xbf16>, vector<2x5x5x4xbf16>, vector<2x5x5x4xbf16>, vector<2x5x5x4xbf16>, vector<2x5x5x4xbf16>, vector<2x5x5x4xbf16>, vector<2x5x5x4xbf16>, vector<2x5x5x4xbf16>, vector<2x5x5x4xbf16> -> vector<2x5x5x36xbf16>
    %32 = vector.shape_cast %31 : vector<2x5x5x36xbf16> to vector<50x36xbf16>
    %c0_15 = arith.constant 0 : index
    %c0_16 = arith.constant 0 : index
    %33 = vector.load %arg3[%c0_15, %c0_16] : memref<36x128xbf16, #tpu.memory_space<vmem>>, vector<36x128xbf16>
    %cst_17 = arith.constant dense<0.000000e+00> : vector<50x128xf32>
    %34 = tpu.matmul %32, %33, %cst_17 {dimension_numbers = #tpu.dot_dimension_numbers<[1], [0], [0], [1], [0, 0, 1, 1], [], []>} : vector<50x36xbf16>, vector<36x128xbf16>, vector<50x128xf32> -> vector<50x128xf32>
    %c0_18 = arith.constant 0 : index
    %c0_19 = arith.constant 0 : index
    %35 = vector.load %arg4[%c0_18, %c0_19] : memref<1x128xf32, #tpu.memory_space<vmem>>, vector<1x128xf32>
    %36 = vector.broadcast %35 : vector<1x128xf32> to vector<50x128xf32>
    %37 = arith.addf %34, %36 : vector<50x128xf32>
    %cst_20 = arith.constant 0.000000e+00 : f32
    %38 = vector.broadcast %cst_20 : f32 to vector<50x128xf32>
    %39 = arith.maximumf %37, %38 : vector<50x128xf32>
    %40 = arith.truncf %39 : vector<50x128xf32> to vector<50x128xbf16>
    %41 = vector.shape_cast %40 : vector<50x128xbf16> to vector<2x5x5x128xbf16>
    %cst_21 = arith.constant 0.000000e+00 : f32
    %42 = vector.broadcast %cst_21 : f32 to vector<18x128xf32>
    %43 = vector.extract_strided_slice %41 {offsets = [0, 0, 0, 0], sizes = [2, 3, 3, 128], strides = [1, 1, 1, 1]} : vector<2x5x5x128xbf16> to vector<2x3x3x128xbf16>
    %44 = vector.shape_cast %43 : vector<2x3x3x128xbf16> to vector<18x128xbf16>
    %c0_22 = arith.constant 0 : index
    %c0_23 = arith.constant 0 : index
    %c0_24 = arith.constant 0 : index
    %45 = vector.load %arg5[%c0_22, %c0_23, %c0_24] : memref<9x128x128xbf16, #tpu.memory_space<vmem>>, vector<1x128x128xbf16>
    %46 = vector.shape_cast %45 : vector<1x128x128xbf16> to vector<128x128xbf16>
    %cst_25 = arith.constant dense<0.000000e+00> : vector<18x128xf32>
    %47 = tpu.matmul %44, %46, %cst_25 {dimension_numbers = #tpu.dot_dimension_numbers<[1], [0], [0], [1], [0, 0, 1, 1], [], []>} : vector<18x128xbf16>, vector<128x128xbf16>, vector<18x128xf32> -> vector<18x128xf32>
    %48 = arith.addf %42, %47 : vector<18x128xf32>
    %49 = vector.extract_strided_slice %41 {offsets = [0, 0, 1, 0], sizes = [2, 3, 3, 128], strides = [1, 1, 1, 1]} : vector<2x5x5x128xbf16> to vector<2x3x3x128xbf16>
    %50 = vector.shape_cast %49 : vector<2x3x3x128xbf16> to vector<18x128xbf16>
    %c1_26 = arith.constant 1 : index
    %c0_27 = arith.constant 0 : index
    %c0_28 = arith.constant 0 : index
    %51 = vector.load %arg5[%c1_26, %c0_27, %c0_28] : memref<9x128x128xbf16, #tpu.memory_space<vmem>>, vector<1x128x128xbf16>
    %52 = vector.shape_cast %51 : vector<1x128x128xbf16> to vector<128x128xbf16>
    %cst_29 = arith.constant dense<0.000000e+00> : vector<18x128xf32>
    %53 = tpu.matmul %50, %52, %cst_29 {dimension_numbers = #tpu.dot_dimension_numbers<[1], [0], [0], [1], [0, 0, 1, 1], [], []>} : vector<18x128xbf16>, vector<128x128xbf16>, vector<18x128xf32> -> vector<18x128xf32>
    %54 = arith.addf %48, %53 : vector<18x128xf32>
    %55 = vector.extract_strided_slice %41 {offsets = [0, 0, 2, 0], sizes = [2, 3, 3, 128], strides = [1, 1, 1, 1]} : vector<2x5x5x128xbf16> to vector<2x3x3x128xbf16>
    %56 = vector.shape_cast %55 : vector<2x3x3x128xbf16> to vector<18x128xbf16>
    %c2 = arith.constant 2 : index
    %c0_30 = arith.constant 0 : index
    %c0_31 = arith.constant 0 : index
    %57 = vector.load %arg5[%c2, %c0_30, %c0_31] : memref<9x128x128xbf16, #tpu.memory_space<vmem>>, vector<1x128x128xbf16>
    %58 = vector.shape_cast %57 : vector<1x128x128xbf16> to vector<128x128xbf16>
    %cst_32 = arith.constant dense<0.000000e+00> : vector<18x128xf32>
    %59 = tpu.matmul %56, %58, %cst_32 {dimension_numbers = #tpu.dot_dimension_numbers<[1], [0], [0], [1], [0, 0, 1, 1], [], []>} : vector<18x128xbf16>, vector<128x128xbf16>, vector<18x128xf32> -> vector<18x128xf32>
    %60 = arith.addf %54, %59 : vector<18x128xf32>
    %61 = vector.extract_strided_slice %41 {offsets = [0, 1, 0, 0], sizes = [2, 3, 3, 128], strides = [1, 1, 1, 1]} : vector<2x5x5x128xbf16> to vector<2x3x3x128xbf16>
    %62 = vector.shape_cast %61 : vector<2x3x3x128xbf16> to vector<18x128xbf16>
    %c3 = arith.constant 3 : index
    %c0_33 = arith.constant 0 : index
    %c0_34 = arith.constant 0 : index
    %63 = vector.load %arg5[%c3, %c0_33, %c0_34] : memref<9x128x128xbf16, #tpu.memory_space<vmem>>, vector<1x128x128xbf16>
    %64 = vector.shape_cast %63 : vector<1x128x128xbf16> to vector<128x128xbf16>
    %cst_35 = arith.constant dense<0.000000e+00> : vector<18x128xf32>
    %65 = tpu.matmul %62, %64, %cst_35 {dimension_numbers = #tpu.dot_dimension_numbers<[1], [0], [0], [1], [0, 0, 1, 1], [], []>} : vector<18x128xbf16>, vector<128x128xbf16>, vector<18x128xf32> -> vector<18x128xf32>
    %66 = arith.addf %60, %65 : vector<18x128xf32>
    %67 = vector.extract_strided_slice %41 {offsets = [0, 1, 1, 0], sizes = [2, 3, 3, 128], strides = [1, 1, 1, 1]} : vector<2x5x5x128xbf16> to vector<2x3x3x128xbf16>
    %68 = vector.shape_cast %67 : vector<2x3x3x128xbf16> to vector<18x128xbf16>
    %c4 = arith.constant 4 : index
    %c0_36 = arith.constant 0 : index
    %c0_37 = arith.constant 0 : index
    %69 = vector.load %arg5[%c4, %c0_36, %c0_37] : memref<9x128x128xbf16, #tpu.memory_space<vmem>>, vector<1x128x128xbf16>
    %70 = vector.shape_cast %69 : vector<1x128x128xbf16> to vector<128x128xbf16>
    %cst_38 = arith.constant dense<0.000000e+00> : vector<18x128xf32>
    %71 = tpu.matmul %68, %70, %cst_38 {dimension_numbers = #tpu.dot_dimension_numbers<[1], [0], [0], [1], [0, 0, 1, 1], [], []>} : vector<18x128xbf16>, vector<128x128xbf16>, vector<18x128xf32> -> vector<18x128xf32>
    %72 = arith.addf %66, %71 : vector<18x128xf32>
    %73 = vector.extract_strided_slice %41 {offsets = [0, 1, 2, 0], sizes = [2, 3, 3, 128], strides = [1, 1, 1, 1]} : vector<2x5x5x128xbf16> to vector<2x3x3x128xbf16>
    %74 = vector.shape_cast %73 : vector<2x3x3x128xbf16> to vector<18x128xbf16>
    %c5 = arith.constant 5 : index
    %c0_39 = arith.constant 0 : index
    %c0_40 = arith.constant 0 : index
    %75 = vector.load %arg5[%c5, %c0_39, %c0_40] : memref<9x128x128xbf16, #tpu.memory_space<vmem>>, vector<1x128x128xbf16>
    %76 = vector.shape_cast %75 : vector<1x128x128xbf16> to vector<128x128xbf16>
    %cst_41 = arith.constant dense<0.000000e+00> : vector<18x128xf32>
    %77 = tpu.matmul %74, %76, %cst_41 {dimension_numbers = #tpu.dot_dimension_numbers<[1], [0], [0], [1], [0, 0, 1, 1], [], []>} : vector<18x128xbf16>, vector<128x128xbf16>, vector<18x128xf32> -> vector<18x128xf32>
    %78 = arith.addf %72, %77 : vector<18x128xf32>
    %79 = vector.extract_strided_slice %41 {offsets = [0, 2, 0, 0], sizes = [2, 3, 3, 128], strides = [1, 1, 1, 1]} : vector<2x5x5x128xbf16> to vector<2x3x3x128xbf16>
    %80 = vector.shape_cast %79 : vector<2x3x3x128xbf16> to vector<18x128xbf16>
    %c6 = arith.constant 6 : index
    %c0_42 = arith.constant 0 : index
    %c0_43 = arith.constant 0 : index
    %81 = vector.load %arg5[%c6, %c0_42, %c0_43] : memref<9x128x128xbf16, #tpu.memory_space<vmem>>, vector<1x128x128xbf16>
    %82 = vector.shape_cast %81 : vector<1x128x128xbf16> to vector<128x128xbf16>
    %cst_44 = arith.constant dense<0.000000e+00> : vector<18x128xf32>
    %83 = tpu.matmul %80, %82, %cst_44 {dimension_numbers = #tpu.dot_dimension_numbers<[1], [0], [0], [1], [0, 0, 1, 1], [], []>} : vector<18x128xbf16>, vector<128x128xbf16>, vector<18x128xf32> -> vector<18x128xf32>
    %84 = arith.addf %78, %83 : vector<18x128xf32>
    %85 = vector.extract_strided_slice %41 {offsets = [0, 2, 1, 0], sizes = [2, 3, 3, 128], strides = [1, 1, 1, 1]} : vector<2x5x5x128xbf16> to vector<2x3x3x128xbf16>
    %86 = vector.shape_cast %85 : vector<2x3x3x128xbf16> to vector<18x128xbf16>
    %c7 = arith.constant 7 : index
    %c0_45 = arith.constant 0 : index
    %c0_46 = arith.constant 0 : index
    %87 = vector.load %arg5[%c7, %c0_45, %c0_46] : memref<9x128x128xbf16, #tpu.memory_space<vmem>>, vector<1x128x128xbf16>
    %88 = vector.shape_cast %87 : vector<1x128x128xbf16> to vector<128x128xbf16>
    %cst_47 = arith.constant dense<0.000000e+00> : vector<18x128xf32>
    %89 = tpu.matmul %86, %88, %cst_47 {dimension_numbers = #tpu.dot_dimension_numbers<[1], [0], [0], [1], [0, 0, 1, 1], [], []>} : vector<18x128xbf16>, vector<128x128xbf16>, vector<18x128xf32> -> vector<18x128xf32>
    %90 = arith.addf %84, %89 : vector<18x128xf32>
    %91 = vector.extract_strided_slice %41 {offsets = [0, 2, 2, 0], sizes = [2, 3, 3, 128], strides = [1, 1, 1, 1]} : vector<2x5x5x128xbf16> to vector<2x3x3x128xbf16>
    %92 = vector.shape_cast %91 : vector<2x3x3x128xbf16> to vector<18x128xbf16>
    %c8 = arith.constant 8 : index
    %c0_48 = arith.constant 0 : index
    %c0_49 = arith.constant 0 : index
    %93 = vector.load %arg5[%c8, %c0_48, %c0_49] : memref<9x128x128xbf16, #tpu.memory_space<vmem>>, vector<1x128x128xbf16>
    %94 = vector.shape_cast %93 : vector<1x128x128xbf16> to vector<128x128xbf16>
    %cst_50 = arith.constant dense<0.000000e+00> : vector<18x128xf32>
    %95 = tpu.matmul %92, %94, %cst_50 {dimension_numbers = #tpu.dot_dimension_numbers<[1], [0], [0], [1], [0, 0, 1, 1], [], []>} : vector<18x128xbf16>, vector<128x128xbf16>, vector<18x128xf32> -> vector<18x128xf32>
    %96 = arith.addf %90, %95 : vector<18x128xf32>
    %c0_51 = arith.constant 0 : index
    %c0_52 = arith.constant 0 : index
    %97 = vector.load %arg6[%c0_51, %c0_52] : memref<1x128xf32, #tpu.memory_space<vmem>>, vector<1x128xf32>
    %98 = vector.broadcast %97 : vector<1x128xf32> to vector<18x128xf32>
    %99 = arith.addf %96, %98 : vector<18x128xf32>
    %cst_53 = arith.constant 0.000000e+00 : f32
    %100 = vector.broadcast %cst_53 : f32 to vector<18x128xf32>
    %101 = arith.maximumf %99, %100 : vector<18x128xf32>
    %102 = arith.truncf %101 : vector<18x128xf32> to vector<18x128xbf16>
    %103 = vector.shape_cast %102 : vector<18x128xbf16> to vector<2x3x3x128xbf16>
    %cst_54 = arith.constant 0.000000e+00 : f32
    %104 = vector.broadcast %cst_54 : f32 to vector<2x128xf32>
    %105 = vector.extract_strided_slice %103 {offsets = [0, 0, 0, 0], sizes = [2, 1, 1, 128], strides = [1, 1, 1, 1]} : vector<2x3x3x128xbf16> to vector<2x1x1x128xbf16>
    %106 = vector.shape_cast %105 : vector<2x1x1x128xbf16> to vector<2x128xbf16>
    %c0_55 = arith.constant 0 : index
    %c0_56 = arith.constant 0 : index
    %c0_57 = arith.constant 0 : index
    %107 = vector.load %arg7[%c0_55, %c0_56, %c0_57] : memref<9x128x128xbf16, #tpu.memory_space<vmem>>, vector<1x128x128xbf16>
    %108 = vector.shape_cast %107 : vector<1x128x128xbf16> to vector<128x128xbf16>
    %cst_58 = arith.constant dense<0.000000e+00> : vector<2x128xf32>
    %109 = tpu.matmul %106, %108, %cst_58 {dimension_numbers = #tpu.dot_dimension_numbers<[1], [0], [0], [1], [0, 0, 1, 1], [], []>} : vector<2x128xbf16>, vector<128x128xbf16>, vector<2x128xf32> -> vector<2x128xf32>
    %110 = arith.addf %104, %109 : vector<2x128xf32>
    %111 = vector.extract_strided_slice %103 {offsets = [0, 0, 1, 0], sizes = [2, 1, 1, 128], strides = [1, 1, 1, 1]} : vector<2x3x3x128xbf16> to vector<2x1x1x128xbf16>
    %112 = vector.shape_cast %111 : vector<2x1x1x128xbf16> to vector<2x128xbf16>
    %c1_59 = arith.constant 1 : index
    %c0_60 = arith.constant 0 : index
    %c0_61 = arith.constant 0 : index
    %113 = vector.load %arg7[%c1_59, %c0_60, %c0_61] : memref<9x128x128xbf16, #tpu.memory_space<vmem>>, vector<1x128x128xbf16>
    %114 = vector.shape_cast %113 : vector<1x128x128xbf16> to vector<128x128xbf16>
    %cst_62 = arith.constant dense<0.000000e+00> : vector<2x128xf32>
    %115 = tpu.matmul %112, %114, %cst_62 {dimension_numbers = #tpu.dot_dimension_numbers<[1], [0], [0], [1], [0, 0, 1, 1], [], []>} : vector<2x128xbf16>, vector<128x128xbf16>, vector<2x128xf32> -> vector<2x128xf32>
    %116 = arith.addf %110, %115 : vector<2x128xf32>
    %117 = vector.extract_strided_slice %103 {offsets = [0, 0, 2, 0], sizes = [2, 1, 1, 128], strides = [1, 1, 1, 1]} : vector<2x3x3x128xbf16> to vector<2x1x1x128xbf16>
    %118 = vector.shape_cast %117 : vector<2x1x1x128xbf16> to vector<2x128xbf16>
    %c2_63 = arith.constant 2 : index
    %c0_64 = arith.constant 0 : index
    %c0_65 = arith.constant 0 : index
    %119 = vector.load %arg7[%c2_63, %c0_64, %c0_65] : memref<9x128x128xbf16, #tpu.memory_space<vmem>>, vector<1x128x128xbf16>
    %120 = vector.shape_cast %119 : vector<1x128x128xbf16> to vector<128x128xbf16>
    %cst_66 = arith.constant dense<0.000000e+00> : vector<2x128xf32>
    %121 = tpu.matmul %118, %120, %cst_66 {dimension_numbers = #tpu.dot_dimension_numbers<[1], [0], [0], [1], [0, 0, 1, 1], [], []>} : vector<2x128xbf16>, vector<128x128xbf16>, vector<2x128xf32> -> vector<2x128xf32>
    %122 = arith.addf %116, %121 : vector<2x128xf32>
    %123 = vector.extract_strided_slice %103 {offsets = [0, 1, 0, 0], sizes = [2, 1, 1, 128], strides = [1, 1, 1, 1]} : vector<2x3x3x128xbf16> to vector<2x1x1x128xbf16>
    %124 = vector.shape_cast %123 : vector<2x1x1x128xbf16> to vector<2x128xbf16>
    %c3_67 = arith.constant 3 : index
    %c0_68 = arith.constant 0 : index
    %c0_69 = arith.constant 0 : index
    %125 = vector.load %arg7[%c3_67, %c0_68, %c0_69] : memref<9x128x128xbf16, #tpu.memory_space<vmem>>, vector<1x128x128xbf16>
    %126 = vector.shape_cast %125 : vector<1x128x128xbf16> to vector<128x128xbf16>
    %cst_70 = arith.constant dense<0.000000e+00> : vector<2x128xf32>
    %127 = tpu.matmul %124, %126, %cst_70 {dimension_numbers = #tpu.dot_dimension_numbers<[1], [0], [0], [1], [0, 0, 1, 1], [], []>} : vector<2x128xbf16>, vector<128x128xbf16>, vector<2x128xf32> -> vector<2x128xf32>
    %128 = arith.addf %122, %127 : vector<2x128xf32>
    %129 = vector.extract_strided_slice %103 {offsets = [0, 1, 1, 0], sizes = [2, 1, 1, 128], strides = [1, 1, 1, 1]} : vector<2x3x3x128xbf16> to vector<2x1x1x128xbf16>
    %130 = vector.shape_cast %129 : vector<2x1x1x128xbf16> to vector<2x128xbf16>
    %c4_71 = arith.constant 4 : index
    %c0_72 = arith.constant 0 : index
    %c0_73 = arith.constant 0 : index
    %131 = vector.load %arg7[%c4_71, %c0_72, %c0_73] : memref<9x128x128xbf16, #tpu.memory_space<vmem>>, vector<1x128x128xbf16>
    %132 = vector.shape_cast %131 : vector<1x128x128xbf16> to vector<128x128xbf16>
    %cst_74 = arith.constant dense<0.000000e+00> : vector<2x128xf32>
    %133 = tpu.matmul %130, %132, %cst_74 {dimension_numbers = #tpu.dot_dimension_numbers<[1], [0], [0], [1], [0, 0, 1, 1], [], []>} : vector<2x128xbf16>, vector<128x128xbf16>, vector<2x128xf32> -> vector<2x128xf32>
    %134 = arith.addf %128, %133 : vector<2x128xf32>
    %135 = vector.extract_strided_slice %103 {offsets = [0, 1, 2, 0], sizes = [2, 1, 1, 128], strides = [1, 1, 1, 1]} : vector<2x3x3x128xbf16> to vector<2x1x1x128xbf16>
    %136 = vector.shape_cast %135 : vector<2x1x1x128xbf16> to vector<2x128xbf16>
    %c5_75 = arith.constant 5 : index
    %c0_76 = arith.constant 0 : index
    %c0_77 = arith.constant 0 : index
    %137 = vector.load %arg7[%c5_75, %c0_76, %c0_77] : memref<9x128x128xbf16, #tpu.memory_space<vmem>>, vector<1x128x128xbf16>
    %138 = vector.shape_cast %137 : vector<1x128x128xbf16> to vector<128x128xbf16>
    %cst_78 = arith.constant dense<0.000000e+00> : vector<2x128xf32>
    %139 = tpu.matmul %136, %138, %cst_78 {dimension_numbers = #tpu.dot_dimension_numbers<[1], [0], [0], [1], [0, 0, 1, 1], [], []>} : vector<2x128xbf16>, vector<128x128xbf16>, vector<2x128xf32> -> vector<2x128xf32>
    %140 = arith.addf %134, %139 : vector<2x128xf32>
    %141 = vector.extract_strided_slice %103 {offsets = [0, 2, 0, 0], sizes = [2, 1, 1, 128], strides = [1, 1, 1, 1]} : vector<2x3x3x128xbf16> to vector<2x1x1x128xbf16>
    %142 = vector.shape_cast %141 : vector<2x1x1x128xbf16> to vector<2x128xbf16>
    %c6_79 = arith.constant 6 : index
    %c0_80 = arith.constant 0 : index
    %c0_81 = arith.constant 0 : index
    %143 = vector.load %arg7[%c6_79, %c0_80, %c0_81] : memref<9x128x128xbf16, #tpu.memory_space<vmem>>, vector<1x128x128xbf16>
    %144 = vector.shape_cast %143 : vector<1x128x128xbf16> to vector<128x128xbf16>
    %cst_82 = arith.constant dense<0.000000e+00> : vector<2x128xf32>
    %145 = tpu.matmul %142, %144, %cst_82 {dimension_numbers = #tpu.dot_dimension_numbers<[1], [0], [0], [1], [0, 0, 1, 1], [], []>} : vector<2x128xbf16>, vector<128x128xbf16>, vector<2x128xf32> -> vector<2x128xf32>
    %146 = arith.addf %140, %145 : vector<2x128xf32>
    %147 = vector.extract_strided_slice %103 {offsets = [0, 2, 1, 0], sizes = [2, 1, 1, 128], strides = [1, 1, 1, 1]} : vector<2x3x3x128xbf16> to vector<2x1x1x128xbf16>
    %148 = vector.shape_cast %147 : vector<2x1x1x128xbf16> to vector<2x128xbf16>
    %c7_83 = arith.constant 7 : index
    %c0_84 = arith.constant 0 : index
    %c0_85 = arith.constant 0 : index
    %149 = vector.load %arg7[%c7_83, %c0_84, %c0_85] : memref<9x128x128xbf16, #tpu.memory_space<vmem>>, vector<1x128x128xbf16>
    %150 = vector.shape_cast %149 : vector<1x128x128xbf16> to vector<128x128xbf16>
    %cst_86 = arith.constant dense<0.000000e+00> : vector<2x128xf32>
    %151 = tpu.matmul %148, %150, %cst_86 {dimension_numbers = #tpu.dot_dimension_numbers<[1], [0], [0], [1], [0, 0, 1, 1], [], []>} : vector<2x128xbf16>, vector<128x128xbf16>, vector<2x128xf32> -> vector<2x128xf32>
    %152 = arith.addf %146, %151 : vector<2x128xf32>
    %153 = vector.extract_strided_slice %103 {offsets = [0, 2, 2, 0], sizes = [2, 1, 1, 128], strides = [1, 1, 1, 1]} : vector<2x3x3x128xbf16> to vector<2x1x1x128xbf16>
    %154 = vector.shape_cast %153 : vector<2x1x1x128xbf16> to vector<2x128xbf16>
    %c8_87 = arith.constant 8 : index
    %c0_88 = arith.constant 0 : index
    %c0_89 = arith.constant 0 : index
    %155 = vector.load %arg7[%c8_87, %c0_88, %c0_89] : memref<9x128x128xbf16, #tpu.memory_space<vmem>>, vector<1x128x128xbf16>
    %156 = vector.shape_cast %155 : vector<1x128x128xbf16> to vector<128x128xbf16>
    %cst_90 = arith.constant dense<0.000000e+00> : vector<2x128xf32>
    %157 = tpu.matmul %154, %156, %cst_90 {dimension_numbers = #tpu.dot_dimension_numbers<[1], [0], [0], [1], [0, 0, 1, 1], [], []>} : vector<2x128xbf16>, vector<128x128xbf16>, vector<2x128xf32> -> vector<2x128xf32>
    %158 = arith.addf %152, %157 : vector<2x128xf32>
    %c0_91 = arith.constant 0 : index
    %c0_92 = arith.constant 0 : index
    %159 = vector.load %arg8[%c0_91, %c0_92] : memref<1x128xf32, #tpu.memory_space<vmem>>, vector<1x128xf32>
    %160 = vector.broadcast %159 : vector<1x128xf32> to vector<2x128xf32>
    %161 = arith.addf %158, %160 : vector<2x128xf32>
    %cst_93 = arith.constant 0.000000e+00 : f32
    %162 = vector.broadcast %cst_93 : f32 to vector<2x128xf32>
    %163 = arith.maximumf %161, %162 : vector<2x128xf32>
    %164 = vector.shape_cast %163 : vector<2x128xf32> to vector<1x2x128xf32>
    %c0_94 = arith.constant 0 : index
    %c0_95 = arith.constant 0 : index
    %c0_96 = arith.constant 0 : index
    %165 = vector.load %arg9[%c0_94, %c0_95, %c0_96] : memref<1x2x128xf32, #tpu.memory_space<vmem>>, vector<1x2x128xf32>
    tpu.vector_store %arg9[%c0_94, %c0_95, %c0_96], %164 {strides = array<i32>} : memref<1x2x128xf32, #tpu.memory_space<vmem>>, vector<1x2x128xf32>,
    return
  }
  func.func @transform_0(%arg0: i32) -> (i32, i32, i32) {
    %c0_i32 = arith.constant 0 : i32
    %c0_i32_0 = arith.constant 0 : i32
    %c0_i32_1 = arith.constant 0 : i32
    return %arg0, %c0_i32, %c0_i32_0 : i32, i32, i32
  }
  func.func @transform_1(%arg0: i32) -> (i32, i32) {
    %c0_i32 = arith.constant 0 : i32
    %c0_i32_0 = arith.constant 0 : i32
    %c0_i32_1 = arith.constant 0 : i32
    return %c0_i32, %c0_i32_0 : i32, i32
  }
  func.func @transform_2(%arg0: i32) -> (i32, i32) {
    %c0_i32 = arith.constant 0 : i32
    %c0_i32_0 = arith.constant 0 : i32
    %c0_i32_1 = arith.constant 0 : i32
    return %c0_i32, %c0_i32_0 : i32, i32
  }
  func.func @transform_3(%arg0: i32) -> (i32, i32) {
    %c0_i32 = arith.constant 0 : i32
    %c0_i32_0 = arith.constant 0 : i32
    %c0_i32_1 = arith.constant 0 : i32
    return %c0_i32, %c0_i32_0 : i32, i32
  }
  func.func @transform_4(%arg0: i32) -> (i32, i32, i32) {
    %c0_i32 = arith.constant 0 : i32
    %c0_i32_0 = arith.constant 0 : i32
    %c0_i32_1 = arith.constant 0 : i32
    %c0_i32_2 = arith.constant 0 : i32
    return %c0_i32, %c0_i32_0, %c0_i32_1 : i32, i32, i32
  }
  func.func @transform_5(%arg0: i32) -> (i32, i32) {
    %c0_i32 = arith.constant 0 : i32
    %c0_i32_0 = arith.constant 0 : i32
    %c0_i32_1 = arith.constant 0 : i32
    return %c0_i32, %c0_i32_0 : i32, i32
  }
  func.func @transform_6(%arg0: i32) -> (i32, i32, i32) {
    %c0_i32 = arith.constant 0 : i32
    %c0_i32_0 = arith.constant 0 : i32
    %c0_i32_1 = arith.constant 0 : i32
    %c0_i32_2 = arith.constant 0 : i32
    return %c0_i32, %c0_i32_0, %c0_i32_1 : i32, i32, i32
  }
  func.func @transform_7(%arg0: i32) -> (i32, i32) {
    %c0_i32 = arith.constant 0 : i32
    %c0_i32_0 = arith.constant 0 : i32
    %c0_i32_1 = arith.constant 0 : i32
    return %c0_i32, %c0_i32_0 : i32, i32
  }
  func.func @transform_8(%arg0: i32) -> (i32, i32, i32) {
    %c0_i32 = arith.constant 0 : i32
    %c0_i32_0 = arith.constant 0 : i32
    %c0_i32_1 = arith.constant 0 : i32
    return %arg0, %c0_i32, %c0_i32_0 : i32, i32, i32
  }
}

</mosaic_0001>

<bundles_post_ra>
// kernel: tpu_custom_call.1
= control target key start
LH: loop header
LB: loop body
LE: loop exit
PB: predicated region body
PF: predicated region fallthrough
CT: control target
= control target key end

     0   :  { %13 = vsyncpa [#allocation4], 0  ;;  %s7909_s0 = inlined_call_operand.vmem [shape: f32[2,4,256], index: 0, kind: input, shape index: {}]   ;;  %s7910_s1 = inlined_call_operand.vmem [shape: f32[256,49], index: 1, kind: input, shape index: {}]   ;;  %s7911_s2 = inlined_call_operand.vmem [shape: bf16[36,128], index: 2, kind: input, shape index: {}]   ;;  %s7912_s3 = inlined_call_operand.vmem [shape: f32[1,128], index: 3, kind: input, shape index: {}]   ;;  %s7913_s4 = inlined_call_operand.hbm [shape: bf16[9,128,128], index: 4, kind: input, shape index: {}]   ;;  %s7914_s5 = inlined_call_operand.vmem [shape: f32[1,128], index: 5, kind: input, shape index: {}]   ;;  %s7915_s6 = inlined_call_operand.hbm [shape: bf16[9,128,128], index: 6, kind: input, shape index: {}]   ;;  %s7916_s7 = inlined_call_operand.vmem [shape: f32[1,128], index: 7, kind: input, shape index: {}]   ;;  %s7917_s8 = inlined_call_operand.hbm [shape: f32[1,2,128], index: 8, kind: output, shape index: {}]  }
   0x1   :  { %14 = vsyncpa [#allocation7], 0 }
   0x2   :  { %15 = vsyncpa [#allocation5], 0  ;;  %s6516_s27 = smov [#allocation3]   ;;  %s6444_s9 = scalar_lea.hbm %s7913_s4, 9216 }
   0x3   :  { %s29_s28 = sshll.u32 %s6516_s27, 4  ;;  %p6445_p0 = scmp.ne.s32.totalorder %s7913_s4, %s6444_s9  ;;  %s30_s28 = int_to_ptr.vmem [resolvable:$true] %s29_s28 }
   0x4   :  { %p6448_p1 = scmp.lt.u32.totalorder %s6444_s9, %s7913_s4 }
   0x6   :  { %p6450_p2 = pnand %p6448_p1, %p6445_p0 }
   0x8   :  { %6453 = shalt.err (!%p6450_p2)
}
   0x9   :  { %s6454_s14 = scalar_lea.vmem %s30_s28, 9216  ;;  %p6459_p4 = scmp.lt.s32.totalorder %s30_s28, %s30_s28 }
   0xa   :  { %p6455_p3 = scmp.ne.s32.totalorder %s30_s28, %s6454_s14  ;;  %p6460_p5 = scmp.lt.s32.totalorder %s6454_s14, %s6454_s14 }
   0xc   :  { %p6461_p6 = por %p6460_p5, %p6459_p4 }
   0xe   :  { %p6462_p7 = pnand %p6461_p6, %p6455_p3 }
  0x10   :  { %6465 = shalt.err (!%p6462_p7)
}
  0x11   :  { %s6517_s15 = smov 64   ;;  %s6518_s16 = smov 4  }
  0x12   :  { %35 = dma.hbm_to_vmem [thread:$0]  %s7913_s4, 9216, %s30_s28, [#allocation4], %s6517_s15, %s6517_s15, %s6518_s16  }
  0x13   :  { %s6519_s19 = smov [#allocation6]   ;;  %s6466_s23 = scalar_lea.hbm %s7915_s6, 9216 }
  0x14   :  { %s43_s20 = sshll.u32 %s6519_s19, 4  ;;  %p6467_p8 = scmp.ne.s32.totalorder %s7915_s6, %s6466_s23  ;;  %s44_s20 = int_to_ptr.vmem [resolvable:$true] %s43_s20 }
  0x15   :  { %p6470_p9 = scmp.lt.u32.totalorder %s6466_s23, %s7915_s6 }
  0x17   :  { %p6472_p10 = pnand %p6470_p9, %p6467_p8 }
  0x19   :  { %6475 = shalt.err (!%p6472_p10)
}
  0x1a   :  { %s6476_s29 = scalar_lea.vmem %s44_s20, 9216  ;;  %p6481_p12 = scmp.lt.s32.totalorder %s44_s20, %s44_s20 }
  0x1b   :  { %p6477_p11 = scmp.ne.s32.totalorder %s44_s20, %s6476_s29  ;;  %p6482_p13 = scmp.lt.s32.totalorder %s6476_s29, %s6476_s29 }
  0x1d   :  { %p6483_p0 = por %p6482_p13, %p6481_p12 }
  0x1f   :  { %p6484_p1 = pnand %p6483_p0, %p6477_p11 }
  0x21   :  { %6487 = shalt.err (!%p6484_p1)
}
  0x22   :  { %49 = dma.hbm_to_vmem [thread:$0]  %s7915_s6, 9216, %s44_s20, [#allocation7], %s6517_s15, %s6517_s15, %s6518_s16  }
  0x23   :  { %6510 = dma.done.wait [#allocation4], 9216  }
  0x24   :  { %6511 = vsyncadd [#allocation4], 4294958080 }
  0x25   :  { %6512 = dma.done.wait [#allocation7], 9216  }
  0x26   :  { %6513 = vsyncadd [#allocation7], 4294958080  ;;  %v77_v0 = vld [vmem:[%s7910_s1 + $0x80] sm:$0xff]  ;;  %v78_v1 = vld [vmem:[%s7910_s1 + $0x88] sm:$0xff]  ;;  %v6520_v55 = vmov 1966171168   ;;  %v216_v57 = vlaneseq }
  0x27   :  { %v61_v2 = vld [vmem:[%s7910_s1] sm:$0xff]  ;;  %v6194_v3 = vpack.c.bf16 %v78_v1, %v77_v0  ;;  %v62_v4 = vld [vmem:[%s7910_s1 + $0x8] sm:$0xff]  ;;  %v79_v5 = vld [vmem:[%s7910_s1 + $0x90] sm:$0xff]  ;;  %v214_v56 = vunpack.c.l.s4 %v6520_v55  ;;  %v6521_v0 = vmov 1935823168   ;;  %vm625_vm0 = vcmask 27648  }
  0x28   :  { %v80_v6 = vld [vmem:[%s7910_s1 + $0x98] sm:$0xff]  ;;  %v6196_v7 = vpack.c.bf16 %v62_v4, %v61_v2  ;;  %v63_v9 = vld [vmem:[%s7910_s1 + $0x10] sm:$0xff]  ;;  %v81_v11 = vld [vmem:[%s7910_s1 + $0xa0] sm:$0xff]  ;;  %v217_v60 = vshrl.u32 %v216_v57, 7  ;;  %v453_v1 = vunpack.c.l.s4 %v6521_v0  ;;  %vm626_vm1 = vsmask.f32 3328 }
  0x29   :  { %v6198_v8 = vpack.c.bf16 %v80_v6, %v79_v5  ;;  %v64_v10 = vld [vmem:[%s7910_s1 + $0x18] sm:$0xff]  ;;  %6195 = vmatprep.subr.bf16.mxu0 %v6194_v3  ;;  %v82_v12 = vld [vmem:[%s7910_s1 + $0xa8] sm:$0xff]  ;;  %v65_v15 = vld [vmem:[%s7910_s1 + $0x20] sm:$0xff]  ;;  %v215_v59 = vunpack.c.0.s8 %v214_v56  ;;  %s6524_s28 = smov 20   ;;  %s6525_s30 = smov 24   ;;  %vm1452_vm3 = vcmask 31744  }
  0x2a   :  { %6197 = vmatpush3.bf16.msra.mxu0 %v6196_v7  ;;  %v6200_v13 = vpack.c.bf16 %v64_v10, %v63_v9  ;;  %v6202_v14 = vpack.c.bf16 %v82_v12, %v81_v11  ;;  %v66_v16 = vld [vmem:[%s7910_s1 + $0x28] sm:$0xff]  ;;  %v83_v17 = vld [vmem:[%s7910_s1 + $0xb0] sm:$0xff]  ;;  %v84_v18 = vld [vmem:[%s7910_s1 + $0xb8] sm:$0xff]  ;;  %v454_v9 = vunpack.c.0.s8 %v453_v1  ;;  %s6526_s9 = smov 16   ;;  %s6527_s10 = smov 32   ;;  %vm1483_vm4 = vcmask 64512  }
  0x2b   :  { %6199 = vmatprep.subr.bf16.mxu0 %v6198_v8  ;;  %v6204_v19 = vpack.c.bf16 %v66_v16, %v65_v15  ;;  %v6206_v20 = vpack.c.bf16 %v84_v18, %v83_v17  ;;  %v67_v21 = vld [vmem:[%s7910_s1 + $0x30] sm:$0xff]  ;;  %v68_v22 = vld [vmem:[%s7910_s1 + $0x38] sm:$0xff]  ;;  %v85_v23 = vld [vmem:[%s7910_s1 + $0xc0] sm:$0xff]  ;;  %v6705_v63 = vsub.s32 %v215_v59, %v217_v60  ;;  %s6528_s11 = smov 28   ;;  %vm1504_vm5 = vcmask 97280   ;;  %s6531_s20 = smov [#allocation8]  }
  0x2c   :  { %v86_v24 = vld [vmem:[%s7910_s1 + $0xc8] sm:$0xff]  ;;  %v69_v25 = vld [vmem:[%s7910_s1 + $0x40] sm:$0xff]  ;;  %v6208_v28 = vpack.c.bf16 %v68_v22, %v67_v21  ;;  %v87_v29 = vld [vmem:[%s7910_s1 + $0xd0] sm:$0xff]  ;;  %vm1525_vm6 = vcmask 130048   ;;  %vm1546_vm7 = vcmask 162816   ;;  %vm1567_vm8 = vcmask 195584  }
  0x2d   :  { %v70_v26 = vld [vmem:[%s7910_s1 + $0x48] sm:$0xff]  ;;  %v88_v30 = vld [vmem:[%s7910_s1 + $0xd8] sm:$0xff]  ;;  %v6210_v31 = vpack.c.bf16 %v86_v24, %v85_v23  ;;  %v71_v32 = vld [vmem:[%s7910_s1 + $0x50] sm:$0xff]  ;;  %vm1588_vm9 = vcmask 228352   ;;  %vm1609_vm10 = vcmask 261120   ;;  %vm2146_vm11 = vcmask 1041408  }
  0x2e   :  { %6201 = vmatpush3.bf16.msra.mxu0 %v6200_v13  ;;  %v6282_v27 = vld [vmem:[%s7909_s0 + $0x4] ss:$8 sps:$4 sm:$0xff]   ;;  %v72_v33 = vld [vmem:[%s7910_s1 + $0x58] sm:$0xff]  ;;  %v6212_v34 = vpack.c.bf16 %v70_v26, %v69_v25  ;;  %v6214_v37 = vpack.c.bf16 %v88_v30, %v87_v29  ;;  %v91_v41 = vld [vmem:[%s7910_s1 + $0xf0] sm:$0xff]  ;;  %vm2133_vm12 = vcmask 293888   ;;  %vm6530_vm13 = vmmov 0  }
  0x2f   :  { %6203 = vmatprep.subr.bf16.mxu0 %v6202_v14  ;;  %163 = vmatprep.mubr.f32.mxu0 %v6282_v27  ;;  %v89_v35 = vld [vmem:[%s7910_s1 + $0xe0] sm:$0xff]  ;;  %v90_v36 = vld [vmem:[%s7910_s1 + $0xe8] sm:$0xff]  ;;  %v6216_v40 = vpack.c.bf16 %v72_v33, %v71_v32  ;;  %v92_v42 = vld [vmem:[%s7910_s1 + $0xf8] sm:$0xff]  ;;  %s5334_s21 = sshll.u32 %s6531_s20, 4  ;;  %s5335_s21 = int_to_ptr.vmem [resolvable:$true] %s5334_s21 }
  0x30   :  { %v73_v38 = vld [vmem:[%s7910_s1 + $0x60] sm:$0xff]  ;;  %v74_v39 = vld [vmem:[%s7910_s1 + $0x68] sm:$0xff]  ;;  %v6218_v43 = vpack.c.bf16 %v90_v36, %v89_v35  ;;  %v75_v44 = vld [vmem:[%s7910_s1 + $0x70] sm:$0xff]  ;;  %v6222_v47 = vpack.c.bf16 %v92_v42, %v91_v41  ;;  %s6488_s22 = scalar_lea.vmem %s5335_s21, 32  ;;  %p6493_p3 = scmp.lt.s32.totalorder %s5335_s21, %s5335_s21 }
  0x31   :  { %v76_v45 = vld [vmem:[%s7910_s1 + $0x78] sm:$0xff]  ;;  %v6220_v46 = vpack.c.bf16 %v74_v39, %v73_v38  ;;  %v6280_v49 = vld [vmem:[%s7909_s0] ss:$8 sps:$4 sm:$0xff]   ;;  %vm6738_vm2 = vmand %vm625_vm0, %vm626_vm1  ;;  %s6522_s0 = smov 8   ;;  %s6523_s1 = smov 12  }
  0x32   :  { %6205 = vmatpush3.bf16.msra.mxu0 %v6204_v19  ;;  %v6224_v48 = vpack.c.bf16 %v76_v45, %v75_v44  ;;  %v6714_v19 = vsub.s32 %v454_v9, %v217_v60  ;;  %p6489_p2 = scmp.ne.s32.totalorder %s5335_s21, %s6488_s22  ;;  %p6494_p4 = scmp.lt.s32.totalorder %s6488_s22, %s6488_s22 }
  0x33   :  { %6207 = vmatprep.subr.bf16.mxu0 %v6206_v20 }
  0x34   :  { %p6495_p5 = por %p6494_p4, %p6493_p3 }
  0x36   :  { %6209 = vmatpush3.bf16.msra.mxu0 %v6208_v28  ;;  %p6496_p6 = pnand %p6495_p5, %p6489_p2 }
  0x37   :  { %6211 = vmatprep.subr.bf16.mxu0 %v6210_v31 }
  0x3a   :  { %6213 = vmatpush3.bf16.msra.mxu0 %v6212_v34 }
  0x3b   :  { %6215 = vmatprep.subr.bf16.mxu0 %v6214_v37 }
  0x3e   :  { %6217 = vmatpush3.bf16.msra.mxu0 %v6216_v40 }
  0x3f   :  { %6219 = vmatprep.subr.bf16.mxu0 %v6218_v43 }
  0x42   :  { %6221 = vmatpush3.bf16.msra.mxu0 %v6220_v46 }
  0x43   :  { %6223 = vmatprep.subr.bf16.mxu0 %v6222_v47 }
  0x46   :  { %6225 = vmatpush3.bf16.msra.mxu0 %v6224_v48 }
  0x49   :  { %164 = vmatmul.mubr.f32.vlgmr.msra.gmra.mrb[0].mxu0 %v6280_v49 }
 0x11c   :  { %v5639_v50 = vpop.f32.mrb[0].mxu0 }
 0x11d   :  { %v5640_v51 = vpop.f32.mrb[1].mxu0 }
 0x11e   :  { %v5641_v52 = vadd.f32 %v5640_v51, %v5639_v50 }
 0x120   :  { %v170_v53 = vcombine.high %v5641_v52, %v5641_v52 }
 0x122   :  { %v6243_v54 = vpack.i.bf16 %v170_v53, %v5641_v52 }
 0x124   :  { %6244 = vxpose.xlu0.b32.start.end [1/1] (short) (narrow) %v6243_v54, 56 }
 0x1a4   :  { %v6245_v58 = vpop.trf.xlu0 }
 0x1a5   :  { %v6249_v61 = vunpack.i.h.bf16 %v6245_v58  ;;  %v6246_v62 = vunpack.i.l.bf16 %v6245_v58 }
 0x1a8   :  { %v6250_v2 = vpop.trf.xlu0 }
 0x1a9   :  { %v6254_v3 = vunpack.i.h.bf16 %v6250_v2  ;;  %v6251_v4 = vunpack.i.l.bf16 %v6250_v2 }
 0x1ab   :  { %v5356_v5 = vpack.c.bf16 %v6254_v3, %v6254_v3  ;;  %v204_v6 = vpack.c.bf16 %v6251_v4, %v6246_v62  ;;  %v5344_v7 = vpack.c.bf16 %v6251_v4, %v6251_v4  ;;  %v681_v8 = vpack.c.bf16 %v6254_v3, %v6249_v61  ;;  %v628_v3 = vld [vmem:[#allocation2] sm:$0xf] }
 0x1ac   :  { %v6711_v14 = vpop.trf.xlu0 }
 0x1ad   :  { %v703_v10 = vrot.slane %v5356_v5, %v6705_v63  ;;  %v219_v11 = vrot.slane %v204_v6, %v6705_v63  ;;  %v226_v12 = vrot.slane %v5344_v7, %v6705_v63  ;;  %v696_v13 = vrot.slane %v681_v8, %v6705_v63 }
 0x1ae   :  { %v6256_v41 = vunpack.i.l.bf16 %v6711_v14 }
 0x1af   :  { %v705_v15 = vcombine.high %v703_v10, %v703_v10  ;;  %v719_v16 = vrot.slane %v703_v10, %v6705_v63  ;;  %v227_v17 = vcombine.high %v219_v11, %v219_v11  ;;  %v228_v18 = vcombine.high %v226_v12, %v226_v12 }
 0x1b0   :  { %v235_v20 = vrot.slane %v219_v11, %v6705_v63  ;;  %v242_v21 = vrot.slane %v226_v12, %v6705_v63  ;;  %v704_v22 = vcombine.high %v696_v13, %v696_v13  ;;  %v712_v34 = vrot.slane %v696_v13, %v6705_v63  ;;  %v6260_v42 = vpop.trf.xlu0  ;;  %v631_v12 = vld [vmem:[#allocation2 + $0x4] sm:$0xf] }
 0x1b1   :  { %v6719_v23 = vrot.slane %v705_v15, %v6705_v63  ;;  %v735_v24 = vcombine.high %v719_v16, %v719_v16  ;;  %v859_v25 = vunpack.i.h.s16 %v719_v16  ;;  %v249_v26 = vrot.slane %v227_v17, %v6705_v63 }
 0x1b2   :  { %v6723_v27 = vrot.slane %v228_v18, %v6705_v63  ;;  %v257_v28 = vcombine.high %v235_v20, %v235_v20  ;;  %v258_v29 = vcombine.high %v242_v21, %v242_v21  ;;  %v382_v30 = vunpack.i.h.s16 %v242_v21 }
 0x1b3   :  { %v863_v31 = vunpack.i.h.s16 %v735_v24  ;;  %v5360_v32 = vpack.i.b16 %v6719_v23, %v859_v25  ;;  %v259_v33 = vcombine.high %v249_v26, %v249_v26  ;;  %v861_v43 = vunpack.i.h.s16 %v6719_v23 }
 0x1b4   :  { %v384_v35 = vunpack.i.h.s16 %v6723_v27  ;;  %v386_v36 = vunpack.i.h.s16 %v258_v29  ;;  %v5348_v37 = vpack.i.b16 %v6723_v27, %v382_v30  ;;  %v450_v38 = vcombine.low %v235_v20, %v257_v28  ;;  %v1103_v28 = vld [vmem:[#allocation2 + $0x1c] sm:$0xf] }
 0x1b5   :  { %v379_v39 = vunpack.i.l.s16 %v259_v33  ;;  %v380_v40 = vunpack.i.h.s16 %v259_v33  ;;  %v952_v44 = vcombine.low %v5360_v32, %v863_v31  ;;  %v726_v46 = vrot.slane %v704_v22, %v6705_v63 }
 0x1b6   :  { %v5349_v45 = vpack.i.b16 %v258_v29, %v384_v35  ;;  %v475_v49 = vcombine.low %v5348_v37, %v386_v36  ;;  %v734_v50 = vcombine.high %v712_v34, %v712_v34  ;;  %v458_v51 = vrot.slane %v450_v38, %v6714_v19  ;;  %v1106_v36 = vld [vmem:[#allocation2 + $0x20] sm:$0xf] }
 0x1b7   :  { %v5347_v47 = vpack.i.b16 %v242_v21, %v380_v40  ;;  %v451_v48 = vcombine.low %v249_v26, %v379_v39  ;;  %v736_v52 = vcombine.high %v726_v46, %v726_v46  ;;  %v6264_v53 = vunpack.i.h.bf16 %v6260_v42 }
 0x1b8   :  { %v927_v56 = vcombine.low %v712_v34, %v734_v50  ;;  %v6261_v60 = vunpack.i.l.bf16 %v6260_v42  ;;  %v5361_v61 = vpack.i.b16 %v735_v24, %v861_v43  ;;  %v489_v1 = vrot.slane %v475_v49, %v6714_v19 }
 0x1b9   :  { %v465_v54 = vrot.slane %v451_v48, %v6714_v19  ;;  %v474_v55 = vcombine.low %v5347_v47, %v5349_v45  ;;  %v856_v57 = vunpack.i.l.s16 %v736_v52  ;;  %v857_v58 = vunpack.i.h.s16 %v736_v52 }
 0x1ba   :  { %v5357_v59 = vpack.c.bf16 %v6264_v53, %v6264_v53  ;;  %v205_v7 = vpack.c.bf16 %v6261_v60, %v6256_v41  ;;  %v6259_v10 = vunpack.i.h.bf16 %v6711_v14  ;;  %v5345_v11 = vpack.c.bf16 %v6261_v60, %v6261_v60 }
 0x1bb   :  { %v466_v62 = vcombine.low %v458_v51, %v465_v54  ;;  %v482_v0 = vrot.slane %v474_v55, %v6714_v19  ;;  %v5359_v4 = vpack.i.b16 %v719_v16, %v857_v58  ;;  %v928_v5 = vcombine.low %v726_v46, %v856_v57 }
 0x1bc   :  { %v752_v6 = vrot.slane %v5357_v59, %v6705_v63  ;;  %v966_v13 = vrot.slane %v952_v44, %v6714_v19  ;;  %v935_v15 = vrot.slane %v927_v56, %v6714_v19  ;;  %v268_v21 = vrot.slane %v205_v7, %v6705_v63 }
 0x1bd   :  { %v473_v8 = vrot.slane %v466_v62, %v6714_v19  ;;  %v490_v9 = vcombine.low %v482_v0, %v489_v1  ;;  %v942_v17 = vrot.slane %v928_v5, %v6714_v19  ;;  %v951_v18 = vcombine.low %v5359_v4, %v5361_v61 }
 0x1be   :  { %v275_v22 = vrot.slane %v5345_v11, %v6705_v63  ;;  %v754_v25 = vcombine.high %v752_v6, %v752_v6  ;;  %v6755_v26 = vrot.slane %v752_v6, %v6705_v63  ;;  %v276_v30 = vcombine.high %v268_v21, %v268_v21  ;;  %v634_v11 = vld [vmem:[#allocation2 + $0x8] sm:$0xf] }
 0x1bf   :  { %v497_v16 = vrot.slane %v490_v9, %v6714_v19  ;;  %v629_v20 = vsel %vm6738_vm2, %v473_v8, %v628_v3  ;;  %v943_v14 = vcombine.low %v935_v15, %v942_v17  ;;  %v959_v24 = vrot.slane %v951_v18, %v6714_v19 }
 0x1c0   :  { %630 = vst [vmem:[#allocation2] sm:$0xf] %v629_v20  ;;  %v277_v31 = vcombine.high %v275_v22, %v275_v22  ;;  %v284_v32 = vrot.slane %v268_v21, %v6705_v63  ;;  %v260_v35 = vcombine.high %v6723_v27, %v6723_v27  ;;  %v6764_v37 = vrot.slane %v275_v22, %v6705_v63  ;;  %v6776_v27 = vpop.trf.xlu0 }
 0x1c1   :  { %v632_v29 = vsel %vm6738_vm2, %v497_v16, %v631_v12  ;;  %v950_v33 = vrot.slane %v943_v14, %v6714_v19  ;;  %v967_v34 = vcombine.low %v959_v24, %v966_v13  ;;  %v298_v38 = vrot.slane %v276_v30, %v6705_v63 }
 0x1c2   :  { %633 = vst [vmem:[#allocation2 + $0x4] sm:$0xf] %v632_v29  ;;  %v6768_v39 = vrot.slane %v277_v31, %v6705_v63  ;;  %v682_v40 = vpack.c.bf16 %v6264_v53, %v6259_v10  ;;  %v6774_v43 = vrot.slane %v754_v25, %v6705_v63  ;;  %v306_v44 = vcombine.high %v284_v32, %v284_v32 }
 0x1c3   :  { %v974_v41 = vrot.slane %v967_v34, %v6714_v19  ;;  %v1104_v42 = vsel %vm6738_vm2, %v950_v33, %v1103_v28  ;;  %v875_v45 = vunpack.i.h.s16 %v6755_v26  ;;  %v308_v46 = vcombine.high %v298_v38, %v298_v38  ;;  %v637_v28 = vld [vmem:[#allocation2 + $0xc] sm:$0xf] }
 0x1c4   :  { %1105 = vst [vmem:[#allocation2 + $0x1c] sm:$0xf] %v1104_v42  ;;  %v398_v47 = vunpack.i.h.s16 %v6764_v37  ;;  %v393_v49 = vunpack.i.l.s16 %v306_v44  ;;  %v394_v50 = vunpack.i.h.s16 %v306_v44  ;;  %v498_v51 = vcombine.low %v260_v35, %v298_v38  ;;  %v6270_v4 = vpop.trf.xlu0 }
 0x1c5   :  { %v1107_v48 = vsel %vm6738_vm2, %v974_v41, %v1106_v36  ;;  %v396_v52 = vunpack.i.h.s16 %v308_v46  ;;  %v400_v53 = vunpack.i.h.s16 %v6768_v39  ;;  %v745_v55 = vrot.slane %v682_v40, %v6705_v63 }
 0x1c6   :  { %1108 = vst [vmem:[#allocation2 + $0x20] sm:$0xf] %v1107_v48  ;;  %v5352_v54 = vpack.i.b16 %v6768_v39, %v398_v47  ;;  %v877_v56 = vunpack.i.h.s16 %v6774_v43  ;;  %v5350_v57 = vpack.i.b16 %v308_v46, %v394_v50  ;;  %v499_v58 = vcombine.low %v284_v32, %v393_v49 }
 0x1c7   :  { %v5351_v59 = vpack.i.b16 %v6764_v37, %v396_v52  ;;  %v753_v60 = vcombine.high %v745_v55, %v745_v55  ;;  %v761_v61 = vrot.slane %v745_v55, %v6705_v63  ;;  %v5364_v62 = vpack.i.b16 %v6774_v43, %v875_v45  ;;  %v6805_v40 = vld [vmem:[#allocation2] sm:$0xf]  ;;  %v1109_v45 = vld [vmem:[#allocation2 + $0x24] sm:$0xf] }
 0x1c8   :  { %v506_v0 = vrot.slane %v498_v51, %v6714_v19  ;;  %v513_v1 = vrot.slane %v499_v58, %v6714_v19  ;;  %v522_v3 = vcombine.low %v5350_v57, %v5352_v54  ;;  %v737_v10 = vcombine.high %v6719_v23, %v6719_v23 }
 0x1c9   :  { %v523_v5 = vcombine.low %v5351_v59, %v400_v53  ;;  %v775_v6 = vrot.slane %v753_v60, %v6705_v63  ;;  %v783_v7 = vcombine.high %v761_v61, %v761_v61  ;;  %v6266_v20 = vunpack.i.l.bf16 %v6776_v27  ;;  %v1112_v60 = vld [vmem:[#allocation2 + $0x28] sm:$0xf] }
 0x1ca   :  { %v514_v8 = vcombine.low %v506_v0, %v513_v1  ;;  %v530_v9 = vrot.slane %v522_v3, %v6714_v19  ;;  %v6271_v21 = vunpack.i.l.bf16 %v6270_v4  ;;  %v6269_v30 = vunpack.i.h.bf16 %v6776_v27 }
 0x1cb   :  { %v537_v12 = vrot.slane %v523_v5, %v6714_v19  ;;  %v785_v13 = vcombine.high %v775_v6, %v775_v6  ;;  %v870_v15 = vunpack.i.l.s16 %v783_v7  ;;  %v871_v17 = vunpack.i.h.s16 %v783_v7 }
 0x1cc   :  { %v521_v18 = vrot.slane %v514_v8, %v6714_v19  ;;  %v975_v16 = vcombine.low %v737_v10, %v775_v6  ;;  %v6274_v31 = vunpack.i.h.bf16 %v6270_v4  ;;  %v206_v38 = vpack.c.bf16 %v6271_v21, %v6266_v20 }
 0x1cd   :  { %v538_v22 = vcombine.low %v530_v9, %v537_v12  ;;  %v873_v14 = vunpack.i.h.s16 %v785_v13  ;;  %v5362_v24 = vpack.i.b16 %v785_v13, %v871_v17  ;;  %v976_v25 = vcombine.low %v761_v61, %v870_v15  ;;  %v6848_v13 = vld [vmem:[#allocation2 + $0x20] sm:$0xf]  ;;  %v6850_v15 = vld [vmem:[#allocation2 + $0x4] sm:$0xf] }
 0x1ce   :  { %v635_v23 = vsel %vm6738_vm2, %v521_v18, %v634_v11  ;;  %v983_v29 = vrot.slane %v975_v16, %v6714_v19  ;;  %v5358_v36 = vpack.c.bf16 %v6274_v31, %v6274_v31  ;;  %v5346_v46 = vpack.c.bf16 %v6271_v21, %v6271_v21 }
 0x1cf   :  { %v545_v32 = vrot.slane %v538_v22, %v6714_v19  ;;  %636 = vst [vmem:[#allocation2 + $0x8] sm:$0xf] %v635_v23  ;;  %v5363_v33 = vpack.i.b16 %v6755_v26, %v873_v14  ;;  %v990_v34 = vrot.slane %v976_v25, %v6714_v19  ;;  %v999_v35 = vcombine.low %v5362_v24, %v5364_v62 }
 0x1d0   :  { %v317_v47 = vrot.slane %v206_v38, %v6705_v63  ;;  %v683_v48 = vpack.c.bf16 %v6274_v31, %v6269_v30  ;;  %v307_v51 = vcombine.high %v6764_v37, %v6764_v37  ;;  %v6817_v52 = vcombine.low %v6805_v40, %v6805_v40 }
 0x1d1   :  { %v638_v41 = vsel %vm6738_vm2, %v545_v32, %v637_v28  ;;  %v991_v42 = vcombine.low %v983_v29, %v990_v34  ;;  %v1000_v44 = vcombine.low %v5363_v33, %v877_v56  ;;  %v1007_v27 = vrot.slane %v999_v35, %v6714_v19 }
 0x1d2   :  { %639 = vst [vmem:[#allocation2 + $0xc] sm:$0xf] %v638_v41  ;;  %v6820_v53 = vrot.slane %v5358_v36, %v6705_v63  ;;  %v6823_v54 = vrot.slane %v5346_v46, %v6705_v63  ;;  %v325_v55 = vcombine.high %v317_v47, %v317_v47  ;;  %v333_v56 = vrot.slane %v317_v47, %v6705_v63  ;;  %v640_v36 = vld [vmem:[#allocation2 + $0x10] sm:$0xf] }
 0x1d3   :  { %v998_v49 = vrot.slane %v991_v42, %v6714_v19  ;;  %v1014_v50 = vrot.slane %v1000_v44, %v6714_v19  ;;  %v794_v59 = vrot.slane %v683_v48, %v6705_v63  ;;  %v1258_v37 = vrot.slane %v6817_v52, 1  ;;  %v6873_v48 = vld [vmem:[#allocation2 + $0x1c] sm:$0xf] }
 0x1d4   :  { %v309_v61 = vcombine.high %v6768_v39, %v6768_v39  ;;  %v6834_v62 = vrot.slane %v6823_v54, %v6705_v63  ;;  %v347_v0 = vrot.slane %v325_v55, %v6705_v63  ;;  %v355_v3 = vcombine.high %v333_v56, %v333_v56 }
 0x1d5   :  { %v1015_v57 = vcombine.low %v1007_v27, %v1014_v50  ;;  %v1110_v58 = vsel %vm6738_vm2, %v998_v49, %v1109_v45  ;;  %v546_v4 = vcombine.low %v307_v51, %v333_v56  ;;  %v802_v5 = vcombine.high %v794_v59, %v794_v59  ;;  %1268 = vrot.lane.b32.xlu1 %v1258_v37, %s6522_s0  ;;  %v643_v37 = vld [vmem:[#allocation2 + $0x14] sm:$0xf] }
 0x1d6   :  { %1111 = vst [vmem:[#allocation2 + $0x24] sm:$0xf] %v1110_v58  ;;  %v786_v6 = vcombine.high %v6774_v43, %v6774_v43  ;;  %v357_v7 = vcombine.high %v347_v0, %v347_v0  ;;  %v407_v39 = vunpack.i.l.s16 %v347_v0  ;;  %v408_v8 = vunpack.i.h.s16 %v347_v0 }
 0x1d7   :  { %v1022_v1 = vrot.slane %v1015_v57, %v6714_v19  ;;  %v6845_v10 = vrot.slane %v6820_v53, %v6705_v63  ;;  %v410_v11 = vunpack.i.h.s16 %v355_v3  ;;  %v414_v12 = vunpack.i.h.s16 %v6834_v62 }
 0x1d8   :  { %v412_v17 = vunpack.i.h.s16 %v357_v7  ;;  %v5353_v43 = vpack.i.b16 %v355_v3, %v408_v8  ;;  %v547_v18 = vcombine.low %v309_v61, %v407_v39  ;;  %v554_v16 = vrot.slane %v546_v4, %v6714_v19 }
 0x1d9   :  { %v1113_v9 = vsel %vm6738_vm2, %v1022_v1, %v1112_v60  ;;  %v5354_v20 = vpack.i.b16 %v357_v7, %v410_v11  ;;  %v784_v21 = vcombine.high %v6755_v26, %v6755_v26  ;;  %v810_v22 = vrot.slane %v794_v59, %v6705_v63  ;;  %v6881_v59 = vld [vmem:[#allocation2 + $0x8] sm:$0xf] }
 0x1da   :  { %1114 = vst [vmem:[#allocation2 + $0x28] sm:$0xf] %v1113_v9  ;;  %v824_v14 = vrot.slane %v802_v5, %v6705_v63  ;;  %v5355_v24 = vpack.i.b16 %v6834_v62, %v412_v17  ;;  %v561_v25 = vrot.slane %v547_v18, %v6714_v19  ;;  %v6861_v28 = vcombine.low %v6848_v13, %v6848_v13  ;;  %v1115_v5 = vld [vmem:[#allocation2 + $0x2c] sm:$0xf]  ;;  %v1118_v18 = vld [vmem:[#allocation2 + $0x30] sm:$0xf] }
 0x1db   :  { %v6865_v23 = vcombine.low %v6850_v15, %v6850_v15  ;;  %v571_v29 = vcombine.low %v5354_v20, %v414_v12  ;;  %v832_v30 = vcombine.high %v810_v22, %v810_v22  ;;  %v891_v32 = vunpack.i.h.s16 %v6845_v10 }
 0x1dc   :  { %v834_v31 = vcombine.high %v824_v14, %v824_v14  ;;  %v884_v26 = vunpack.i.l.s16 %v824_v14  ;;  %v562_v33 = vcombine.low %v554_v16, %v561_v25  ;;  %v570_v34 = vcombine.low %v5353_v43, %v5355_v24 }
 0x1dd   :  { %v885_v35 = vunpack.i.h.s16 %v824_v14  ;;  %1294 = vrot.lane.b32.xlu1 %v6865_v23, %s6523_s1  ;;  %v585_v38 = vrot.slane %v571_v29, %v6714_v19  ;;  %v887_v41 = vunpack.i.h.s16 %v832_v30  ;;  %v1023_v44 = vcombine.low %v784_v21, %v810_v22  ;;  %v6275_v14 = vpop.trf.xlu0 }
 0x1de   :  { %v889_v42 = vunpack.i.h.s16 %v834_v31  ;;  %v569_v27 = vrot.slane %v562_v33, %v6714_v19  ;;  %v578_v45 = vrot.slane %v570_v34, %v6714_v19  ;;  %v1024_v47 = vcombine.low %v786_v6, %v884_v26  ;;  %v6924_v33 = vld [vmem:[#allocation2 + $0x24] sm:$0xf] }
 0x1df   :  { %v5365_v46 = vpack.i.b16 %v832_v30, %v885_v35  ;;  %v5366_v49 = vpack.i.b16 %v834_v31, %v887_v41  ;;  %v1031_v51 = vrot.slane %v1023_v44, %v6714_v19  ;;  %v1264_v55 = vrot.slane %v6861_v28, 1 }
 0x1e0   :  { %v5367_v50 = vpack.i.b16 %v6845_v10, %v889_v42  ;;  %v586_v56 = vcombine.low %v578_v45, %v585_v38  ;;  %v641_v57 = vsel %vm6738_vm2, %v569_v27, %v640_v36  ;;  %v1038_v58 = vrot.slane %v1024_v47, %v6714_v19 }
 0x1e1   :  { %642 = vst [vmem:[#allocation2 + $0x10] sm:$0xf] %v641_v57  ;;  %v1048_v61 = vcombine.low %v5366_v49, %v891_v32  ;;  %1360 = vrot.lane.b32.xlu0 %v1264_v55, %s6524_s28  ;;  %v1259_v0 = vrot.slane %v6865_v23, 1  ;;  %v6887_v1 = vcombine.low %v6873_v48, %v6873_v48  ;;  %v6894_v39 = vcombine.low %v6881_v59, %v6881_v59 }
 0x1e2   :  { %v1047_v60 = vcombine.low %v5365_v46, %v5367_v50  ;;  %v593_v3 = vrot.slane %v586_v56, %v6714_v19  ;;  %v1039_v4 = vcombine.low %v1031_v51, %v1038_v58  ;;  %v1178_v8 = vshll.u32 %v6865_v23, 16 }
 0x1e3   :  { %v1062_v7 = vrot.slane %v1048_v61, %v6714_v19  ;;  %1270 = vrot.lane.b32.xlu1 %v1259_v0, %s6522_s0  ;;  %v803_v9 = vcombine.high %v6820_v53, %v6820_v53  ;;  %v1263_v43 = vrot.slane %v6887_v1, 1  ;;  %v326_v16 = vcombine.high %v6823_v54, %v6823_v54 }
 0x1e4   :  { %v1055_v6 = vrot.slane %v1047_v60, %v6714_v19  ;;  %v644_v11 = vsel %vm6738_vm2, %v593_v3, %v643_v37  ;;  %v1046_v12 = vrot.slane %v1039_v4, %v6714_v19  ;;  %v1180_v21 = vrot.slane %v1178_v8, 1  ;;  %v6956_v8 = vld [vmem:[#allocation2 + $0xc] sm:$0xf] }
 0x1e5   :  { %645 = vst [vmem:[#allocation2 + $0x14] sm:$0xf] %v644_v11  ;;  %1376 = vrot.lane.b32.xlu0 %v6894_v39, %s6525_s30  ;;  %v831_v22 = vrot.slane %v803_v9, %v6705_v63  ;;  %v1176_v25 = vshrl.u32 %v6865_v23, 16  ;;  %v1171_v54 = vshll.u32 %v6817_v52, 16  ;;  %v354_v29 = vrot.slane %v326_v16, %v6705_v63  ;;  %v1121_v9 = vld [vmem:[#allocation2 + $0x34] sm:$0xf] }
 0x1e6   :  { %v1063_v17 = vcombine.low %v1055_v6, %v1062_v7  ;;  %v1116_v53 = vsel %vm6738_vm2, %v1046_v12, %v1115_v5  ;;  %v1213_v31 = vshll.u32 %v6861_v28, 16  ;;  %v6279_v26 = vunpack.i.h.bf16 %v6275_v14 }
 0x1e7   :  { %1117 = vst [vmem:[#allocation2 + $0x2c] sm:$0xf] %v1116_v53  ;;  %1278 = vrot.lane.b32.xlu1 %v1263_v43, %s6522_s0  ;;  %v6919_v30 = vor.u32 %v1180_v21, %v1176_v25  ;;  %v835_v32 = vcombine.high %v831_v22, %v831_v22  ;;  %v6276_v34 = vunpack.i.l.bf16 %v6275_v14  ;;  %v1173_v23 = vrot.slane %v1171_v54, 1 }
 0x1e8   :  { %v1070_v20 = vrot.slane %v1063_v17, %v6714_v19  ;;  %v684_v35 = vpack.c.bf16 %v6279_v26, %v6279_v26  ;;  %v358_v36 = vcombine.high %v354_v29, %v354_v29  ;;  %v6930_v41 = vcombine.low %v6924_v33, %v6924_v33  ;;  %v646_v17 = vld [vmem:[#allocation2 + $0x18] sm:$0xf] }
 0x1e9   :  { %1280 = vrot.lane.b32.xlu0 %v1264_v55, %s6522_s0  ;;  %v207_v38 = vpack.c.bf16 %v6276_v34, %v6276_v34  ;;  %v1215_v42 = vrot.slane %v1213_v31, 1  ;;  %v1169_v44 = vshrl.u32 %v6817_v52, 16  ;;  %v1071_v45 = vcombine.low %v831_v22, %v835_v32 }
 0x1ea   :  { %v1119_v24 = vsel %vm6738_vm2, %v1070_v20, %v1118_v18  ;;  %v842_v27 = vrot.slane %v684_v35, %v6705_v63  ;;  %v1211_v46 = vshrl.u32 %v6861_v28, 16  ;;  %v1206_v50 = vshll.u32 %v6887_v1, 16 }
 0x1eb   :  { %1120 = vst [vmem:[#allocation2 + $0x30] sm:$0xf] %v1119_v24  ;;  %1304 = vrot.lane.b32.xlu1 %v6861_v28, %s6523_s1  ;;  %v365_v47 = vrot.slane %v207_v38, %v6705_v63  ;;  %v1174_v49 = vor.u32 %v1173_v23, %v1169_v44  ;;  %v833_v55 = vcombine.high %v6845_v10, %v6845_v10  ;;  %v1265_v12 = vrot.slane %v6930_v41, 1  ;;  %v6992_v23 = vld [vmem:[#allocation2 + $0x10] sm:$0xf] }
 0x1ec   :  { %v849_v51 = vrot.slane %v842_v27, %v6705_v63  ;;  %v594_v56 = vcombine.low %v354_v29, %v358_v36  ;;  %v356_v52 = vcombine.high %v6834_v62, %v6834_v62  ;;  %v1216_v28 = vor.u32 %v1215_v42, %v1211_v46  ;;  %v6981_v29 = vld [vmem:[#allocation2 + $0x28] sm:$0xf]  ;;  %v7014_v27 = vld [vmem:[#allocation2 + $0x14] ss:$0 sps:$4 sm:$0xff]  }
 0x1ed   :  { %1240 = vrot.lane.b32.xlu0 %v6919_v30, %s6518_s16  ;;  %v372_v57 = vrot.slane %v365_v47, %v6705_v63  ;;  %v1079_v60 = vrot.slane %v1071_v45, %v6714_v19  ;;  %v1208_v61 = vrot.slane %v1206_v50, 1  ;;  %v1204_v62 = vshrl.u32 %v6887_v1, 16 }
 0x1ee   :  { %v898_v58 = vunpack.i.l.s16 %v849_v51  ;;  %v602_v10 = vrot.slane %v594_v56, %v6714_v19  ;;  %v5371_v18 = vcombine.low %v6956_v8, %v6956_v8  ;;  %v1260_v16 = vrot.slane %v6894_v39, 1 }
 0x1ef   :  { %1350 = vrot.lane.b32.xlu1 %v1259_v0, %s6524_s28  ;;  %v421_v37 = vunpack.i.l.s16 %v372_v57  ;;  %v1209_v6 = vor.u32 %v1208_v61, %v1204_v62  ;;  %v1185_v22 = vshll.u32 %v6894_v39, 16  ;;  %v1220_v14 = vshll.u32 %v6930_v41, 16 }
 0x1f0   :  { %v1072_v0 = vcombine.low %v833_v55, %v898_v58  ;;  %v1261_v21 = vrot.slane %v5371_v18, 1  ;;  %v1183_v2 = vshrl.u32 %v6894_v39, 16  ;;  %v1218_v54 = vshrl.u32 %v6930_v41, 16 }
 0x1f1   :  { %1386 = vrot.lane.b32.xlu0 %v6930_v41, %s6525_s30  ;;  %v595_v3 = vcombine.low %v356_v52, %v421_v37  ;;  %v1222_v25 = vrot.slane %v1220_v14, 1  ;;  %v1190_v32 = vshrl.u32 %v5371_v18, 16  ;;  %v7001_v36 = vcombine.low %v6992_v23, %v6992_v23 }
 0x1f2   :  { %v1086_v4 = vrot.slane %v1072_v0, %v6714_v19  ;;  %v1348_v51 = vrot.slane %v7014_v27, 1  ;;  %v7038_v57 = vld [vmem:[#allocation2 + $0x30] ss:$0 sps:$4 sm:$0xff]   ;;  %v1317_v0 = vshll.u32 %v7014_v27, 16 }
 0x1f3   :  { %1238 = vrot.lane.b32.xlu1 %v1174_v49, %s6518_s16  ;;  %v609_v5 = vrot.slane %v595_v3, %v6714_v19  ;;  %v1223_v31 = vor.u32 %v1222_v25, %v1218_v54  ;;  %v1262_v38 = vrot.slane %v7001_v36, 1 }
 0x1f4   :  { %v1087_v7 = vcombine.low %v1079_v60, %v1086_v4  ;;  %v1319_v3 = vrot.slane %v1317_v0, 1 }
 0x1f5   :  { %1338 = vrot.lane.b32.xlu0 %v1216_v28, %s6526_s9  ;;  %v610_v11 = vcombine.low %v602_v10, %v609_v5  ;;  %v1315_v10 = vshrl.u32 %v7014_v27, 16 }
 0x1f6   :  { %v1094_v43 = vrot.slane %v1087_v7, %v6714_v19 }
 0x1f7   :  { %1296 = vrot.lane.b32.xlu1 %v6894_v39, %s6523_s1  ;;  %v617_v1 = vrot.slane %v610_v11, %v6714_v19  ;;  %v1187_v19 = vrot.slane %v1185_v22, 1  ;;  %v5376_v39 = vcombine.low %v6981_v29, %v6981_v29  ;;  %v1320_v4 = vor.u32 %v1319_v3, %v1315_v10 }
 0x1f8   :  { %v1122_v53 = vsel %vm6738_vm2, %v1094_v43, %v1121_v9 }
 0x1f9   :  { %1250 = vrot.lane.b32.xlu0 %v1216_v28, %s6518_s16  ;;  %v647_v20 = vsel %vm6738_vm2, %v617_v1, %v646_v17  ;;  %1123 = vst [vmem:[#allocation2 + $0x34] sm:$0xf] %v1122_v53  ;;  %v1188_v24 = vor.u32 %v1187_v19, %v1183_v2  ;;  %v1266_v26 = vrot.slane %v5376_v39, 1  ;;  %v1227_v44 = vshll.u32 %v5376_v39, 16 }
 0x1fa   :  { %648 = vst [vmem:[#allocation2 + $0x18] sm:$0xf] %v647_v20  ;;  %v1225_v45 = vshrl.u32 %v5376_v39, 16 }
 0x1fb   :  { %1248 = vrot.lane.b32.xlu1 %v1209_v6, %s6518_s16  ;;  %v1229_v46 = vrot.slane %v1227_v44, 1 }
 0x1fd   :  { %1282 = vrot.lane.b32.xlu0 %v1265_v12, %s6522_s0  ;;  %v7019_v47 = vor.u32 %v1229_v46, %v1225_v45 }
 0x1ff   :  { %1272 = vrot.lane.b32.xlu1 %v1260_v16, %s6522_s0 }
 0x200   :  { %v6296_v5 = vld [vmem:[#allocation2 + $0x34] ss:$0 sps:$4 sm:$0xff]  }
 0x201   :  { %1354 = vrot.lane.b32.xlu0 %v1261_v21, %s6524_s28  ;;  %v7024_v49 = vld [vmem:[#allocation2 + $0x18] ss:$0 sps:$4 sm:$0xff]   ;;  %v1406_v7 = vshll.u32 %v6296_v5, 16  ;;  %v1404_v11 = vshrl.u32 %v6296_v5, 16  ;;  %v1431_v53 = vrot.slane %v6296_v5, 1 }
 0x202   :  { %v1399_v55 = vshll.u32 %v7024_v49, 16  ;;  %v1397_v56 = vshrl.u32 %v7024_v49, 16  ;;  %v1430_v25 = vrot.slane %v7024_v49, 1 }
 0x203   :  { %1352 = vrot.lane.b32.xlu1 %v1260_v16, %s6524_s28 }
 0x204   :  { %v1401_v52 = vrot.slane %v1399_v55, 1 }
 0x205   :  { %1434 = vrot.lane.b32.xlu0 %v1261_v21, %s6527_s10 }
 0x206   :  { %v1402_v58 = vor.u32 %v1401_v52, %v1397_v56 }
 0x207   :  { %1328 = vrot.lane.b32.xlu1 %v6919_v30, %s6526_s9  ;;  %v1192_v30 = vshll.u32 %v5371_v18, 16 }
 0x209   :  { %1410 = vrot.lane.b32.xlu0 %v1188_v24, %s6528_s11  ;;  %v1194_v34 = vrot.slane %v1192_v30, 1 }
 0x20b   :  { %1306 = vrot.lane.b32.xlu1 %v6930_v41, %s6523_s1  ;;  %v6994_v35 = vor.u32 %v1194_v34, %v1190_v32  ;;  %v7005_v41 = vld [vmem:[#allocation2 + $0x2c] sm:$0xf] }
 0x20c   :  { %v5377_v42 = vcombine.low %v7005_v41, %v7005_v41 }
 0x20d   :  { %1340 = vrot.lane.b32.xlu0 %v1223_v31, %s6526_s9 }
 0x20e   :  { %v7026_v50 = vrot.slane %v5377_v42, 1  ;;  %v1234_v28 = vshll.u32 %v5377_v42, 16  ;;  %v1232_v37 = vshrl.u32 %v5377_v42, 16 }
 0x20f   :  { %1432 = vrot.lane.b32.xlu1 %v1260_v16, %s6527_s10 }
 0x210   :  { %v1236_v60 = vrot.slane %v1234_v28, 1 }
 0x211   :  { %1284 = vrot.lane.b32.xlu0 %v1266_v26, %s6522_s0 }
 0x212   :  { %v1237_v61 = vor.u32 %v1236_v60, %v1232_v37 }
 0x213   :  { %1298 = vrot.lane.b32.xlu1 %v5371_v18, %s6523_s1 }
 0x215   :  { %1364 = vrot.lane.b32.xlu0 %v1266_v26, %s6524_s28 }
 0x217   :  { %1378 = vrot.lane.b32.xlu1 %v5371_v18, %s6525_s30 }
 0x219   :  { %1332 = vrot.lane.b32.xlu0 %v6994_v35, %s6526_s9 }
 0x21b   :  { %1442 = vrot.lane.b32.xlu1 %v1265_v12, %s6527_s10 }
 0x21d   :  { %1436 = vrot.lane.b32.xlu0 %v1262_v38, %s6527_s10 }
 0x21f   :  { %1362 = vrot.lane.b32.xlu1 %v1265_v12, %s6524_s28  ;;  %v1408_v12 = vrot.slane %v1406_v7, 1 }
 0x221   :  { %1310 = vrot.lane.b32.xlu0 %v5377_v42, %s6523_s1  ;;  %v1409_v1 = vor.u32 %v1408_v12, %v1404_v11 }
 0x223   :  { %1242 = vrot.lane.b32.xlu1 %v1188_v24, %s6518_s16 }
 0x225   :  { %1390 = vrot.lane.b32.xlu0 %v5377_v42, %s6525_s30 }
 0x227   :  { %1274 = vrot.lane.b32.xlu1 %v1261_v21, %s6522_s0 }
 0x229   :  { %1302 = vrot.lane.b32.xlu0 %v7014_v27, %s6523_s1 }
 0x22b   :  { %1330 = vrot.lane.b32.xlu1 %v1188_v24, %s6526_s9 }
 0x22d   :  { %1342 = vrot.lane.b32.xlu0 %v7019_v47, %s6526_s9 }
 0x22f   :  { %1308 = vrot.lane.b32.xlu1 %v5376_v39, %s6523_s1 }
 0x231   :  { %1366 = vrot.lane.b32.xlu0 %v7026_v50, %s6524_s28 }
 0x233   :  { %1388 = vrot.lane.b32.xlu1 %v5376_v39, %s6525_s30 }
 0x235   :  { %1438 = vrot.lane.b32.xlu0 %v1348_v51, %s6527_s10 }
 0x237   :  { %1300 = vrot.lane.b32.xlu1 %v7001_v36, %s6523_s1 }
 0x239   :  { %1392 = vrot.lane.b32.xlu0 %v7038_v57, %s6525_s30 }
 0x23b   :  { %1380 = vrot.lane.b32.xlu1 %v7001_v36, %s6525_s30 }
 0x23d   :  { %1418 = vrot.lane.b32.xlu0 %v1402_v58, %s6528_s11 }
 0x23f   :  { %1420 = vrot.lane.b32.xlu1 %v1223_v31, %s6528_s11 }
 0x241   :  { %1256 = vrot.lane.b32.xlu0 %v1237_v61, %s6518_s16 }
 0x243   :  { %1252 = vrot.lane.b32.xlu1 %v1223_v31, %s6518_s16 }
 0x245   :  { %1344 = vrot.lane.b32.xlu0 %v1237_v61, %s6526_s9 }
 0x247   :  { %1444 = vrot.lane.b32.xlu1 %v1266_v26, %s6527_s10  ;;  %v1269_v62 = vpop.permute.xlu1 %1268 }
 0x249   :  { %1424 = vrot.lane.b32.xlu0 %v1237_v61, %s6528_s11 }
 0x24b   :  { %1244 = vrot.lane.b32.xlu1 %v6994_v35, %s6518_s16 }
 0x24d   :  { %1336 = vrot.lane.b32.xlu0 %v1320_v4, %s6526_s9 }
 0x24f   :  { %1276 = vrot.lane.b32.xlu1 %v1262_v38, %s6522_s0  ;;  %v1295_v6 = vpop.permute.xlu1 %1294 }
 0x251   :  { %1416 = vrot.lane.b32.xlu0 %v1320_v4, %s6528_s11  ;;  %v6297_v4 = vld [vmem:[%s7911_s2] sm:$0xff]  }
 0x252   :  { %5820 = vmatprep.subr.bf16.mxu1 %v6297_v4 }
 0x253   :  { %v1361_v9 = vpop.permute.xlu0 %1360  ;;  %1356 = vrot.lane.b32.xlu1 %v1262_v38, %s6524_s28  ;;  %5821 = vmatpush3.bf16.msra.mxu1 %v6297_v4 }
 0x255   :  { %1446 = vrot.lane.b32.xlu0 %v7026_v50, %s6527_s10  ;;  %v1271_v17 = vpop.permute.xlu1 %1270 }
 0x257   :  { %v1377_v43 = vpop.permute.xlu0 %1376  ;;  %1412 = vrot.lane.b32.xlu1 %v6994_v35, %s6528_s11 }
 0x259   :  { %1428 = vrot.lane.b32.xlu0 %v1409_v1, %s6528_s11  ;;  %v1279_v18 = vpop.permute.xlu1 %1278  ;;  %v1322_v1 = vshrl.u32 %v7038_v57, 16 }
 0x25b   :  { %v1281_v16 = vpop.permute.xlu0 %1280  ;;  %1384 = vrot.lane.b32.xlu1 %v7024_v49, %s6525_s30  ;;  %v1197_v49 = vshrl.u32 %v7001_v36, 16 }
 0x25d   :  { %1450 = vrot.lane.b32.xlu0 %v1431_v53, %s6527_s10  ;;  %v1305_v20 = vpop.permute.xlu1 %1304  ;;  %v6299_v53 = vld [vmem:[%s7911_s2 + $0x10] ss:$0 sps:$4 sm:$0x33]  }
 0x25f   :  { %v1241_v21 = vpop.permute.xlu0 %1240  ;;  %1382 = vrot.lane.b32.xlu1 %v7014_v27, %s6525_s30  ;;  %v1349_v27 = vrot.slane %v7038_v57, 1 }
 0x260   :  { %v1458_v22 = vsel %vm1452_vm3, %v6850_v15, %v1241_v21 }
 0x261   :  { %v1351_v19 = vpop.permute.xlu1 %1350  ;;  %v1487_v14 = vsel %vm1483_vm4, %v1458_v22, %v1271_v17  ;;  %v1324_v17 = vshll.u32 %v7038_v57, 16 }
 0x263   :  { %v1387_v2 = vpop.permute.xlu0 %1386  ;;  %1254 = vrot.lane.b32.xlu1 %v7019_v47, %s6518_s16 }
 0x265   :  { %v1239_v24 = vpop.permute.xlu1 %1238 }
 0x266   :  { %v1455_v54 = vsel %vm1452_vm3, %v6805_v40, %v1239_v24  ;;  %v1199_v40 = vshll.u32 %v7001_v36, 16 }
 0x267   :  { %v1339_v31 = vpop.permute.xlu0 %1338  ;;  %v1485_v39 = vsel %vm1483_vm4, %v1455_v54, %v1269_v62  ;;  %1440 = vrot.lane.b32.xlu1 %v1430_v25, %s6527_s10 }
 0x268   :  { %v1506_v15 = vsel %vm1504_vm5, %v1485_v39, %v1295_v6 }
 0x269   :  { %v1297_v26 = vpop.permute.xlu1 %1296 }
 0x26a   :  { %v7083_v30 = vsel %vm1504_vm5, %v1487_v14, %v1297_v26 }
 0x26b   :  { %v1251_v32 = vpop.permute.xlu0 %1250  ;;  %1286 = vrot.lane.b32.xlu1 %v7026_v50, %s6522_s0  ;;  %v1201_v50 = vrot.slane %v1199_v40, 1 }
 0x26c   :  { %v1473_v34 = vsel %vm1452_vm3, %v6848_v13, %v1251_v32 }
 0x26d   :  { %v1249_v35 = vpop.permute.xlu1 %1248  ;;  %v1497_v38 = vsel %vm1483_vm4, %v1473_v34, %v1281_v16  ;;  %v1202_v28 = vor.u32 %v1201_v50, %v1197_v49  ;;  %v6298_v16 = vld [vmem:[%s7911_s2 + $0x8] sm:$0xff]  }
 0x26e   :  { %v1470_v42 = vsel %vm1452_vm3, %v6873_v48, %v1249_v35  ;;  %5822 = vmatprep.subr.bf16.mxu1 %v6298_v16 }
 0x26f   :  { %v7093_v44 = vpop.permute.xlu0 %1282  ;;  %v1495_v45 = vsel %vm1483_vm4, %v1470_v42, %v1279_v18  ;;  %1422 = vrot.lane.b32.xlu1 %v7019_v47, %s6528_s11  ;;  %v1326_v18 = vrot.slane %v1324_v17, 1  ;;  %5823 = vmatpush3.bf16.msra.mxu1 %v6298_v16 }
 0x270   :  { %v1516_v46 = vsel %vm1504_vm5, %v1495_v45, %v1305_v20  ;;  %6226 = vmatprep.subr.msk.bf16.mxu1 %vm2146_vm11, %v6299_v53 }
 0x271   :  { %v7099_v13 = vpop.permute.xlu1 %1272  ;;  %v1537_v55 = vsel %vm1525_vm6, %v1516_v46, %v1339_v31  ;;  %v1327_v22 = vor.u32 %v1326_v18, %v1322_v1 }
 0x272   :  { %v1558_v48 = vsel %vm1546_vm7, %v1537_v55, %v1361_v9 }
 0x273   :  { %v7104_v56 = vpop.permute.xlu0 %1354  ;;  %1394 = vrot.lane.b32.xlu1 %v6296_v5, %s6525_s30  ;;  %v7108_v52 = vsel %vm1567_vm8, %v1558_v48, %v1387_v2 }
 0x275   :  { %v7110_v47 = vpop.permute.xlu1 %1352 }
 0x277   :  { %v7112_v58 = vpop.permute.xlu0 %1434  ;;  %1246 = vrot.lane.b32.xlu1 %v1202_v28, %s6518_s16 }
 0x279   :  { %v1329_v36 = vpop.permute.xlu1 %1328 }
 0x27a   :  { %v1527_v37 = vsel %vm1525_vm6, %v1506_v15, %v1329_v36 }
 0x27b   :  { %v1411_v60 = vpop.permute.xlu0 %1410  ;;  %v1548_v61 = vsel %vm1546_vm7, %v1527_v37, %v1351_v19  ;;  %1334 = vrot.lane.b32.xlu1 %v1202_v28, %s6526_s9  ;;  %v2148_v19 = vsel %vm2146_vm11, %v6299_v53, 0 }
 0x27c   :  { %v1569_v0 = vsel %vm1567_vm8, %v1548_v61, %v1377_v43  ;;  %5825 = vmatpush3.bf16.msra.mxu1 %v2148_v19 }
 0x27d   :  { %v1307_v10 = vpop.permute.xlu1 %1306  ;;  %v1590_v3 = vsel %vm1588_vm9, %v1569_v0, %v1411_v60 }
 0x27e   :  { %v1518_v62 = vsel %vm1504_vm5, %v1497_v38, %v1307_v10 }
 0x27f   :  { %v1341_v5 = vpop.permute.xlu0 %1340  ;;  %1358 = vrot.lane.b32.xlu1 %v1348_v51, %s6524_s28 }
 0x280   :  { %v1539_v6 = vsel %vm1525_vm6, %v1518_v62, %v1341_v5 }
 0x281   :  { %v1433_v7 = vpop.permute.xlu1 %1432 }
 0x282   :  { %v7129_v9 = vsel %vm1609_vm10, %v1590_v3, %v1433_v7 }
 0x283   :  { %v7131_v11 = vpop.permute.xlu0 %1284  ;;  %1414 = vrot.lane.b32.xlu1 %v1202_v28, %s6528_s11  ;;  %v1646_v18 = vrot.slane %v7129_v9, %v6705_v63 }
 0x285   :  { %v1299_v12 = vpop.permute.xlu1 %1298  ;;  %v1647_v16 = vcombine.high %v1646_v18, %v1646_v18  ;;  %v1654_v53 = vrot.slane %v1646_v18, %v6705_v63 }
 0x287   :  { %v1365_v43 = vpop.permute.xlu0 %1364  ;;  %1312 = vrot.lane.b32.xlu1 %v7038_v57, %s6523_s1 }
 0x289   :  { %v1379_v51 = vpop.permute.xlu1 %1378 }
 0x28b   :  { %v1333_v20 = vpop.permute.xlu0 %1332  ;;  %1368 = vrot.lane.b32.xlu1 %v1349_v27, %s6524_s28 }
 0x28d   :  { %v1443_v21 = vpop.permute.xlu1 %1442 }
 0x28f   :  { %v7146_v57 = vpop.permute.xlu0 %1436  ;;  %1346 = vrot.lane.b32.xlu1 %v1327_v22, %s6526_s9 }
 0x291   :  { %v1363_v14 = vpop.permute.xlu1 %1362 }
 0x292   :  { %v1560_v2 = vsel %vm1546_vm7, %v1539_v6, %v1363_v14  ;;  %v1661_v14 = vrot.slane %v1647_v16, %v6705_v63 }
 0x293   :  { %v7150_v24 = vpop.permute.xlu0 %1310  ;;  %1426 = vrot.lane.b32.xlu1 %v1327_v22, %s6528_s11 }
 0x295   :  { %v1243_v25 = vpop.permute.xlu1 %1242 }
 0x296   :  { %v1461_v54 = vsel %vm1452_vm3, %v6881_v59, %v1243_v25 }
 0x297   :  { %v1391_v31 = vpop.permute.xlu0 %1390  ;;  %v1489_v39 = vsel %vm1483_vm4, %v1461_v54, %v7099_v13  ;;  %1448 = vrot.lane.b32.xlu1 %v1349_v27, %s6527_s10 }
 0x298   :  { %v1510_v15 = vsel %vm1504_vm5, %v1489_v39, %v1299_v12 }
 0x299   :  { %v1275_v26 = vpop.permute.xlu1 %1274  ;;  %v1531_v32 = vsel %vm1525_vm6, %v1510_v15, %v1333_v20 }
 0x29a   :  { %v1552_v34 = vsel %vm1546_vm7, %v1531_v32, %v7104_v56 }
 0x29b   :  { %v7162_v35 = vpop.permute.xlu0 %1302 }
 0x29d   :  { %v1331_v40 = vpop.permute.xlu1 %1330 }
 0x29e   :  { %v1529_v59 = vsel %vm1525_vm6, %v7083_v30, %v1331_v40 }
 0x29f   :  { %v1343_v38 = vpop.permute.xlu0 %1342  ;;  %v1550_v42 = vsel %vm1546_vm7, %v1529_v59, %v7110_v47 }
 0x2a0   :  { %v1571_v45 = vsel %vm1567_vm8, %v1550_v42, %v1379_v51 }
 0x2a1   :  { %v1309_v46 = vpop.permute.xlu1 %1308 }
 0x2a3   :  { %v7169_v13 = vpop.permute.xlu0 %1366 }
 0x2a5   :  { %v1389_v49 = vpop.permute.xlu1 %1388 }
 0x2a6   :  { %v7172_v50 = vsel %vm1567_vm8, %v1560_v2, %v1389_v49  ;;  %v1662_v2 = vcombine.high %v1654_v53, %v1654_v53 }
 0x2a7   :  { %v7174_v55 = vpop.permute.xlu0 %1438 }
 0x2a9   :  { %v1301_v48 = vpop.permute.xlu1 %1300 }
 0x2ab   :  { %v7176_v56 = vpop.permute.xlu0 %1392 }
 0x2ad   :  { %v1381_v28 = vpop.permute.xlu1 %1380 }
 0x2ae   :  { %v7179_v30 = vsel %vm1567_vm8, %v1552_v34, %v1381_v28  ;;  %v1957_v34 = vcombine.low %v1654_v53, %v1661_v14 }
 0x2af   :  { %v7181_v36 = vpop.permute.xlu0 %1418 }
 0x2b0   :  { %v7236_v49 = vrot.slane %v1957_v34, %v6705_v63 }
 0x2b1   :  { %v1421_v47 = vpop.permute.xlu1 %1420 }
 0x2b2   :  { %v1600_v37 = vsel %vm1588_vm9, %v7108_v52, %v1421_v47 }
 0x2b3   :  { %v7185_v60 = vpop.permute.xlu0 %1256  ;;  %v1621_v61 = vsel %vm1609_vm10, %v1600_v37, %v1443_v21 }
 0x2b5   :  { %v1253_v0 = vpop.permute.xlu1 %1252 }
 0x2b6   :  { %v1476_v10 = vsel %vm1452_vm3, %v6924_v33, %v1253_v0 }
 0x2b7   :  { %v1499_v3 = vsel %vm1483_vm4, %v1476_v10, %v7093_v44  ;;  %v7192_v62 = vpop.permute.xlu0 %1344 }
 0x2b8   :  { %v1520_v4 = vsel %vm1504_vm5, %v1499_v3, %v1309_v46 }
 0x2b9   :  { %v1541_v5 = vsel %vm1525_vm6, %v1520_v4, %v1343_v38  ;;  %v1445_v6 = vpop.permute.xlu1 %1444 }
 0x2ba   :  { %v1562_v52 = vsel %vm1546_vm7, %v1541_v5, %v1365_v43 }
 0x2bb   :  { %v1425_v12 = vpop.permute.xlu0 %1424  ;;  %v1583_v54 = vsel %vm1567_vm8, %v1562_v52, %v1391_v31  ;;  %v1761_v31 = vrot.slane %v1621_v61, %v6705_v63 }
 0x2bc   :  { %v1604_v40 = vsel %vm1588_vm9, %v1583_v54, %v1425_v12 }
 0x2bd   :  { %v1245_v7 = vpop.permute.xlu1 %1244  ;;  %v1762_v37 = vcombine.high %v1761_v31, %v1761_v31  ;;  %v7250_v4 = vrot.slane %v1761_v31, %v6705_v63 }
 0x2be   :  { %v1464_v17 = vsel %vm1452_vm3, %v6956_v8, %v1245_v7 }
 0x2bf   :  { %v1491_v27 = vsel %vm1483_vm4, %v1464_v17, %v1275_v26  ;;  %v7205_v51 = vpop.permute.xlu0 %1336  ;;  %v7246_v3 = vrot.slane %v1762_v37, %v6705_v63  ;;  %v1777_v18 = vcombine.high %v7250_v4, %v7250_v4 }
 0x2c0   :  { %v7201_v33 = vsel %vm1504_vm5, %v1491_v27, %v1301_v48 }
 0x2c1   :  { %v7203_v44 = vpop.permute.xlu1 %1276  ;;  %v1898_v7 = vunpack.i.h.s16 %v7246_v3 }
 0x2c3   :  { %v7212_v20 = vpop.permute.xlu0 %1416 }
 0x2c5   :  { %v7207_v1 = vpop.permute.xlu1 %1356 }
 0x2c7   :  { %v1447_v39 = vpop.permute.xlu0 %1446 }
 0x2c8   :  { %v1625_v38 = vsel %vm1609_vm10, %v1604_v40, %v1447_v39 }
 0x2c9   :  { %v1413_v43 = vpop.permute.xlu1 %1412  ;;  %v1807_v46 = vrot.slane %v1625_v38, %v6705_v63 }
 0x2ca   :  { %v1592_v8 = vsel %vm1588_vm9, %v1571_v45, %v1413_v43 }
 0x2cb   :  { %v1613_v21 = vsel %vm1609_vm10, %v1592_v8, %v7112_v58  ;;  %v1808_v0 = vcombine.high %v1807_v46, %v1807_v46  ;;  %v1815_v5 = vrot.slane %v1807_v46, %v6705_v63 }
 0x2cc   :  { %v1669_v22 = vrot.slane %v1613_v21, %v6705_v63 }
 0x2cd   :  { %v7218_v19 = vpop.permute.xlu1 %1384  ;;  %v1822_v61 = vrot.slane %v1808_v0, %v6705_v63  ;;  %v1823_v43 = vcombine.high %v1815_v5, %v1815_v5  ;;  %v1906_v16 = vunpack.i.h.s16 %v1815_v5 }
 0x2ce   :  { %v1670_v25 = vcombine.high %v1669_v22, %v1669_v22  ;;  %v7222_v9 = vrot.slane %v1669_v22, %v6705_v63  ;;  %v7262_v22 = vpack.i.b16 %v1777_v18, %v1898_v7 }
 0x2cf   :  { %v1908_v12 = vunpack.i.h.s16 %v1822_v61 }
 0x2d0   :  { %v7226_v15 = vrot.slane %v1670_v25, %v6705_v63  ;;  %v1876_v26 = vunpack.i.h.s16 %v7222_v9  ;;  %v5383_v58 = vpack.i.b16 %v7222_v9, %v1662_v2  ;;  %v5393_v25 = vpack.i.b16 %v1822_v61, %v1906_v16 }
 0x2d1   :  { %v1383_v32 = vpop.permute.xlu1 %1382  ;;  %v5394_v21 = vpack.i.b16 %v1823_v43, %v1908_v12 }
 0x2d2   :  { %v5384_v59 = vpack.i.b16 %v7226_v15, %v1876_v26  ;;  %v1878_v43 = vunpack.i.h.s16 %v7226_v15 }
 0x2d3   :  { %v2056_v39 = vcombine.low %v5393_v25, %v5394_v21 }
 0x2d4   :  { %v1958_v42 = vcombine.low %v5383_v58, %v5384_v59 }
 0x2d5   :  { %v1255_v45 = vpop.permute.xlu1 %1254 }
 0x2d6   :  { %v7239_v48 = vrot.slane %v1958_v42, %v6705_v63  ;;  %v7277_v42 = vrot.slane %v2056_v39, %v6705_v63 }
 0x2d8   :  { %v1989_v28 = vcombine.low %v7236_v49, %v7239_v48 }
 0x2d9   :  { %v1441_v47 = vpop.permute.xlu1 %1440 }
 0x2dd   :  { %v7243_v10 = vpop.permute.xlu1 %1286 }
 0x2e1   :  { %v1423_v52 = vpop.permute.xlu1 %1422 }
 0x2e2   :  { %v1602_v17 = vsel %vm1588_vm9, %v7172_v50, %v1423_v52 }
 0x2e3   :  { %v1623_v27 = vsel %vm1609_vm10, %v1602_v17, %v1445_v6 }
 0x2e4   :  { %v1784_v53 = vrot.slane %v1623_v27, %v6705_v63  ;;  %v1479_v27 = vsel %vm1452_vm3, %v6981_v29, %v1255_v45  ;;  %v1685_v45 = vcombine.high %v7222_v9, %v7222_v9 }
 0x2e5   :  { %v7260_v8 = vpop.permute.xlu1 %1394 }
 0x2e6   :  { %v1785_v14 = vcombine.high %v1784_v53, %v1784_v53  ;;  %v7265_v2 = vrot.slane %v1784_v53, %v6705_v63  ;;  %v1896_v53 = vunpack.i.h.s16 %v7250_v4 }
 0x2e8   :  { %v1800_v50 = vcombine.high %v7265_v2, %v7265_v2  ;;  %v2009_v6 = vcombine.low %v7262_v22, %v7265_v2  ;;  %v1799_v26 = vrot.slane %v1785_v14, %v6705_v63 }
 0x2e9   :  { %v1247_v54 = vpop.permute.xlu1 %1246 }
 0x2ea   :  { %v5392_v58 = vpack.i.b16 %v1815_v5, %v1800_v50  ;;  %v1467_v34 = vsel %vm1452_vm3, %v6992_v23, %v1247_v54 }
 0x2eb   :  { %v1493_v40 = vsel %vm1483_vm4, %v1467_v34, %v7203_v44 }
 0x2ec   :  { %v2055_v59 = vcombine.low %v1799_v26, %v5392_v58  ;;  %v1514_v37 = vsel %vm1504_vm5, %v1493_v40, %v7162_v35  ;;  %v5385_v26 = vpack.i.b16 %v1685_v45, %v1878_v43  ;;  %v5390_v40 = vpack.i.b16 %v7246_v3, %v1896_v53 }
 0x2ed   :  { %v1335_v38 = vpop.permute.xlu1 %1334  ;;  %v1535_v5 = vsel %vm1525_vm6, %v1514_v37, %v7205_v51  ;;  %v1482_v3 = vsel %vm1452_vm3, %v7005_v41, %v7185_v60 }
 0x2ee   :  { %v7280_v31 = vrot.slane %v2055_v59, %v6705_v63  ;;  %v1533_v46 = vsel %vm1525_vm6, %v7201_v33, %v1335_v38 }
 0x2ef   :  { %v1554_v23 = vsel %vm1546_vm7, %v1533_v46, %v7207_v1 }
 0x2f0   :  { %v1575_v0 = vsel %vm1567_vm8, %v1554_v23, %v1383_v32  ;;  %v2087_v44 = vcombine.low %v7280_v31, %v7277_v42  ;;  %v6304_v42 = vld [vmem:[#allocation3 + $0x50] sm:$0xff]  }
 0x2f1   :  { %v1596_v61 = vsel %vm1588_vm9, %v1575_v0, %v7212_v20  ;;  %v1359_v52 = vpop.permute.xlu1 %1358  ;;  %v6305_v31 = vld [vmem:[#allocation3 + $0x10] sm:$0xff]  }
 0x2f2   :  { %v1617_v33 = vsel %vm1609_vm10, %v1596_v61, %v7174_v55  ;;  %v1556_v35 = vsel %vm1546_vm7, %v1535_v5, %v1359_v52 }
 0x2f3   :  { %v1715_v7 = vrot.slane %v1617_v33, %v6705_v63  ;;  %v1577_v1 = vsel %vm1567_vm8, %v1556_v35, %v7218_v19  ;;  %v1429_v33 = vpop.permute.xlu0 %1428  ;;  %v1503_v35 = vsel %vm1483_vm4, %v1482_v3, %v7243_v10  ;;  %v6302_v3 = vld [vmem:[#allocation3 + $0x48] sm:$0xff]  }
 0x2f4   :  { %v1598_v32 = vsel %vm1588_vm9, %v1577_v1, %v7181_v36 }
 0x2f5   :  { %v1716_v12 = vcombine.high %v1715_v7, %v1715_v7  ;;  %v1723_v20 = vrot.slane %v1715_v7, %v6705_v63  ;;  %v1619_v17 = vsel %vm1609_vm10, %v1598_v32, %v1441_v47  ;;  %v1415_v51 = vpop.permute.xlu1 %1414 }
 0x2f6   :  { %v1738_v55 = vrot.slane %v1619_v17, %v6705_v63  ;;  %v1594_v18 = vsel %vm1588_vm9, %v7179_v30, %v1415_v51  ;;  %v1501_v30 = vsel %vm1483_vm4, %v1479_v27, %v7131_v11 }
 0x2f7   :  { %v1730_v19 = vrot.slane %v1716_v12, %v6705_v63  ;;  %v1886_v16 = vunpack.i.h.s16 %v1723_v20  ;;  %v1615_v36 = vsel %vm1609_vm10, %v1594_v18, %v7146_v57  ;;  %v1731_v15 = vcombine.high %v1723_v20, %v1723_v20  ;;  %v1451_v18 = vpop.permute.xlu0 %1450 }
 0x2f8   :  { %v1739_v47 = vcombine.high %v1738_v55, %v1738_v55  ;;  %v1746_v21 = vrot.slane %v1738_v55, %v6705_v63  ;;  %v1692_v29 = vrot.slane %v1615_v36, %v6705_v63  ;;  %v1522_v11 = vsel %vm1504_vm5, %v1501_v30, %v7150_v24 }
 0x2f9   :  { %v1888_v14 = vunpack.i.h.s16 %v1730_v19  ;;  %v1313_v25 = vpop.permute.xlu1 %1312  ;;  %v5387_v58 = vpack.i.b16 %v1730_v19, %v1886_v16  ;;  %v2037_v24 = vrot.slane %v2009_v6, %v6705_v63  ;;  %v1543_v41 = vsel %vm1525_vm6, %v1522_v11, %v7192_v62 }
 0x2fa   :  { %v1753_v50 = vrot.slane %v1739_v47, %v6705_v63  ;;  %v1754_v54 = vcombine.high %v1746_v21, %v1746_v21  ;;  %v1693_v57 = vcombine.high %v1692_v29, %v1692_v29  ;;  %v1700_v39 = vrot.slane %v1692_v29, %v6705_v63 }
 0x2fb   :  { %v5388_v34 = vpack.i.b16 %v1731_v15, %v1888_v14  ;;  %v1524_v32 = vsel %vm1504_vm5, %v1503_v35, %v1313_v25  ;;  %v1564_v43 = vsel %vm1546_vm7, %v1543_v41, %v7169_v13  ;;  %v1997_v36 = vrot.slane %v1989_v28, %v6705_v63  ;;  %v6308_v35 = vld [vmem:[#allocation3 + $0x60] sm:$0xff]   ;;  %v6314_v41 = vld [vmem:[#allocation3 + $0x78] sm:$0xff]  }
 0x2fc   :  { %v5389_v59 = vpack.i.b16 %v7250_v4, %v1754_v54  ;;  %v2007_v9 = vcombine.low %v1746_v21, %v1753_v50  ;;  %v1708_v38 = vcombine.high %v1700_v39, %v1700_v39  ;;  %v1959_v46 = vcombine.low %v5385_v26, %v1700_v39 }
 0x2fd   :  { %v1369_v37 = vpop.permute.xlu1 %1368  ;;  %v2006_v23 = vcombine.low %v5387_v58, %v5388_v34  ;;  %v1707_v0 = vrot.slane %v1693_v57, %v6705_v63  ;;  %v1585_v21 = vsel %vm1567_vm8, %v1564_v43, %v7176_v56 }
 0x2fe   :  { %v5386_v61 = vpack.i.b16 %v1723_v20, %v1708_v38  ;;  %v2008_v5 = vcombine.low %v5389_v59, %v5390_v40  ;;  %v2023_v52 = vrot.slane %v2007_v9, %v6705_v63  ;;  %v1981_v17 = vrot.slane %v1959_v46, %v6705_v63 }
 0x2ff   :  { %v2016_v4 = vrot.slane %v2006_v23, %v6705_v63 }
 0x300   :  { %v1960_v7 = vcombine.low %v1707_v0, %v5386_v61  ;;  %v2030_v1 = vrot.slane %v2008_v5, %v6705_v63  ;;  %v6300_v5 = vld [vmem:[#allocation3 + $0x40] sm:$0xff]  }
 0x301   :  { %v1347_v12 = vpop.permute.xlu1 %1346  ;;  %v2038_v60 = vcombine.low %v2016_v4, %v2023_v52  ;;  %v6301_v52 = vld [vmem:[#allocation3] sm:$0xff]   ;;  %5834 = vmatprep.subr.bf16.mxu1 %v6300_v5  ;;  %v6307_v4 = vld [vmem:[#allocation3 + $0x18] sm:$0xff]  }
 0x302   :  { %v1545_v20 = vsel %vm1525_vm6, %v1524_v32, %v1347_v12  ;;  %v1988_v10 = vrot.slane %v1960_v7, %v6705_v63  ;;  %v2039_v51 = vcombine.low %v2030_v1, %v2037_v24  ;;  %5854 = vmatprep.subr.bf16.mxu0 %v6301_v52  ;;  %v6309_v24 = vld [vmem:[#allocation3 + $0x20] sm:$0xff]   ;;  %v6310_v7 = vld [vmem:[#allocation3 + $0x68] sm:$0xff]   ;;  %v6312_v32 = vld [vmem:[#allocation3 + $0x70] sm:$0xff]  }
 0x303   :  { %v1566_v22 = vsel %vm1546_vm7, %v1545_v20, %v1369_v37  ;;  %v2046_v2 = vrot.slane %v2038_v60, %v6705_v63  ;;  %v2095_v37 = vrot.slane %v2087_v44, %v6705_v63  ;;  %5855 = vmatpush3.bf16.msra.mxu0 %v6301_v52  ;;  %v6306_v44 = vld [vmem:[#allocation3 + $0x58] sm:$0xff]   ;;  %v6311_v1 = vld [vmem:[#allocation3 + $0x28] sm:$0xff]   ;;  %v6313_v12 = vld [vmem:[#allocation3 + $0x30] sm:$0xff]  }
 0x304   :  { %v1587_v6 = vsel %vm1567_vm8, %v1566_v22, %v7260_v8  ;;  %v1990_v27 = vcombine.low %v1981_v17, %v1988_v10  ;;  %v2053_v55 = vrot.slane %v2039_v51, %v6705_v63  ;;  %v6315_v60 = vld [vmem:[#allocation3 + $0x38] sm:$0xff]   ;;  %v7383_v20 = vld [vmem:[#allocation3 + $0x80] sm:$0xff]   ;;  %v7392_v10 = vld [vmem:[%s7912_s3] ss:$0 sm:$0xff] }
 0x305   :  { %v1608_v62 = vsel %vm1588_vm9, %v1587_v6, %v1429_v33  ;;  %v1427_v19 = vpop.permute.xlu1 %1426  ;;  %v6303_v33 = vld [vmem:[#allocation3 + $0x8] sm:$0xff]   ;;  %v7385_v17 = vld [vmem:[#allocation3 + $0xc0] sm:$0xff]  }
 0x306   :  { %v1629_v16 = vsel %vm1609_vm10, %v1608_v62, %v1451_v18  ;;  %v2004_v53 = vrot.slane %v1990_v27, %v6705_v63  ;;  %v2054_v8 = vcombine.low %v2046_v2, %v2053_v55  ;;  %v1606_v13 = vsel %vm1588_vm9, %v1585_v21, %v1427_v19  ;;  %5856 = vmatprep.subr.bf16.mxu0 %v6303_v33 }
 0x307   :  { %v1853_v47 = vrot.slane %v1629_v16, %v6705_v63  ;;  %5857 = vmatpush3.bf16.msra.mxu0 %v6303_v33 }
 0x308   :  { %v2005_v29 = vcombine.low %v1997_v36, %v2004_v53  ;;  %5858 = vmatprep.subr.bf16.mxu0 %v6305_v31 }
 0x309   :  { %v1854_v45 = vcombine.high %v1853_v47, %v1853_v47  ;;  %v1861_v30 = vrot.slane %v1853_v47, %v6705_v63  ;;  %v1449_v15 = vpop.permute.xlu1 %1448 }
 0x30a   :  { %v1627_v14 = vsel %vm1609_vm10, %v1606_v13, %v1449_v15  ;;  %5826 = vmatprep.mubr.msk.bf16.mxu1 %vm2133_vm12, %v2005_v29 }
 0x30b   :  { %v1830_v49 = vrot.slane %v1627_v14, %v6705_v63  ;;  %5827 = vmatmul.mubr.msk.bf16.vlgmr.msra.gmra.mrb[0].mxu1 %vm2133_vm12, %v2054_v8  ;;  %v1868_v48 = vrot.slane %v1854_v45, %v6705_v63  ;;  %v1916_v28 = vunpack.i.h.s16 %v1861_v30  ;;  %v1869_v34 = vcombine.high %v1861_v30, %v1861_v30  ;;  %5859 = vmatpush3.bf16.msra.mxu0 %v6305_v31 }
 0x30c   :  { %5835 = vmatpush3.bf16.msra.mxu1 %v6300_v5  ;;  %5860 = vmatprep.subr.bf16.mxu0 %v6307_v4 }
 0x30d   :  { %v1831_v25 = vcombine.high %v1830_v49, %v1830_v49  ;;  %v1838_v56 = vrot.slane %v1830_v49, %v6705_v63  ;;  %v1918_v57 = vunpack.i.h.s16 %v1868_v48  ;;  %v5396_v39 = vpack.i.b16 %v1868_v48, %v1916_v28  ;;  %5836 = vmatprep.subr.bf16.mxu1 %v6302_v3 }
 0x30f   :  { %v1845_v50 = vrot.slane %v1831_v25, %v6705_v63  ;;  %v1846_v54 = vcombine.high %v1838_v56, %v1838_v56  ;;  %v5397_v59 = vpack.i.b16 %v1869_v34, %v1918_v57  ;;  %5861 = vmatpush3.bf16.msra.mxu0 %v6307_v4 }
 0x310   :  { %5837 = vmatpush3.bf16.msra.mxu1 %v6302_v3  ;;  %5862 = vmatprep.subr.bf16.mxu0 %v6309_v24 }
 0x311   :  { %v5395_v26 = vpack.i.b16 %v1861_v30, %v1846_v54  ;;  %v2057_v58 = vcombine.low %v1838_v56, %v1845_v50  ;;  %v2110_v46 = vrot.slane %v5397_v59, %v6705_v63  ;;  %5838 = vmatprep.subr.bf16.mxu1 %v6304_v42 }
 0x313   :  { %v2058_v40 = vcombine.low %v5395_v26, %v5396_v39  ;;  %v2079_v9 = vrot.slane %v2057_v58, %v6705_v63  ;;  %v2117_v61 = vrot.slane %v2110_v46, %v6705_v63  ;;  %5863 = vmatpush3.bf16.msra.mxu0 %v6309_v24 }
 0x314   :  { %5839 = vmatpush3.bf16.msra.mxu1 %v6304_v42  ;;  %5864 = vmatprep.subr.bf16.mxu0 %v6311_v1 }
 0x315   :  { %v2086_v38 = vrot.slane %v2058_v40, %v6705_v63  ;;  %5840 = vmatprep.subr.bf16.mxu1 %v6306_v44 }
 0x317   :  { %v2088_v11 = vcombine.low %v2079_v9, %v2086_v38  ;;  %5865 = vmatpush3.bf16.msra.mxu0 %v6311_v1 }
 0x318   :  { %5841 = vmatpush3.bf16.msra.mxu1 %v6306_v44  ;;  %5866 = vmatprep.subr.bf16.mxu0 %v6313_v12 }
 0x319   :  { %v2102_v23 = vrot.slane %v2088_v11, %v6705_v63  ;;  %5842 = vmatprep.subr.bf16.mxu1 %v6308_v35 }
 0x31b   :  { %v2103_v0 = vcombine.low %v2095_v37, %v2102_v23  ;;  %5867 = vmatpush3.bf16.msra.mxu0 %v6313_v12 }
 0x31c   :  { %5843 = vmatpush3.bf16.msra.mxu1 %v6308_v35  ;;  %5868 = vmatprep.subr.bf16.mxu0 %v6315_v60 }
 0x31d   :  { %5830 = vmatprep.mubr.msk.bf16.mxu1 %vm2133_vm12, %v2103_v0  ;;  %5844 = vmatprep.subr.bf16.mxu1 %v6310_v7 }
 0x31e   :  { %5831 = vmatmul.mubr.msk.bf16.gmra.mrb[4].mxu1 %vm2133_vm12, %v2117_v61 }
 0x31f   :  { %5869 = vmatpush3.bf16.msra.mxu0 %v6315_v60 }
 0x320   :  { %5845 = vmatpush3.bf16.msra.mxu1 %v6310_v7  ;;  %5894 = vmatprep.subr.bf16.mxu0 %v7385_v17 }
 0x321   :  { %5846 = vmatprep.subr.bf16.mxu1 %v6312_v32 }
 0x324   :  { %5847 = vmatpush3.bf16.msra.mxu1 %v6312_v32 }
 0x325   :  { %5848 = vmatprep.subr.bf16.mxu1 %v6314_v41 }
 0x328   :  { %5849 = vmatpush3.bf16.msra.mxu1 %v6314_v41 }
 0x329   :  { %5874 = vmatprep.subr.bf16.mxu1 %v7383_v20 }
 0x3de   :  { %v5828_v51 = vpop.f32.mrb[0].mxu1 }
 0x3df   :  { %v2193_v22 = vadd.f32 %v5828_v51, %v7392_v10  ;;  %v2184_v2 = vpop.f32.mrb[1].mxu1 }
 0x3e0   :  { %v2185_v6 = vadd.f32 %v7392_v10, %v2184_v2  ;;  %v5829_v27 = vpop.f32.mrb[2].mxu1 }
 0x3e1   :  { %v2196_v55 = vadd.f32 %v5829_v27, %v7392_v10  ;;  %v2187_v18 = vpop.f32.mrb[3].mxu1  ;;  %v2216_v43 = vmax.f32 %v2193_v22, 0.0 }
 0x3e2   :  { %v2188_v62 = vadd.f32 %v7392_v10, %v2187_v18  ;;  %v2214_v16 = vmax.f32 %v2185_v6, 0.0 }
 0x3e3   :  { %v2217_v19 = vmax.f32 %v2196_v55, 0.0 }
 0x3e4   :  { %v2215_v36 = vmax.f32 %v2188_v62, 0.0 }
 0x3e5   :  { %v2222_v53 = vpack.c.bf16 %v2217_v19, %v2216_v43  ;;  %v5406_v8 = vpack.c.bf16 %v2217_v19, %v2217_v19 }
 0x3e6   :  { %v2221_v47 = vpack.c.bf16 %v2215_v36, %v2214_v16  ;;  %v5405_v21 = vpack.c.bf16 %v2215_v36, %v2215_v36 }
 0x3e7   :  { %v2292_v29 = vrot.slane %v5406_v8, %v6705_v63  ;;  %v2285_v30 = vrot.slane %v2222_v53, %v6705_v63 }
 0x3e8   :  { %v2236_v45 = vrot.slane %v2221_v47, %v6705_v63  ;;  %v2243_v13 = vrot.slane %v5405_v21, %v6705_v63 }
 0x3e9   :  { %v2294_v15 = vcombine.high %v2292_v29, %v2292_v29  ;;  %v7403_v14 = vrot.slane %v2292_v29, %v6705_v63  ;;  %v2293_v59 = vcombine.high %v2285_v30, %v2285_v30  ;;  %v7468_v18 = vrot.slane %v2285_v30, %v6705_v63 }
 0x3ea   :  { %v2244_v49 = vcombine.high %v2236_v45, %v2236_v45  ;;  %v2245_v48 = vcombine.high %v2243_v13, %v2243_v13  ;;  %v2252_v28 = vrot.slane %v2236_v45, %v6705_v63  ;;  %v7407_v25 = vrot.slane %v2243_v13, %v6705_v63 }
 0x3eb   :  { %v7410_v56 = vrot.slane %v2294_v15, %v6705_v63  ;;  %v7424_v26 = vcombine.high %v7403_v14, %v7403_v14  ;;  %v2415_v58 = vunpack.i.h.s16 %v7403_v14  ;;  %v7471_v62 = vrot.slane %v2293_v59, %v6705_v63 }
 0x3ec   :  { %v2266_v50 = vrot.slane %v2244_v49, %v6705_v63  ;;  %v7414_v54 = vrot.slane %v2245_v48, %v6705_v63  ;;  %v7416_v57 = vcombine.high %v2252_v28, %v2252_v28  ;;  %v7420_v39 = vcombine.high %v7407_v25, %v7407_v25 }
 0x3ed   :  { %v2417_v34 = vunpack.i.h.s16 %v7410_v56  ;;  %v2391_v40 = vunpack.i.h.s16 %v2252_v28  ;;  %v7475_v43 = vcombine.high %v7410_v56, %v7410_v56 }
 0x3ee   :  { %v7428_v9 = vcombine.high %v2266_v50, %v2266_v50  ;;  %v2395_v38 = vunpack.i.h.s16 %v7416_v57  ;;  %v2393_v11 = vunpack.i.h.s16 %v2266_v50  ;;  %v7434_v37 = vcombine.high %v7414_v54, %v7414_v54 }
 0x3ef   :  { %v5413_v46 = vpack.i.b16 %v7424_v26, %v2417_v34  ;;  %v2401_v23 = vunpack.i.h.s16 %v7414_v54  ;;  %v7438_v0 = vunpack.i.h.s16 %v7420_v39  ;;  %v5408_v5 = vpack.i.b16 %v2266_v50, %v2391_v40 }
 0x3f0   :  { %v2397_v61 = vunpack.i.h.s16 %v7428_v9  ;;  %v5425_v52 = vpack.i.b16 %v2395_v38, %v2266_v50  ;;  %v5409_v3 = vpack.i.b16 %v7428_v9, %v2393_v11  ;;  %v5426_v44 = vpack.i.b16 %v2415_v58, %v7420_v39 }
 0x3f1   :  { %v5832_v33 = vpop.f32.mrb[4].mxu1  ;;  %v7445_v42 = vpack.i.b16 %v7420_v39, %v2401_v23  ;;  %v5412_v31 = vpack.i.b16 %v7410_v56, %v7438_v0  ;;  %v2653_v4 = vcombine.low %v7428_v9, %v7414_v54  ;;  %v5437_v21 = vpack.i.b16 %v2417_v34, %v7434_v37 }
 0x3f2   :  { %v2652_v35 = vcombine.low %v2252_v28, %v5425_v52  ;;  %v5436_v24 = vpack.i.b16 %v2397_v61, %v7416_v57  ;;  %v7454_v7 = vadd.f32 %v5832_v33, %v7392_v10  ;;  %v2200_v1 = vpop.f32.mrb[5].mxu1  ;;  %v7457_v32 = vpack.i.b16 %v7407_v25, %v2397_v61 }
 0x3f3   :  { %v2201_v12 = vadd.f32 %v7392_v10, %v2200_v1  ;;  %v5833_v41 = vpop.f32.mrb[6].mxu1  ;;  %v2482_v60 = vcombine.low %v5408_v5, %v5409_v3  ;;  %v7460_v51 = vcombine.low %v5412_v31, %v5413_v46  ;;  %v2654_v22 = vcombine.low %v5426_v44, %v7410_v56 }
 0x3f4   :  { %v2203_v2 = vpop.f32.mrb[7].mxu1  ;;  %v2483_v6 = vcombine.low %v7457_v32, %v7445_v42  ;;  %v2662_v27 = vrot.slane %v2652_v35, %v6705_v63  ;;  %v2669_v55 = vrot.slane %v2653_v4, %v6705_v63  ;;  %v2839_v29 = vcombine.low %v2266_v50, %v5436_v24 }
 0x3f5   :  { %v2204_v19 = vadd.f32 %v7392_v10, %v2203_v2  ;;  %v2218_v16 = vmax.f32 %v2201_v12, 0.0  ;;  %v2492_v36 = vrot.slane %v2482_v60, %v6705_v63  ;;  %v2840_v45 = vcombine.low %v7407_v25, %v7420_v39 }
 0x3f6   :  { %v2499_v53 = vrot.slane %v2483_v6, %v6705_v63  ;;  %v2684_v8 = vcombine.low %v2662_v27, %v2669_v55  ;;  %v2405_v30 = vunpack.i.h.s16 %v7434_v37  ;;  %v2841_v10 = vcombine.low %v5437_v21, %v7424_v26 }
 0x3f7   :  { %v2219_v47 = vmax.f32 %v2204_v19, 0.0  ;;  %v2849_v48 = vrot.slane %v2839_v29, %v6705_v63  ;;  %v7488_v28 = vcombine.high %v7471_v62, %v7471_v62  ;;  %v2421_v56 = vunpack.i.h.s16 %v7475_v43 }
 0x3f8   :  { %v2514_v13 = vcombine.low %v2492_v36, %v2499_v53  ;;  %v2856_v50 = vrot.slane %v2840_v45, %v6705_v63  ;;  %v2220_v57 = vmax.f32 %v7454_v7, 0.0  ;;  %v7498_v40 = vunpack.i.h.s16 %v7468_v18 }
 0x3f9   :  { %v2223_v15 = vpack.c.bf16 %v2219_v47, %v2218_v16  ;;  %v5407_v49 = vpack.c.bf16 %v2219_v47, %v2219_v47  ;;  %v5447_v59 = vpack.i.b16 %v7428_v9, %v2395_v38  ;;  %v5448_v11 = vpack.i.b16 %v7414_v54, %v2397_v61 }
 0x3fa   :  { %v7500_v26 = vcombine.low %v2849_v48, %v2856_v50  ;;  %v5449_v46 = vpack.i.b16 %v7468_v18, %v2405_v30  ;;  %v2506_v3 = vrot.slane %v7460_v51, %v6705_v63  ;;  %v2676_v33 = vrot.slane %v2654_v22, %v6705_v63 }
 0x3fb   :  { %v2334_v58 = vrot.slane %v2223_v15, %v6705_v63  ;;  %v7495_v34 = vrot.slane %v5407_v49, %v6705_v63  ;;  %v2692_v31 = vrot.slane %v2684_v8, %v6705_v63  ;;  %v5450_v38 = vpack.i.b16 %v7475_v43, %v7498_v40 }
 0x3fc   :  { %v3027_v44 = vcombine.low %v5447_v59, %v5448_v11  ;;  %v3028_v61 = vcombine.low %v7445_v42, %v5449_v46  ;;  %v2522_v1 = vrot.slane %v2514_v13, %v6705_v63  ;;  %v2863_v51 = vrot.slane %v2841_v10, %v6705_v63 }
 0x3fd   :  { %v2342_v5 = vcombine.high %v2334_v58, %v2334_v58  ;;  %v7508_v52 = vrot.slane %v2334_v58, %v6705_v63  ;;  %v7519_v4 = vrot.slane %v7495_v34, %v6705_v63  ;;  %v2343_v12 = vcombine.high %v7495_v34, %v7495_v34 }
 0x3fe   :  { %v3037_v27 = vrot.slane %v3027_v44, %v6705_v63  ;;  %v2879_v19 = vrot.slane %v7500_v26, %v6705_v63  ;;  %v3044_v36 = vrot.slane %v3028_v61, %v6705_v63  ;;  %v5462_v50 = vpack.i.b16 %v2401_v23, %v7407_v25 }
 0x3ff   :  { %v7522_v35 = vrot.slane %v2342_v5, %v6705_v63  ;;  %v7526_v24 = vcombine.high %v7508_v52, %v7508_v52  ;;  %v2423_v41 = vunpack.i.h.s16 %v7508_v52  ;;  %v5414_v60 = vpack.i.b16 %v7508_v52, %v2421_v56 }
 0x400   :  { %v7553_v53 = vcombine.high %v7519_v4, %v7519_v4  ;;  %v2431_v29 = vunpack.i.h.s16 %v7519_v4  ;;  %v3059_v48 = vcombine.low %v3037_v27, %v3044_v36  ;;  %v5463_v59 = vpack.i.b16 %v2421_v56, %v7471_v62 }
 0x401   :  { %v7536_v22 = vcombine.high %v7522_v35, %v7522_v35  ;;  %v7539_v2 = vunpack.i.h.s16 %v7522_v35  ;;  %v7542_v6 = vunpack.i.h.s16 %v7526_v24  ;;  %v5415_v55 = vpack.i.b16 %v7526_v24, %v2423_v41 }
 0x402   :  { %v3029_v16 = vcombine.low %v5450_v38, %v5414_v60  ;;  %v2707_v34 = vrot.slane %v7526_v24, %v6705_v63  ;;  %v3067_v44 = vrot.slane %v3059_v48, %v6705_v63  ;;  %v3213_v27 = vcombine.low %v7428_v9, %v5462_v50 }
 0x403   :  { %v7557_v8 = vpack.i.b16 %v7536_v22, %v7542_v6  ;;  %v5427_v47 = vpack.i.b16 %v7539_v2, %v7508_v52  ;;  %v5438_v21 = vpack.i.b16 %v7542_v6, %v7522_v35  ;;  %v2485_v45 = vcombine.low %v5414_v60, %v5415_v55 }
 0x404   :  { %v5451_v13 = vpack.i.b16 %v7526_v24, %v7539_v2  ;;  %v5452_v15 = vpack.i.b16 %v7519_v4, %v7542_v6  ;;  %v3051_v5 = vrot.slane %v3029_v16, %v6705_v63  ;;  %v5464_v61 = vpack.i.b16 %v2431_v29, %v7536_v22 }
 0x405   :  { %v2655_v49 = vcombine.low %v7475_v43, %v5427_v47  ;;  %v2842_v10 = vcombine.low %v7508_v52, %v5438_v21  ;;  %v2513_v58 = vrot.slane %v2485_v45, %v6705_v63  ;;  %v2537_v11 = vrot.slane %v7557_v8, %v6705_v63 }
 0x406   :  { %v3030_v26 = vcombine.low %v5451_v13, %v5452_v15  ;;  %v3214_v55 = vcombine.low %v7420_v39, %v7468_v18  ;;  %v3216_v16 = vcombine.low %v7526_v24, %v5464_v61  ;;  %v3223_v13 = vrot.slane %v3213_v27, %v6705_v63 }
 0x407   :  { %v2683_v43 = vrot.slane %v2655_v49, %v6705_v63  ;;  %v2870_v46 = vrot.slane %v2842_v10, %v6705_v63  ;;  %v2515_v38 = vcombine.low %v2506_v3, %v2513_v58  ;;  %v3215_v3 = vcombine.low %v5463_v59, %v7508_v52  ;;  %v6318_v58 = vld [vmem:[#allocation3 + $0x88] sm:$0xff]  }
 0x408   :  { %v3058_v23 = vrot.slane %v3030_v26, %v6705_v63  ;;  %v3244_v49 = vrot.slane %v3216_v16, %v6705_v63  ;;  %v2544_v10 = vrot.slane %v2537_v11, %v6705_v63  ;;  %v7602_v59 = vrot.slane %v2343_v12, %v6705_v63 }
 0x409   :  { %v2685_v60 = vcombine.low %v2676_v33, %v2683_v43  ;;  %v2872_v56 = vcombine.low %v2863_v51, %v2870_v46  ;;  %v2529_v36 = vrot.slane %v2515_v38, %v6705_v63  ;;  %v3230_v33 = vrot.slane %v3214_v55, %v6705_v63  ;;  %v6319_v38 = vld [vmem:[#allocation3 + $0xc8] sm:$0xff]  }
 0x40a   :  { %v3060_v47 = vcombine.low %v3051_v5, %v3058_v23  ;;  %v3237_v15 = vrot.slane %v3215_v3, %v6705_v63  ;;  %v2714_v5 = vrot.slane %v2707_v34, %v6705_v63  ;;  %v2409_v23 = vunpack.i.h.s16 %v7471_v62  ;;  %v6320_v34 = vld [vmem:[#allocation3 + $0x90] sm:$0xff]  }
 0x40b   :  { %v2699_v21 = vrot.slane %v2685_v60, %v6705_v63  ;;  %v2886_v45 = vrot.slane %v2872_v56, %v6705_v63  ;;  %v2530_v51 = vcombine.low %v2522_v1, %v2529_v36  ;;  %v3245_v26 = vcombine.low %v3223_v13, %v3230_v33 }
 0x40c   :  { %v3074_v9 = vrot.slane %v3060_v47, %v6705_v63  ;;  %v3246_v46 = vcombine.low %v3237_v15, %v3244_v49  ;;  %v2399_v1 = vunpack.i.h.s16 %v7407_v25  ;;  %v5476_v61 = vpack.i.b16 %v7508_v52, %v2409_v23  ;;  %v6321_v52 = vld [vmem:[#allocation3 + $0xd0] sm:$0xff]  }
 0x40d   :  { %v2700_v48 = vcombine.low %v2692_v31, %v2699_v21  ;;  %v2887_v50 = vcombine.low %v2879_v19, %v2886_v45  ;;  %5850 = vmatprep.mubr.bf16.mxu1 %v2530_v51  ;;  %v2429_v31 = vunpack.i.h.s16 %v7536_v22  ;;  %v5474_v19 = vpack.i.b16 %v7434_v37, %v7438_v0 }
 0x40e   :  { %v3075_v43 = vcombine.low %v3067_v44, %v3074_v9  ;;  %5851 = vmatmul.mubr.bf16.vlgmr.msra.gmra.mrb[8].mxu1 %v2544_v10  ;;  %v7612_v12 = vrot.slane %v3245_v26, %v6705_v63  ;;  %v7615_v25 = vrot.slane %v3246_v46, %v6705_v63  ;;  %v5473_v11 = vpack.i.b16 %v7420_v39, %v2399_v1  ;;  %v6324_v46 = vld [vmem:[#allocation3 + $0xa0] sm:$0xff]  }
 0x40f   :  { %5870 = vmatprep.mubr.bf16.mxu0 %v2700_v48  ;;  %5875 = vmatpush3.bf16.msra.mxu1 %v7383_v20  ;;  %v7620_v44 = vpack.i.b16 %v7471_v62, %v7498_v40  ;;  %v5477_v20 = vpack.i.b16 %v7522_v35, %v2423_v41  ;;  %v2435_v60 = vunpack.i.h.s16 %v7553_v53  ;;  %v5478_v27 = vpack.i.b16 %v7602_v59, %v2429_v31 }
 0x410   :  { %5890 = vmatprep.mubr.bf16.mxu1 %v2887_v50  ;;  %5871 = vmatmul.mubr.bf16.vlgmr.msra.gmra.mrb[4].mxu0 %v2714_v5  ;;  %v3261_v56 = vcombine.low %v7612_v12, %v7615_v25  ;;  %v3401_v55 = vcombine.low %v7457_v32, %v5473_v11  ;;  %v7635_v36 = vpack.c.bf16 %v2220_v57, %v2220_v57  ;;  %v6322_v57 = vld [vmem:[#allocation3 + $0x98] sm:$0xff]   ;;  %v2433_v13 = vunpack.i.h.s16 %v7602_v59  ;;  %v6341_v12 = vld [vmem:[#allocation3 + $0x160] sm:$0xff]   ;;  %v6342_v25 = vld [vmem:[#allocation3 + $0x128] sm:$0xff]  }
 0x411   :  { %5876 = vmatprep.subr.bf16.mxu1 %v6318_v58  ;;  %5895 = vmatpush3.bf16.msra.mxu0 %v7385_v17  ;;  %v3402_v35 = vcombine.low %v5474_v19, %v7620_v44  ;;  %v3403_v41 = vcombine.low %v5476_v61, %v5477_v20  ;;  %v2323_v17 = vcombine.high %v7468_v18, %v7468_v18  ;;  %v2413_v48 = vunpack.i.h.s16 %v7488_v28 }
 0x412   :  { %5910 = vmatprep.mubr.bf16.mxu0 %v3075_v43  ;;  %5896 = vmatprep.subr.bf16.mxu0 %v6319_v38  ;;  %v3404_v47 = vcombine.low %v7557_v8, %v5478_v27  ;;  %v3411_v3 = vrot.slane %v3401_v55, %v6705_v63  ;;  %v5488_v7 = vpack.i.b16 %v2405_v30, %v7420_v39 }
 0x413   :  { %5877 = vmatpush3.bf16.msra.mxu1 %v6318_v58  ;;  %v5489_v32 = vpack.i.b16 %v7539_v2, %v7488_v28  ;;  %v3418_v16 = vrot.slane %v3402_v35, %v6705_v63  ;;  %v3425_v21 = vrot.slane %v3403_v41, %v6705_v63  ;;  %v5490_v45 = vpack.i.b16 %v2435_v60, %v7602_v59  ;;  %v6323_v2 = vld [vmem:[#allocation3 + $0xd8] sm:$0xff]  }
 0x414   :  { %5878 = vmatprep.subr.bf16.mxu1 %v6320_v34  ;;  %v3432_v33 = vrot.slane %v3404_v47, %v6705_v63  ;;  %v3588_v51 = vcombine.low %v7414_v54, %v5488_v7  ;;  %v3589_v30 = vcombine.low %v7468_v18, %v2323_v17  ;;  %v7658_v10 = vcombine.high %v7602_v59, %v7602_v59  ;;  %v6327_v47 = vld [vmem:[#allocation3 + $0xe8] sm:$0xff]  }
 0x415   :  { %5897 = vmatpush3.bf16.msra.mxu0 %v6319_v38  ;;  %v3590_v9 = vcombine.low %v5489_v32, %v7526_v24  ;;  %v3433_v15 = vcombine.low %v3411_v3, %v3418_v16  ;;  %v3591_v49 = vcombine.low %v7519_v4, %v5490_v45  ;;  %v2382_v43 = vrot.slane %v7635_v36, %v6705_v63 }
 0x416   :  { %5898 = vmatprep.subr.bf16.mxu0 %v6321_v52  ;;  %v3434_v50 = vcombine.low %v3425_v21, %v3432_v33  ;;  %v3598_v58 = vrot.slane %v3588_v51, %v6705_v63  ;;  %v3605_v54 = vrot.slane %v3589_v30, %v6705_v63  ;;  %v2411_v38 = vunpack.i.h.s16 %v2323_v17 }
 0x417   :  { %5879 = vmatpush3.bf16.msra.mxu1 %v6320_v34  ;;  %v3612_v26 = vrot.slane %v3590_v9, %v6705_v63  ;;  %v3441_v1 = vrot.slane %v3433_v15, %v6705_v63  ;;  %v3619_v5 = vrot.slane %v3591_v49, %v6705_v63  ;;  %v5499_v19 = vpack.i.b16 %v7468_v18, %v7438_v0  ;;  %v6325_v34 = vld [vmem:[#allocation3 + $0xe0] sm:$0xff]   ;;  %v6330_v49 = vld [vmem:[#allocation3 + $0xb8] sm:$0xff]  }
 0x418   :  { %5880 = vmatprep.subr.bf16.mxu1 %v6322_v57  ;;  %v3448_v23 = vrot.slane %v3434_v50, %v6705_v63  ;;  %v3620_v31 = vcombine.low %v3598_v58, %v3605_v54  ;;  %v5501_v11 = vpack.i.b16 %v7526_v24, %v2413_v48  ;;  %v7675_v61 = vpack.i.b16 %v7602_v59, %v2431_v29  ;;  %v6326_v24 = vld [vmem:[#allocation3 + $0xa8] sm:$0xff]   ;;  %v6331_v58 = vld [vmem:[#allocation3 + $0xf8] sm:$0xff]  }
 0x419   :  { %5899 = vmatpush3.bf16.msra.mxu0 %v6321_v52  ;;  %v3621_v20 = vcombine.low %v3612_v26, %v3619_v5  ;;  %v5500_v60 = vpack.i.b16 %v7488_v28, %v2411_v38  ;;  %v5502_v27 = vpack.i.b16 %v7658_v10, %v2433_v13  ;;  %v3774_v0 = vcombine.low %v7445_v42, %v5499_v19  ;;  %v6333_v38 = vld [vmem:[#allocation3 + $0x140] sm:$0xff]  }
 0x41a   :  { %5900 = vmatprep.subr.bf16.mxu0 %v6323_v2  ;;  %v7681_v55 = vcombine.low %v3441_v1, %v3448_v23  ;;  %v3776_v18 = vcombine.low %v5501_v11, %v7557_v8  ;;  %v3628_v4 = vrot.slane %v3620_v31, %v6705_v63  ;;  %v2437_v17 = vunpack.i.h.s16 %v7658_v10  ;;  %v6334_v31 = vld [vmem:[#allocation3 + $0x108] sm:$0xff]   ;;  %v6336_v11 = vld [vmem:[#allocation3 + $0x110] sm:$0xff]  }
 0x41b   :  { %5881 = vmatpush3.bf16.msra.mxu1 %v6322_v57  ;;  %v3635_v29 = vrot.slane %v3621_v20, %v6705_v63  ;;  %v3775_v36 = vcombine.low %v7620_v44, %v5500_v60  ;;  %v3777_v52 = vcombine.low %v7675_v61, %v5502_v27  ;;  %v3784_v35 = vrot.slane %v3774_v0, %v6705_v63  ;;  %v6339_v20 = vld [vmem:[#allocation3 + $0x158] sm:$0xff]   ;;  %v6340_v60 = vld [vmem:[#allocation3 + $0x120] sm:$0xff]   ;;  %v6344_v27 = vld [vmem:[#allocation3 + $0x130] sm:$0xff]  }
 0x41c   :  { %5882 = vmatprep.subr.bf16.mxu1 %v6324_v46  ;;  %v3798_v41 = vrot.slane %v3776_v18, %v6705_v63  ;;  %v5512_v42 = vpack.i.b16 %v7498_v40, %v7434_v37  ;;  %v7695_v8 = vrot.slane %v2382_v43, %v6705_v63  ;;  %v5513_v32 = vpack.i.b16 %v7542_v6, %v7403_v14  ;;  %v6328_v40 = vld [vmem:[#allocation3 + $0xb0] sm:$0xff]   ;;  %v6346_v0 = vld [vmem:[#allocation3 + $0x138] sm:$0xff]  }
 0x41d   :  { %5901 = vmatpush3.bf16.msra.mxu0 %v6323_v2  ;;  %v7697_v3 = vcombine.low %v3628_v4, %v3635_v29  ;;  %v3791_v44 = vrot.slane %v3775_v36, %v6705_v63  ;;  %v3805_v7 = vrot.slane %v3777_v52, %v6705_v63  ;;  %v5514_v57 = vpack.i.b16 %v2437_v17, %v7553_v53  ;;  %v6347_v18 = vld [vmem:[#allocation3 + $0x178] sm:$0xff]   ;;  %v6348_v29 = vld [vmem:[#allocation3 + $0x180] sm:$0xff]  }
 0x41e   :  { %5902 = vmatprep.subr.bf16.mxu0 %v6325_v34  ;;  %v3961_v16 = vcombine.low %v7420_v39, %v5512_v42  ;;  %v3962_v37 = vcombine.low %v7471_v62, %v7488_v28  ;;  %v7708_v33 = vpack.i.b16 %v7695_v8, %v2437_v17  ;;  %v3963_v51 = vcombine.low %v5513_v32, %v7536_v22  ;;  %v6329_v39 = vld [vmem:[#allocation3 + $0xf0] sm:$0xff]   ;;  %v6349_v52 = vld [vmem:[#allocation3 + $0x1c0] sm:$0xff]   ;;  %v6354_v42 = vld [vmem:[#allocation3 + $0x198] sm:$0xff]  }
 0x41f   :  { %5883 = vmatpush3.bf16.msra.mxu1 %v6324_v46  ;;  %v3806_v21 = vcombine.low %v3784_v35, %v3791_v44  ;;  %v3807_v45 = vcombine.low %v3798_v41, %v3805_v7  ;;  %v3964_v30 = vcombine.low %v7602_v59, %v5514_v57  ;;  %v2894_v43 = vrot.slane %v7536_v22, %v6705_v63  ;;  %v6332_v46 = vld [vmem:[#allocation3 + $0x100] sm:$0xff]   ;;  %v6335_v22 = vld [vmem:[#allocation3 + $0x148] sm:$0xff]   ;;  %v6353_v17 = vld [vmem:[#allocation3 + $0x1d0] sm:$0xff]  }
 0x420   :  { %5884 = vmatprep.subr.bf16.mxu1 %v6326_v24  ;;  %v3971_v14 = vrot.slane %v3961_v16, %v6705_v63  ;;  %v3978_v6 = vrot.slane %v3962_v37, %v6705_v63  ;;  %v3985_v9 = vrot.slane %v3963_v51, %v6705_v63  ;;  %v3082_v5 = vrot.slane %v7675_v61, %v6705_v63  ;;  %v6338_v61 = vld [vmem:[#allocation3 + $0x118] sm:$0xff]   ;;  %v6350_v41 = vld [vmem:[#allocation3 + $0x188] sm:$0xff]   ;;  %v6356_v44 = vld [vmem:[#allocation3 + $0x1a0] sm:$0xff]  }
 0x421   :  { %5903 = vmatpush3.bf16.msra.mxu0 %v6325_v34  ;;  %v3814_v62 = vrot.slane %v3806_v21, %v6705_v63  ;;  %v3821_v28 = vrot.slane %v3807_v45, %v6705_v63  ;;  %v3992_v2 = vrot.slane %v3964_v30, %v6705_v63  ;;  %v2901_v23 = vrot.slane %v2894_v43, %v6705_v63  ;;  %v6337_v34 = vld [vmem:[#allocation3 + $0x150] sm:$0xff]   ;;  %v6358_v7 = vld [vmem:[#allocation3 + $0x1a8] sm:$0xff]   ;;  %v6362_v37 = vld [vmem:[#allocation3 + $0x1b8] sm:$0xff]  }
 0x422   :  { %5904 = vmatprep.subr.bf16.mxu0 %v6327_v47  ;;  %v3993_v15 = vcombine.low %v3971_v14, %v3978_v6  ;;  %v3089_v19 = vrot.slane %v3082_v5, %v6705_v63  ;;  %v3268_v4 = vrot.slane %v7602_v59, %v6705_v63  ;;  %v6352_v59 = vld [vmem:[#allocation3 + $0x190] sm:$0xff]   ;;  %v6359_v32 = vld [vmem:[#allocation3 + $0x1e8] sm:$0xff]   ;;  %v3643_v21 = vrot.slane %v7658_v10, %v6705_v63  ;;  %v6364_v45 = vld [vmem:[#allocation3 + $0x200] sm:$0xff]  }
 0x423   :  { %5885 = vmatpush3.bf16.msra.mxu1 %v6326_v24  ;;  %v7718_v48 = vcombine.low %v3814_v62, %v3821_v28  ;;  %v3994_v50 = vcombine.low %v3985_v9, %v3992_v2  ;;  %v5479_v24 = vpack.i.b16 %v7553_v53, %v2433_v13  ;;  %v6351_v13 = vld [vmem:[#allocation3 + $0x1c8] sm:$0xff]   ;;  %v6360_v57 = vld [vmem:[#allocation3 + $0x1b0] sm:$0xff]   ;;  %v3829_v51 = vrot.slane %v7708_v33, %v6705_v63  ;;  %v6368_v33 = vld [vmem:[#allocation3 + $0x220] sm:$0xff]  }
 0x424   :  { %5886 = vmatprep.subr.bf16.mxu1 %v6328_v40  ;;  %v4001_v54 = vrot.slane %v3993_v15, %v6705_v63  ;;  %v3275_v35 = vrot.slane %v3268_v4, %v6705_v63  ;;  %v6361_v16 = vld [vmem:[#allocation3 + $0x1f0] sm:$0xff]   ;;  %v3650_v30 = vrot.slane %v3643_v21, %v6705_v63  ;;  %v6365_v14 = vld [vmem:[#allocation3 + $0x208] sm:$0xff]   ;;  %v6371_v9 = vld [vmem:[#allocation3 + $0x238] sm:$0xff]   ;;  %v4016_v2 = vrot.slane %v7695_v8, %v6705_v63 }
 0x425   :  { %5905 = vmatpush3.bf16.msra.mxu0 %v6327_v47  ;;  %v4008_v26 = vrot.slane %v3994_v50, %v6705_v63  ;;  %v3456_v36 = vrot.slane %v5479_v24, %v6705_v63  ;;  %v6355_v47 = vld [vmem:[#allocation3 + $0x1d8] sm:$0xff]   ;;  %v3836_v6 = vrot.slane %v3829_v51, %v6705_v63  ;;  %v6366_v10 = vld [vmem:[#allocation3 + $0x210] sm:$0xff]   ;;  %v6369_v62 = vld [vmem:[#allocation3 + $0x228] sm:$0xff]   ;;  %v6529_v50 = vmov 0.0  }
 0x426   :  { %5906 = vmatprep.subr.bf16.mxu0 %v6329_v39  ;;  %v6370_v28 = vld [vmem:[#allocation3 + $0x230] sm:$0xff]   ;;  %v4023_v15 = vrot.slane %v4016_v2, %v6705_v63 }
 0x427   :  { %5887 = vmatpush3.bf16.msra.mxu1 %v6328_v40  ;;  %v7724_v1 = vcombine.low %v4001_v54, %v4008_v26  ;;  %v3463_v53 = vrot.slane %v3456_v36, %v6705_v63  ;;  %v6363_v40 = vld [vmem:[#allocation3 + $0x1f8] sm:$0xff]   ;;  %v6375_v54 = vld [vmem:[#allocation6 + $0x8] sm:$0xff]  }
 0x428   :  { %5888 = vmatprep.subr.bf16.mxu1 %v6330_v49 }
 0x429   :  { %5907 = vmatpush3.bf16.msra.mxu0 %v6329_v39  ;;  %v6367_v39 = vld [vmem:[#allocation3 + $0x218] sm:$0xff]  }
 0x42a   :  { %5908 = vmatprep.subr.bf16.mxu0 %v6331_v58 }
 0x42b   :  { %5889 = vmatpush3.bf16.msra.mxu1 %v6330_v49  ;;  %v6372_v49 = vld [vmem:[#allocation6 + $0x40] sm:$0xff]  }
 0x42c   :  { %5914 = vmatprep.subr.bf16.mxu1 %v6332_v46 }
 0x42d   :  { %5909 = vmatpush3.bf16.msra.mxu0 %v6331_v58  ;;  %v6374_v58 = vld [vmem:[#allocation6 + $0x48] sm:$0xff]  }
 0x42e   :  { %5891 = vmatmul.mubr.bf16.vlgmr.msra.gmra.mrb[12].mxu1 %v2901_v23  ;;  %5934 = vmatprep.subr.bf16.mxu0 %v6333_v38 }
 0x42f   :  { %5915 = vmatpush3.bf16.msra.mxu1 %v6332_v46  ;;  %5930 = vmatprep.mubr.bf16.mxu1 %v3261_v56  ;;  %v6343_v56 = vld [vmem:[#allocation3 + $0x168] sm:$0xff]  }
 0x430   :  { %5911 = vmatmul.mubr.bf16.vlgmr.msra.gmra.mrb[8].mxu0 %v3089_v19  ;;  %5916 = vmatprep.subr.bf16.mxu1 %v6334_v31 }
 0x431   :  { %5935 = vmatpush3.bf16.msra.mxu0 %v6333_v38  ;;  %5950 = vmatprep.mubr.bf16.mxu0 %v7681_v55  ;;  %v6345_v55 = vld [vmem:[#allocation3 + $0x170] sm:$0xff]  }
 0x432   :  { %5936 = vmatprep.subr.bf16.mxu0 %v6335_v22 }
 0x433   :  { %5917 = vmatpush3.bf16.msra.mxu1 %v6334_v31 }
 0x434   :  { %5918 = vmatprep.subr.bf16.mxu1 %v6336_v11 }
 0x435   :  { %5937 = vmatpush3.bf16.msra.mxu0 %v6335_v22 }
 0x436   :  { %5938 = vmatprep.subr.bf16.mxu0 %v6337_v34 }
 0x437   :  { %5919 = vmatpush3.bf16.msra.mxu1 %v6336_v11  ;;  %v6376_v11 = vld [vmem:[#allocation6 + $0x50] sm:$0xff]  }
 0x438   :  { %5920 = vmatprep.subr.bf16.mxu1 %v6338_v61 }
 0x439   :  { %5939 = vmatpush3.bf16.msra.mxu0 %v6337_v34  ;;  %v6377_v34 = vld [vmem:[#allocation6 + $0x10] sm:$0xff]  }
 0x43a   :  { %5940 = vmatprep.subr.bf16.mxu0 %v6339_v20 }
 0x43b   :  { %5921 = vmatpush3.bf16.msra.mxu1 %v6338_v61  ;;  %v6378_v61 = vld [vmem:[#allocation6 + $0x58] sm:$0xff]  }
 0x43c   :  { %5922 = vmatprep.subr.bf16.mxu1 %v6340_v60 }
 0x43d   :  { %5941 = vmatpush3.bf16.msra.mxu0 %v6339_v20  ;;  %v6379_v20 = vld [vmem:[#allocation6 + $0x18] sm:$0xff]  }
 0x43e   :  { %5942 = vmatprep.subr.bf16.mxu0 %v6341_v12 }
 0x43f   :  { %5923 = vmatpush3.bf16.msra.mxu1 %v6340_v60  ;;  %v6380_v60 = vld [vmem:[#allocation6 + $0x60] sm:$0xff]  }
 0x440   :  { %5924 = vmatprep.subr.bf16.mxu1 %v6342_v25 }
 0x441   :  { %5943 = vmatpush3.bf16.msra.mxu0 %v6341_v12  ;;  %v6381_v12 = vld [vmem:[#allocation6 + $0x20] sm:$0xff]  }
 0x442   :  { %5944 = vmatprep.subr.bf16.mxu0 %v6343_v56 }
 0x443   :  { %5925 = vmatpush3.bf16.msra.mxu1 %v6342_v25  ;;  %v6382_v25 = vld [vmem:[#allocation6 + $0x68] sm:$0xff]  }
 0x444   :  { %5926 = vmatprep.subr.bf16.mxu1 %v6344_v27 }
 0x445   :  { %5945 = vmatpush3.bf16.msra.mxu0 %v6343_v56  ;;  %v6383_v56 = vld [vmem:[#allocation6 + $0x28] sm:$0xff]  }
 0x446   :  { %5946 = vmatprep.subr.bf16.mxu0 %v6345_v55 }
 0x447   :  { %5927 = vmatpush3.bf16.msra.mxu1 %v6344_v27  ;;  %v6384_v27 = vld [vmem:[#allocation6 + $0x70] sm:$0xff]  }
 0x448   :  { %5928 = vmatprep.subr.bf16.mxu1 %v6346_v0 }
 0x449   :  { %5947 = vmatpush3.bf16.msra.mxu0 %v6345_v55  ;;  %v6385_v55 = vld [vmem:[#allocation6 + $0x30] sm:$0xff]  }
 0x44a   :  { %5948 = vmatprep.subr.bf16.mxu0 %v6347_v18 }
 0x44b   :  { %5929 = vmatpush3.bf16.msra.mxu1 %v6346_v0  ;;  %v6386_v0 = vld [vmem:[#allocation6 + $0x78] sm:$0xff]  }
 0x44c   :  { %5954 = vmatprep.subr.bf16.mxu1 %v6348_v29 }
 0x44d   :  { %5949 = vmatpush3.bf16.msra.mxu0 %v6347_v18  ;;  %v6387_v18 = vld [vmem:[#allocation6 + $0x38] sm:$0xff]  }
 0x44e   :  { %5931 = vmatmul.mubr.bf16.vlgmr.msra.gmra.mrb[16].mxu1 %v3275_v35  ;;  %5974 = vmatprep.subr.bf16.mxu0 %v6349_v52 }
 0x44f   :  { %5955 = vmatpush3.bf16.msra.mxu1 %v6348_v29  ;;  %5970 = vmatprep.mubr.bf16.mxu1 %v7697_v3  ;;  %v6357_v3 = vld [vmem:[#allocation3 + $0x1e0] sm:$0xff]  }
 0x450   :  { %5951 = vmatmul.mubr.bf16.vlgmr.msra.gmra.mrb[12].mxu0 %v3463_v53  ;;  %5956 = vmatprep.subr.bf16.mxu1 %v6350_v41 }
 0x451   :  { %5975 = vmatpush3.bf16.msra.mxu0 %v6349_v52  ;;  %5990 = vmatprep.mubr.bf16.mxu0 %v7718_v48  ;;  %v6373_v48 = vld [vmem:[#allocation6] sm:$0xff]  }
 0x452   :  { %5976 = vmatprep.subr.bf16.mxu0 %v6351_v13 }
 0x453   :  { %5957 = vmatpush3.bf16.msra.mxu1 %v6350_v41 }
 0x454   :  { %5958 = vmatprep.subr.bf16.mxu1 %v6352_v59 }
 0x455   :  { %5977 = vmatpush3.bf16.msra.mxu0 %v6351_v13 }
 0x456   :  { %5978 = vmatprep.subr.bf16.mxu0 %v6353_v17 }
 0x457   :  { %5959 = vmatpush3.bf16.msra.mxu1 %v6352_v59 }
 0x458   :  { %5960 = vmatprep.subr.bf16.mxu1 %v6354_v42 }
 0x459   :  { %5979 = vmatpush3.bf16.msra.mxu0 %v6353_v17 }
 0x45a   :  { %5980 = vmatprep.subr.bf16.mxu0 %v6355_v47 }
 0x45b   :  { %5961 = vmatpush3.bf16.msra.mxu1 %v6354_v42 }
 0x45c   :  { %5962 = vmatprep.subr.bf16.mxu1 %v6356_v44 }
 0x45d   :  { %5981 = vmatpush3.bf16.msra.mxu0 %v6355_v47 }
 0x45e   :  { %5982 = vmatprep.subr.bf16.mxu0 %v6357_v3 }
 0x45f   :  { %5963 = vmatpush3.bf16.msra.mxu1 %v6356_v44 }
 0x460   :  { %5964 = vmatprep.subr.bf16.mxu1 %v6358_v7 }
 0x461   :  { %5983 = vmatpush3.bf16.msra.mxu0 %v6357_v3 }
 0x462   :  { %5984 = vmatprep.subr.bf16.mxu0 %v6359_v32 }
 0x463   :  { %5965 = vmatpush3.bf16.msra.mxu1 %v6358_v7 }
 0x464   :  { %5966 = vmatprep.subr.bf16.mxu1 %v6360_v57 }
 0x465   :  { %5985 = vmatpush3.bf16.msra.mxu0 %v6359_v32 }
 0x466   :  { %5986 = vmatprep.subr.bf16.mxu0 %v6361_v16 }
 0x467   :  { %5967 = vmatpush3.bf16.msra.mxu1 %v6360_v57 }
 0x468   :  { %5968 = vmatprep.subr.bf16.mxu1 %v6362_v37 }
 0x469   :  { %5987 = vmatpush3.bf16.msra.mxu0 %v6361_v16 }
 0x46a   :  { %5988 = vmatprep.subr.bf16.mxu0 %v6363_v40 }
 0x46b   :  { %5969 = vmatpush3.bf16.msra.mxu1 %v6362_v37 }
 0x46c   :  { %5994 = vmatprep.subr.bf16.mxu1 %v6364_v45 }
 0x46d   :  { %5989 = vmatpush3.bf16.msra.mxu0 %v6363_v40 }
 0x46e   :  { %5971 = vmatmul.mubr.bf16.vlgmr.msra.gmra.mrb[20].mxu1 %v3650_v30  ;;  %6014 = vmatprep.subr.bf16.mxu0 %v6529_v50 }
 0x46f   :  { %5995 = vmatpush3.bf16.msra.mxu1 %v6364_v45  ;;  %6010 = vmatprep.mubr.bf16.mxu1 %v7724_v1 }
 0x470   :  { %5991 = vmatmul.mubr.bf16.vlgmr.msra.gmra.mrb[16].mxu0 %v3836_v6  ;;  %5996 = vmatprep.subr.bf16.mxu1 %v6365_v14 }
 0x471   :  { %6015 = vmatpush3.bf16.msra.mxu0 %v6372_v49  ;;  %6030 = vmatprep.mubr.msk.bf16.mxu0 %vm6530_vm13, %v6529_v50 }
 0x472   :  { %6016 = vmatprep.subr.bf16.mxu0 %v6529_v50 }
 0x473   :  { %5997 = vmatpush3.bf16.msra.mxu1 %v6365_v14 }
 0x474   :  { %5998 = vmatprep.subr.bf16.mxu1 %v6366_v10 }
 0x475   :  { %6017 = vmatpush3.bf16.msra.mxu0 %v6374_v58 }
 0x476   :  { %6018 = vmatprep.subr.bf16.mxu0 %v6529_v50 }
 0x477   :  { %5999 = vmatpush3.bf16.msra.mxu1 %v6366_v10 }
 0x478   :  { %6000 = vmatprep.subr.bf16.mxu1 %v6367_v39 }
 0x479   :  { %6019 = vmatpush3.bf16.msra.mxu0 %v6376_v11 }
 0x47a   :  { %6020 = vmatprep.subr.bf16.mxu0 %v6529_v50 }
 0x47b   :  { %6001 = vmatpush3.bf16.msra.mxu1 %v6367_v39 }
 0x47c   :  { %6002 = vmatprep.subr.bf16.mxu1 %v6368_v33 }
 0x47d   :  { %6021 = vmatpush3.bf16.msra.mxu0 %v6378_v61 }
 0x47e   :  { %6022 = vmatprep.subr.bf16.mxu0 %v6529_v50 }
 0x47f   :  { %6003 = vmatpush3.bf16.msra.mxu1 %v6368_v33 }
 0x480   :  { %6004 = vmatprep.subr.bf16.mxu1 %v6369_v62 }
 0x481   :  { %6023 = vmatpush3.bf16.msra.mxu0 %v6380_v60 }
 0x482   :  { %6024 = vmatprep.subr.bf16.mxu0 %v6529_v50 }
 0x483   :  { %6005 = vmatpush3.bf16.msra.mxu1 %v6369_v62 }
 0x484   :  { %6006 = vmatprep.subr.bf16.mxu1 %v6370_v28 }
 0x485   :  { %6025 = vmatpush3.bf16.msra.mxu0 %v6382_v25 }
 0x486   :  { %6026 = vmatprep.subr.bf16.mxu0 %v6529_v50 }
 0x487   :  { %6007 = vmatpush3.bf16.msra.mxu1 %v6370_v28 }
 0x488   :  { %6008 = vmatprep.subr.bf16.mxu1 %v6371_v9 }
 0x489   :  { %6027 = vmatpush3.bf16.msra.mxu0 %v6384_v27 }
 0x48a   :  { %6028 = vmatprep.subr.bf16.mxu0 %v6529_v50 }
 0x48b   :  { %6009 = vmatpush3.bf16.msra.mxu1 %v6371_v9 }
 0x48c   :  { %6034 = vmatprep.subr.bf16.mxu1 %v6529_v50 }
 0x48d   :  { %6029 = vmatpush3.bf16.msra.mxu0 %v6386_v0 }
 0x48e   :  { %6011 = vmatmul.mubr.bf16.vlgmr.msra.gmra.mrb[24].mxu1 %v4023_v15  ;;  %6054 = vmatprep.subr.bf16.mxu0 %v6529_v50 }
 0x48f   :  { %6035 = vmatpush3.bf16.msra.mxu1 %v6373_v48  ;;  %6050 = vmatprep.mubr.msk.bf16.mxu1 %vm6530_vm13, %v6529_v50 }
 0x490   :  { %6036 = vmatprep.subr.bf16.mxu1 %v6529_v50 }
 0x493   :  { %6037 = vmatpush3.bf16.msra.mxu1 %v6375_v54 }
 0x494   :  { %6038 = vmatprep.subr.bf16.mxu1 %v6529_v50 }
 0x497   :  { %6039 = vmatpush3.bf16.msra.mxu1 %v6377_v34 }
 0x498   :  { %6040 = vmatprep.subr.bf16.mxu1 %v6529_v50 }
 0x49b   :  { %6041 = vmatpush3.bf16.msra.mxu1 %v6379_v20 }
 0x49c   :  { %6042 = vmatprep.subr.bf16.mxu1 %v6529_v50 }
 0x49f   :  { %6043 = vmatpush3.bf16.msra.mxu1 %v6381_v12 }
 0x4a0   :  { %6044 = vmatprep.subr.bf16.mxu1 %v6529_v50 }
 0x4a3   :  { %6045 = vmatpush3.bf16.msra.mxu1 %v6383_v56 }
 0x4a4   :  { %6046 = vmatprep.subr.bf16.mxu1 %v6529_v50 }
 0x4a7   :  { %6047 = vmatpush3.bf16.msra.mxu1 %v6385_v55 }
 0x4a8   :  { %6048 = vmatprep.subr.bf16.mxu1 %v6529_v50 }
 0x4ab   :  { %6049 = vmatpush3.bf16.msra.mxu1 %v6387_v18 }
 0x4ac   :  { %6074 = vmatprep.subr.bf16.mxu1 %v6529_v50 }
 0x4e1   :  { %v5852_v8 = vpop.f32.mrb[8].mxu1 }
 0x4e2   :  { %v2629_v26 = vpop.f32.mrb[9].mxu1 }
 0x4e3   :  { %v5853_v43 = vpop.f32.mrb[10].mxu1  ;;  %v5872_v46 = vpop.f32.mrb[4].mxu0 }
 0x4e4   :  { %v2808_v1 = vadd.f32 %v5872_v46, %v5852_v8  ;;  %v2632_v5 = vpop.f32.mrb[11].mxu1  ;;  %v2799_v38 = vpop.f32.mrb[5].mxu0 }
 0x4e5   :  { %v2800_v23 = vadd.f32 %v2799_v38, %v2629_v26  ;;  %v5873_v31 = vpop.f32.mrb[6].mxu0 }
 0x4e6   :  { %v2802_v19 = vpop.f32.mrb[7].mxu0 }
 0x4e7   :  { %v2803_v22 = vadd.f32 %v2802_v19, %v2632_v5 }
 0x501   :  { %v5892_v24 = vpop.f32.mrb[12].mxu1 }
 0x502   :  { %v3002_v4 = vadd.f32 %v5892_v24, %v2808_v1  ;;  %v2986_v29 = vpop.f32.mrb[13].mxu1  ;;  %v5523_v1 = vld [vmem:[%s7914_s5] ss:$0 sm:$0xff] }
 0x503   :  { %v3000_v36 = vadd.f32 %v2986_v29, %v2800_v23  ;;  %v5893_v52 = vpop.f32.mrb[14].mxu1  ;;  %v5912_v35 = vpop.f32.mrb[8].mxu0 }
 0x504   :  { %v3190_v41 = vadd.f32 %v5912_v35, %v3002_v4  ;;  %v2989_v53 = vpop.f32.mrb[15].mxu1  ;;  %v3174_v13 = vpop.f32.mrb[9].mxu0 }
 0x505   :  { %v3001_v59 = vadd.f32 %v2989_v53, %v2803_v22  ;;  %v3188_v17 = vadd.f32 %v3174_v13, %v3000_v36  ;;  %v5913_v42 = vpop.f32.mrb[10].mxu0 }
 0x506   :  { %v3177_v47 = vpop.f32.mrb[11].mxu0 }
 0x507   :  { %v3189_v44 = vadd.f32 %v3177_v47, %v3001_v59 }
 0x521   :  { %v5932_v3 = vpop.f32.mrb[16].mxu1 }
 0x522   :  { %v3376_v7 = vadd.f32 %v5932_v3, %v3190_v41  ;;  %v3360_v32 = vpop.f32.mrb[17].mxu1 }
 0x523   :  { %v3374_v57 = vadd.f32 %v3360_v32, %v3188_v17  ;;  %v5933_v16 = vpop.f32.mrb[18].mxu1  ;;  %v5952_v37 = vpop.f32.mrb[12].mxu0 }
 0x524   :  { %v3564_v40 = vadd.f32 %v5952_v37, %v3376_v7  ;;  %v3363_v21 = vpop.f32.mrb[19].mxu1  ;;  %v3548_v45 = vpop.f32.mrb[13].mxu0 }
 0x525   :  { %v3375_v51 = vadd.f32 %v3363_v21, %v3189_v44  ;;  %v3562_v30 = vadd.f32 %v3548_v45, %v3374_v57  ;;  %v5953_v14 = vpop.f32.mrb[14].mxu0 }
 0x526   :  { %v3551_v6 = vpop.f32.mrb[15].mxu0  ;;  %v6388_v14 = vld [vmem:[#allocation6 + $0x80] sm:$0xff]  }
 0x527   :  { %v3563_v10 = vadd.f32 %v3551_v6, %v3375_v51  ;;  %v6389_v6 = vld [vmem:[#allocation6 + $0xc0] sm:$0xff]  }
 0x541   :  { %v5972_v39 = vpop.f32.mrb[20].mxu1 }
 0x542   :  { %v3751_v33 = vadd.f32 %v5972_v39, %v3564_v40  ;;  %v3735_v62 = vpop.f32.mrb[21].mxu1 }
 0x543   :  { %v3749_v28 = vadd.f32 %v3735_v62, %v3562_v30  ;;  %v5973_v9 = vpop.f32.mrb[22].mxu1  ;;  %v5992_v2 = vpop.f32.mrb[16].mxu0 }
 0x544   :  { %v3937_v15 = vadd.f32 %v5992_v2, %v3751_v33  ;;  %v3738_v49 = vpop.f32.mrb[23].mxu1  ;;  %v3921_v48 = vpop.f32.mrb[17].mxu0 }
 0x545   :  { %v3750_v58 = vadd.f32 %v3738_v49, %v3563_v10  ;;  %v3935_v54 = vadd.f32 %v3921_v48, %v3749_v28  ;;  %v5993_v8 = vpop.f32.mrb[18].mxu0  ;;  %v6390_v49 = vld [vmem:[#allocation6 + $0x88] sm:$0xff]  }
 0x546   :  { %v3924_v26 = vpop.f32.mrb[19].mxu0  ;;  %v6391_v48 = vld [vmem:[#allocation6 + $0xc8] sm:$0xff]   ;;  %v6394_v8 = vld [vmem:[#allocation6 + $0x98] sm:$0xff]  }
 0x547   :  { %v3936_v43 = vadd.f32 %v3924_v26, %v3750_v58  ;;  %v6392_v58 = vld [vmem:[#allocation6 + $0x90] sm:$0xff]   ;;  %v6395_v26 = vld [vmem:[#allocation6 + $0xd8] sm:$0xff]  }
 0x561   :  { %v6012_v46 = vpop.f32.mrb[24].mxu1 }
 0x562   :  { %v4124_v5 = vadd.f32 %v6012_v46, %v3937_v15  ;;  %v4108_v38 = vpop.f32.mrb[25].mxu1  ;;  %v6397_v46 = vld [vmem:[#allocation6 + $0xe0] sm:$0xff]  }
 0x563   :  { %v4122_v23 = vadd.f32 %v4108_v38, %v3935_v54  ;;  %v6013_v31 = vpop.f32.mrb[26].mxu1  ;;  %v6393_v54 = vld [vmem:[#allocation6 + $0xd0] sm:$0xff]  }
 0x564   :  { %v4134_v19 = vadd.f32 %v5523_v1, %v4124_v5  ;;  %v4111_v22 = vpop.f32.mrb[27].mxu1  ;;  %v6399_v5 = vld [vmem:[#allocation6 + $0xe8] sm:$0xff]   ;;  %v6400_v38 = vld [vmem:[#allocation6 + $0xb0] sm:$0xff]   ;;  %v6402_v31 = vld [vmem:[#allocation6 + $0xb8] sm:$0xff]  }
 0x565   :  { %v4132_v11 = vadd.f32 %v5523_v1, %v4122_v23  ;;  %v4123_v34 = vadd.f32 %v4111_v22, %v3936_v43  ;;  %v6396_v43 = vld [vmem:[#allocation6 + $0xa0] sm:$0xff]   ;;  %v6401_v23 = vld [vmem:[#allocation6 + $0xf0] sm:$0xff]  }
 0x566   :  { %v4137_v61 = vmax.f32 %v4134_v19, 0.0  ;;  %v6403_v19 = vld [vmem:[#allocation6 + $0xf8] sm:$0xff]  }
 0x567   :  { %v4133_v20 = vadd.f32 %v5523_v1, %v4123_v34  ;;  %v4135_v12 = vmax.f32 %v4132_v11, 0.0  ;;  %v6398_v1 = vld [vmem:[#allocation6 + $0xa8] sm:$0xff]   ;;  %v6404_v34 = vld [vmem:[#allocation6 + $0x100] sm:$0xff]  }
 0x568   :  { %v4139_v60 = vpack.c.bf16 %v4137_v61, %v4137_v61  ;;  %v6405_v61 = vld [vmem:[#allocation6 + $0x140] sm:$0xff]  }
 0x569   :  { %v4136_v25 = vmax.f32 %v4133_v20, 0.0 }
 0x56a   :  { %v4197_v56 = vrot.slane %v4139_v60, %v6705_v63 }
 0x56b   :  { %v4138_v27 = vpack.c.bf16 %v4136_v25, %v4135_v12  ;;  %v5524_v55 = vpack.c.bf16 %v4136_v25, %v4136_v25  ;;  %v6406_v12 = vld [vmem:[#allocation6 + $0x108] sm:$0xff]  }
 0x56c   :  { %v4204_v0 = vrot.slane %v4197_v56, %v6705_v63  ;;  %v6407_v25 = vld [vmem:[#allocation6 + $0x148] sm:$0xff]   ;;  %v6408_v56 = vld [vmem:[#allocation6 + $0x110] sm:$0xff]  }
 0x56d   :  { %v4149_v18 = vrot.slane %v4138_v27, %v6705_v63  ;;  %v4156_v24 = vrot.slane %v5524_v55, %v6705_v63  ;;  %v6409_v27 = vld [vmem:[#allocation6 + $0x150] sm:$0xff]   ;;  %v6410_v55 = vld [vmem:[#allocation6 + $0x118] sm:$0xff]  }
 0x56e   :  { %v4222_v4 = vunpack.i.h.s16 %v4204_v0 }
 0x56f   :  { %v4157_v29 = vcombine.high %v4149_v18, %v4149_v18  ;;  %v4158_v36 = vcombine.high %v4156_v24, %v4156_v24  ;;  %v4165_v52 = vrot.slane %v4149_v18, %v6705_v63  ;;  %v4172_v35 = vrot.slane %v4156_v24, %v6705_v63  ;;  %v6412_v18 = vld [vmem:[#allocation6 + $0x120] sm:$0xff]  }
 0x570   :  { %v6413_v24 = vld [vmem:[#allocation6 + $0x160] sm:$0xff]  }
 0x571   :  { %v4179_v41 = vrot.slane %v4157_v29, %v6705_v63  ;;  %v4186_v53 = vrot.slane %v4158_v36, %v6705_v63  ;;  %v4206_v13 = vunpack.i.h.s16 %v4165_v52  ;;  %v4214_v59 = vunpack.i.h.s16 %v4172_v35  ;;  %v6415_v29 = vld [vmem:[#allocation6 + $0x168] sm:$0xff]   ;;  %v6416_v36 = vld [vmem:[#allocation6 + $0x130] sm:$0xff]  }
 0x572   :  { %v4188_v17 = vcombine.high %v4172_v35, %v4172_v35  ;;  %v4187_v42 = vcombine.high %v4165_v52, %v4165_v52  ;;  %v7787_v47 = vpack.i.b16 %v4222_v4, %v4172_v35  ;;  %v6414_v4 = vld [vmem:[#allocation6 + $0x128] sm:$0xff]   ;;  %v6418_v35 = vld [vmem:[#allocation6 + $0x138] sm:$0xff]  }
 0x573   :  { %v5525_v44 = vpack.i.b16 %v4186_v53, %v4206_v13  ;;  %v5534_v3 = vpack.i.b16 %v4214_v59, %v4165_v52  ;;  %v4216_v7 = vunpack.i.h.s16 %v4186_v53  ;;  %v4208_v32 = vunpack.i.h.s16 %v4179_v41  ;;  %v6417_v52 = vld [vmem:[#allocation6 + $0x170] sm:$0xff]   ;;  %v6420_v59 = vld [vmem:[#allocation6 + $0x180] sm:$0xff]  }
 0x574   :  { %v4218_v57 = vunpack.i.h.s16 %v4188_v17  ;;  %v4190_v16 = vcombine.high %v4186_v53, %v4186_v53  ;;  %v4210_v37 = vunpack.i.h.s16 %v4187_v42  ;;  %v4189_v40 = vcombine.high %v4179_v41, %v4179_v41 }
 0x575   :  { %v4263_v21 = vrot.slane %v5525_v44, %v6705_v63  ;;  %v4367_v45 = vrot.slane %v5534_v3, %v6705_v63  ;;  %v7791_v51 = vpack.i.b16 %v4216_v7, %v4179_v41  ;;  %v7793_v30 = vpack.i.b16 %v4188_v17, %v4208_v32  ;;  %v6419_v41 = vld [vmem:[#allocation6 + $0x178] sm:$0xff]   ;;  %v6421_v17 = vld [vmem:[#allocation6 + $0x1c0] sm:$0xff]   ;;  %v6422_v3 = vld [vmem:[#allocation6 + $0x188] sm:$0xff]  }
 0x576   :  { %v7795_v10 = vpack.i.b16 %v4218_v57, %v4187_v42  ;;  %v7797_v39 = vpack.i.b16 %v4190_v16, %v4210_v37  ;;  %v4220_v33 = vunpack.i.h.s16 %v4190_v16  ;;  %v4212_v62 = vunpack.i.h.s16 %v4189_v40  ;;  %v6423_v7 = vld [vmem:[#allocation6 + $0x1c8] sm:$0xff]   ;;  %v6424_v32 = vld [vmem:[#allocation6 + $0x190] sm:$0xff]   ;;  %v6426_v16 = vld [vmem:[#allocation6 + $0x198] sm:$0xff]  }
 0x577   :  { %v4270_v28 = vrot.slane %v4263_v21, %v6705_v63  ;;  %v4374_v9 = vrot.slane %v4367_v45, %v6705_v63  ;;  %v4488_v22 = vrot.slane %v7791_v51, %v6705_v63  ;;  %v4610_v11 = vrot.slane %v7793_v30, %v6705_v63  ;;  %v6425_v57 = vld [vmem:[#allocation6 + $0x1d0] sm:$0xff]   ;;  %v6427_v37 = vld [vmem:[#allocation6 + $0x1d8] sm:$0xff]   ;;  %v6429_v21 = vld [vmem:[#allocation6 + $0x1e0] sm:$0xff]  }
 0x578   :  { %v7801_v2 = vpack.i.b16 %v4220_v33, %v4189_v40  ;;  %v7803_v15 = vpack.i.b16 %v4204_v0, %v4212_v62  ;;  %v6411_v0 = vld [vmem:[#allocation6 + $0x158] sm:$0xff]   ;;  %v4732_v53 = vrot.slane %v7795_v10, %v6705_v63  ;;  %v4854_v13 = vrot.slane %v7797_v39, %v6705_v63  ;;  %v6428_v40 = vld [vmem:[#allocation6 + $0x1a0] sm:$0xff]   ;;  %v6430_v45 = vld [vmem:[#allocation6 + $0x1a8] sm:$0xff]  }
 0x579   :  { %6031 = vmatmul.mubr.bf16.vlgmr.msra.gmra.mrb[20].mxu0 %v4270_v28  ;;  %6051 = vmatmul.mubr.bf16.vlgmr.msra.gmra.mrb[28].mxu1 %v4374_v9  ;;  %v4495_v20 = vrot.slane %v4488_v22, %v6705_v63  ;;  %v4617_v60 = vrot.slane %v4610_v11, %v6705_v63  ;;  %v6431_v51 = vld [vmem:[#allocation6 + $0x1e8] sm:$0xff]   ;;  %v6432_v30 = vld [vmem:[#allocation6 + $0x1b0] sm:$0xff]   ;;  %v6435_v10 = vld [vmem:[#allocation6 + $0x1f8] sm:$0xff]  }
 0x57a   :  { %6055 = vmatpush3.bf16.msra.mxu0 %v6388_v14  ;;  %6075 = vmatpush3.bf16.msra.mxu1 %v6389_v6  ;;  %v4739_v42 = vrot.slane %v4732_v53, %v6705_v63  ;;  %v4861_v44 = vrot.slane %v4854_v13, %v6705_v63  ;;  %v6433_v14 = vld [vmem:[#allocation6 + $0x1f0] sm:$0xff]   ;;  %v6434_v6 = vld [vmem:[#allocation6 + $0x1b8] sm:$0xff]   ;;  %v4976_v39 = vrot.slane %v7801_v2, %v6705_v63  ;;  %v6436_v62 = vld [vmem:[#allocation6 + $0x200] sm:$0xff]  }
 0x57b   :  { %6056 = vmatprep.subr.bf16.mxu0 %v6529_v50  ;;  %6076 = vmatprep.subr.bf16.mxu1 %v6529_v50  ;;  %v5098_v33 = vrot.slane %v7803_v15, %v6705_v63  ;;  %v6438_v2 = vld [vmem:[#allocation6 + $0x210] sm:$0xff]   ;;  %v6439_v15 = vld [vmem:[#allocation6 + $0x218] sm:$0xff]  }
 0x57c   :  { %6070 = vmatprep.mubr.msk.bf16.mxu0 %vm6530_vm13, %v6529_v50  ;;  %6090 = vmatprep.mubr.msk.bf16.mxu1 %vm6530_vm13, %v6529_v50  ;;  %v4983_v28 = vrot.slane %v4976_v39, %v6705_v63 }
 0x57d   :  { %v5105_v9 = vrot.slane %v5098_v33, %v6705_v63 }
 0x57e   :  { %6057 = vmatpush3.bf16.msra.mxu0 %v6390_v49  ;;  %6077 = vmatpush3.bf16.msra.mxu1 %v6391_v48  ;;  %v6437_v49 = vld [vmem:[#allocation6 + $0x208] sm:$0xff]   ;;  %v6440_v48 = vld [vmem:[#allocation6 + $0x220] sm:$0xff]  }
 0x57f   :  { %6058 = vmatprep.subr.bf16.mxu0 %v6529_v50  ;;  %6078 = vmatprep.subr.bf16.mxu1 %v6529_v50 }
 0x582   :  { %6059 = vmatpush3.bf16.msra.mxu0 %v6392_v58  ;;  %6079 = vmatpush3.bf16.msra.mxu1 %v6393_v54  ;;  %v6441_v58 = vld [vmem:[#allocation6 + $0x228] sm:$0xff]   ;;  %v6442_v54 = vld [vmem:[#allocation6 + $0x230] sm:$0xff]  }
 0x583   :  { %6060 = vmatprep.subr.bf16.mxu0 %v6529_v50  ;;  %6080 = vmatprep.subr.bf16.mxu1 %v6529_v50 }
 0x586   :  { %6061 = vmatpush3.bf16.msra.mxu0 %v6394_v8  ;;  %6081 = vmatpush3.bf16.msra.mxu1 %v6395_v26  ;;  %v6443_v8 = vld [vmem:[#allocation6 + $0x238] sm:$0xff]   ;;  %v5220_v26 = vrot.slane %v7787_v47, %v6705_v63 }
 0x587   :  { %6062 = vmatprep.subr.bf16.mxu0 %v6529_v50  ;;  %6082 = vmatprep.subr.bf16.mxu1 %v6529_v50 }
 0x58a   :  { %6063 = vmatpush3.bf16.msra.mxu0 %v6396_v43  ;;  %6083 = vmatpush3.bf16.msra.mxu1 %v6397_v46  ;;  %v5227_v43 = vrot.slane %v5220_v26, %v6705_v63 }
 0x58b   :  { %6064 = vmatprep.subr.bf16.mxu0 %v6529_v50  ;;  %6084 = vmatprep.subr.bf16.mxu1 %v6529_v50 }
 0x58e   :  { %6065 = vmatpush3.bf16.msra.mxu0 %v6398_v1  ;;  %6085 = vmatpush3.bf16.msra.mxu1 %v6399_v5 }
 0x58f   :  { %6066 = vmatprep.subr.bf16.mxu0 %v6529_v50  ;;  %6086 = vmatprep.subr.bf16.mxu1 %v6529_v50 }
 0x592   :  { %6067 = vmatpush3.bf16.msra.mxu0 %v6400_v38  ;;  %6087 = vmatpush3.bf16.msra.mxu1 %v6401_v23 }
 0x593   :  { %6068 = vmatprep.subr.bf16.mxu0 %v6529_v50  ;;  %6088 = vmatprep.subr.bf16.mxu1 %v6529_v50 }
 0x596   :  { %6069 = vmatpush3.bf16.msra.mxu0 %v6402_v31  ;;  %6089 = vmatpush3.bf16.msra.mxu1 %v6403_v19 }
 0x597   :  { %6094 = vmatprep.subr.bf16.mxu0 %v6529_v50  ;;  %6114 = vmatprep.subr.bf16.mxu1 %v6529_v50 }
 0x599   :  { %6071 = vmatmul.mubr.bf16.vlgmr.msra.gmra.mrb[24].mxu0 %v4495_v20  ;;  %6091 = vmatmul.mubr.bf16.vlgmr.msra.gmra.mrb[32].mxu1 %v4617_v60 }
 0x59a   :  { %6095 = vmatpush3.bf16.msra.mxu0 %v6404_v34  ;;  %6115 = vmatpush3.bf16.msra.mxu1 %v6405_v61 }
 0x59b   :  { %6096 = vmatprep.subr.bf16.mxu0 %v6529_v50  ;;  %6116 = vmatprep.subr.bf16.mxu1 %v6529_v50 }
 0x59c   :  { %6110 = vmatprep.mubr.msk.bf16.mxu0 %vm6530_vm13, %v6529_v50  ;;  %6130 = vmatprep.mubr.msk.bf16.mxu1 %vm6530_vm13, %v6529_v50 }
 0x59e   :  { %6097 = vmatpush3.bf16.msra.mxu0 %v6406_v12  ;;  %6117 = vmatpush3.bf16.msra.mxu1 %v6407_v25 }
 0x59f   :  { %6098 = vmatprep.subr.bf16.mxu0 %v6529_v50  ;;  %6118 = vmatprep.subr.bf16.mxu1 %v6529_v50 }
 0x5a2   :  { %6099 = vmatpush3.bf16.msra.mxu0 %v6408_v56  ;;  %6119 = vmatpush3.bf16.msra.mxu1 %v6409_v27 }
 0x5a3   :  { %6100 = vmatprep.subr.bf16.mxu0 %v6529_v50  ;;  %6120 = vmatprep.subr.bf16.mxu1 %v6529_v50 }
 0x5a6   :  { %6101 = vmatpush3.bf16.msra.mxu0 %v6410_v55  ;;  %6121 = vmatpush3.bf16.msra.mxu1 %v6411_v0 }
 0x5a7   :  { %6102 = vmatprep.subr.bf16.mxu0 %v6529_v50  ;;  %6122 = vmatprep.subr.bf16.mxu1 %v6529_v50 }
 0x5aa   :  { %6103 = vmatpush3.bf16.msra.mxu0 %v6412_v18  ;;  %6123 = vmatpush3.bf16.msra.mxu1 %v6413_v24 }
 0x5ab   :  { %6104 = vmatprep.subr.bf16.mxu0 %v6529_v50  ;;  %6124 = vmatprep.subr.bf16.mxu1 %v6529_v50 }
 0x5ae   :  { %6105 = vmatpush3.bf16.msra.mxu0 %v6414_v4  ;;  %6125 = vmatpush3.bf16.msra.mxu1 %v6415_v29 }
 0x5af   :  { %6106 = vmatprep.subr.bf16.mxu0 %v6529_v50  ;;  %6126 = vmatprep.subr.bf16.mxu1 %v6529_v50 }
 0x5b2   :  { %6107 = vmatpush3.bf16.msra.mxu0 %v6416_v36  ;;  %6127 = vmatpush3.bf16.msra.mxu1 %v6417_v52 }
 0x5b3   :  { %6108 = vmatprep.subr.bf16.mxu0 %v6529_v50  ;;  %6128 = vmatprep.subr.bf16.mxu1 %v6529_v50 }
 0x5b6   :  { %6109 = vmatpush3.bf16.msra.mxu0 %v6418_v35  ;;  %6129 = vmatpush3.bf16.msra.mxu1 %v6419_v41 }
 0x5b7   :  { %6134 = vmatprep.subr.bf16.mxu0 %v6529_v50  ;;  %6154 = vmatprep.subr.bf16.mxu1 %v6529_v50 }
 0x5b9   :  { %6111 = vmatmul.mubr.bf16.vlgmr.msra.gmra.mrb[28].mxu0 %v4739_v42  ;;  %6131 = vmatmul.mubr.bf16.vlgmr.msra.gmra.mrb[36].mxu1 %v4861_v44 }
 0x5ba   :  { %6135 = vmatpush3.bf16.msra.mxu0 %v6420_v59  ;;  %6155 = vmatpush3.bf16.msra.mxu1 %v6421_v17 }
 0x5bb   :  { %6136 = vmatprep.subr.bf16.mxu0 %v6529_v50  ;;  %6156 = vmatprep.subr.bf16.mxu1 %v6529_v50 }
 0x5bc   :  { %6150 = vmatprep.mubr.msk.bf16.mxu0 %vm6530_vm13, %v6529_v50  ;;  %6170 = vmatprep.mubr.msk.bf16.mxu1 %vm6530_vm13, %v6529_v50 }
 0x5be   :  { %6137 = vmatpush3.bf16.msra.mxu0 %v6422_v3  ;;  %6157 = vmatpush3.bf16.msra.mxu1 %v6423_v7 }
 0x5bf   :  { %6138 = vmatprep.subr.bf16.mxu0 %v6529_v50  ;;  %6158 = vmatprep.subr.bf16.mxu1 %v6529_v50 }
 0x5c2   :  { %6139 = vmatpush3.bf16.msra.mxu0 %v6424_v32  ;;  %6159 = vmatpush3.bf16.msra.mxu1 %v6425_v57 }
 0x5c3   :  { %6140 = vmatprep.subr.bf16.mxu0 %v6529_v50  ;;  %6160 = vmatprep.subr.bf16.mxu1 %v6529_v50 }
 0x5c6   :  { %6141 = vmatpush3.bf16.msra.mxu0 %v6426_v16  ;;  %6161 = vmatpush3.bf16.msra.mxu1 %v6427_v37  ;;  %v5606_v16 = vld [vmem:[%s7916_s7] ss:$0 sm:$0xff] }
 0x5c7   :  { %6142 = vmatprep.subr.bf16.mxu0 %v6529_v50  ;;  %6162 = vmatprep.subr.bf16.mxu1 %v6529_v50 }
 0x5ca   :  { %6143 = vmatpush3.bf16.msra.mxu0 %v6428_v40  ;;  %6163 = vmatpush3.bf16.msra.mxu1 %v6429_v21 }
 0x5cb   :  { %6144 = vmatprep.subr.bf16.mxu0 %v6529_v50  ;;  %6164 = vmatprep.subr.bf16.mxu1 %v6529_v50 }
 0x5ce   :  { %6145 = vmatpush3.bf16.msra.mxu0 %v6430_v45  ;;  %6165 = vmatpush3.bf16.msra.mxu1 %v6431_v51 }
 0x5cf   :  { %6146 = vmatprep.subr.bf16.mxu0 %v6529_v50  ;;  %6166 = vmatprep.subr.bf16.mxu1 %v6529_v50 }
 0x5d2   :  { %6147 = vmatpush3.bf16.msra.mxu0 %v6432_v30  ;;  %6167 = vmatpush3.bf16.msra.mxu1 %v6433_v14 }
 0x5d3   :  { %6148 = vmatprep.subr.bf16.mxu0 %v6529_v50  ;;  %6168 = vmatprep.subr.bf16.mxu1 %v6529_v50 }
 0x5d6   :  { %6149 = vmatpush3.bf16.msra.mxu0 %v6434_v6  ;;  %6169 = vmatpush3.bf16.msra.mxu1 %v6435_v10 }
 0x5d7   :  { %6174 = vmatprep.subr.bf16.mxu0 %v6529_v50 }
 0x5d9   :  { %6151 = vmatmul.mubr.bf16.vlgmr.msra.gmra.mrb[32].mxu0 %v4983_v28  ;;  %6171 = vmatmul.mubr.bf16.vlgmr.msra.gmra.mrb[40].mxu1 %v5105_v9 }
 0x5da   :  { %6175 = vmatpush3.bf16.msra.mxu0 %v6436_v62  ;;  %6190 = vmatprep.mubr.msk.bf16.mxu0 %vm6530_vm13, %v6529_v50 }
 0x5db   :  { %6176 = vmatprep.subr.bf16.mxu0 %v6529_v50 }
 0x5de   :  { %6177 = vmatpush3.bf16.msra.mxu0 %v6437_v49 }
 0x5df   :  { %6178 = vmatprep.subr.bf16.mxu0 %v6529_v50 }
 0x5e2   :  { %6179 = vmatpush3.bf16.msra.mxu0 %v6438_v2 }
 0x5e3   :  { %6180 = vmatprep.subr.bf16.mxu0 %v6529_v50 }
 0x5e6   :  { %6181 = vmatpush3.bf16.msra.mxu0 %v6439_v15 }
 0x5e7   :  { %6182 = vmatprep.subr.bf16.mxu0 %v6529_v50 }
 0x5ea   :  { %6183 = vmatpush3.bf16.msra.mxu0 %v6440_v48 }
 0x5eb   :  { %6184 = vmatprep.subr.bf16.mxu0 %v6529_v50 }
 0x5ee   :  { %6185 = vmatpush3.bf16.msra.mxu0 %v6441_v58 }
 0x5ef   :  { %6186 = vmatprep.subr.bf16.mxu0 %v6529_v50 }
 0x5f2   :  { %6187 = vmatpush3.bf16.msra.mxu0 %v6442_v54 }
 0x5f3   :  { %6188 = vmatprep.subr.bf16.mxu0 %v6529_v50 }
 0x5f6   :  { %6189 = vmatpush3.bf16.msra.mxu0 %v6443_v8 }
 0x5f9   :  { %6191 = vmatmul.mubr.bf16.vlgmr.msra.gmra.mrb[36].mxu0 %v5227_v43 }
 0x64c   :  { %v4354_v46 = vpop.f32.mrb[20].mxu0  ;;  %v4458_v1 = vpop.f32.mrb[28].mxu1 }
 0x64d   :  { %v4459_v5 = vadd.f32 %v4458_v1, %v4354_v46  ;;  %v6032_v38 = vpop.f32.mrb[21].mxu0  ;;  %v6052_v23 = vpop.f32.mrb[29].mxu1 }
 0x64e   :  { %v4357_v31 = vpop.f32.mrb[22].mxu0  ;;  %v4461_v19 = vpop.f32.mrb[30].mxu1 }
 0x64f   :  { %v6033_v22 = vpop.f32.mrb[23].mxu0  ;;  %v6053_v11 = vpop.f32.mrb[31].mxu1 }
 0x66c   :  { %v4579_v34 = vpop.f32.mrb[24].mxu0  ;;  %v4701_v61 = vpop.f32.mrb[32].mxu1 }
 0x66d   :  { %v4585_v20 = vadd.f32 %v4579_v34, %v4459_v5  ;;  %v6072_v50 = vpop.f32.mrb[25].mxu0  ;;  %v6092_v60 = vpop.f32.mrb[33].mxu1 }
 0x66e   :  { %v4582_v12 = vpop.f32.mrb[26].mxu0  ;;  %v4704_v47 = vpop.f32.mrb[34].mxu1 }
 0x66f   :  { %v4707_v25 = vadd.f32 %v4701_v61, %v4585_v20  ;;  %v6073_v56 = vpop.f32.mrb[27].mxu0  ;;  %v6093_v63 = vpop.f32.mrb[35].mxu1 }
 0x68c   :  { %v4823_v27 = vpop.f32.mrb[28].mxu0  ;;  %v4945_v55 = vpop.f32.mrb[36].mxu1 }
 0x68d   :  { %v4829_v0 = vadd.f32 %v4823_v27, %v4707_v25  ;;  %v6112_v18 = vpop.f32.mrb[29].mxu0  ;;  %v6132_v24 = vpop.f32.mrb[37].mxu1 }
 0x68e   :  { %v4826_v4 = vpop.f32.mrb[30].mxu0  ;;  %v4948_v29 = vpop.f32.mrb[38].mxu1 }
 0x68f   :  { %v4951_v36 = vadd.f32 %v4945_v55, %v4829_v0  ;;  %v6113_v52 = vpop.f32.mrb[31].mxu0  ;;  %v6133_v35 = vpop.f32.mrb[39].mxu1 }
 0x6ac   :  { %v5067_v41 = vpop.f32.mrb[32].mxu0  ;;  %v5189_v53 = vpop.f32.mrb[40].mxu1 }
 0x6ad   :  { %v5073_v13 = vadd.f32 %v5067_v41, %v4951_v36  ;;  %v6152_v59 = vpop.f32.mrb[33].mxu0  ;;  %v6172_v17 = vpop.f32.mrb[41].mxu1 }
 0x6ae   :  { %v5070_v42 = vpop.f32.mrb[34].mxu0  ;;  %v5192_v44 = vpop.f32.mrb[42].mxu1 }
 0x6af   :  { %v5195_v3 = vadd.f32 %v5189_v53, %v5073_v13  ;;  %v6153_v7 = vpop.f32.mrb[35].mxu0  ;;  %v6173_v32 = vpop.f32.mrb[43].mxu1 }
 0x6cc   :  { %v5311_v57 = vpop.f32.mrb[36].mxu0 }
 0x6cd   :  { %v5317_v37 = vadd.f32 %v5311_v57, %v5195_v3  ;;  %v6192_v40 = vpop.f32.mrb[37].mxu0 }
 0x6ce   :  { %v5314_v21 = vpop.f32.mrb[38].mxu0 }
 0x6cf   :  { %v5325_v45 = vadd.f32 %v5606_v16, %v5317_v37  ;;  %v6193_v51 = vpop.f32.mrb[39].mxu0 }
 0x6d1   :  { %v5326_v30 = vmax.f32 %v5325_v45, 0.0 }
 0x6d3   :  { %5327 = vst [vmem:[#allocation8] sm:$0x3] %v5326_v30 }
 0x6d4   :  { %6499 = shalt.err (!%p6496_p6)
}
 0x6d5   :  { %s6500_s7 = scalar_lea.hbm %s7917_s8, 32 }
 0x6d6   :  { %p6501_p7 = scmp.ne.s32.totalorder %s7917_s8, %s6500_s7  ;;  %p6504_p8 = scmp.lt.u32.totalorder %s6500_s7, %s7917_s8 }
 0x6d8   :  { %p6506_p9 = pnand %p6504_p8, %p6501_p7 }
 0x6da   :  { %6509 = shalt.err (!%p6506_p9)
}
 0x6db   :  { %5337 = dma.vmem_to_hbm [thread:$0]  %s5335_s21, 32, %s7917_s8, [#allocation5]  }
 0x6dc   :  { %6514 = dma.done.wait [#allocation5], 32  }
 0x6dd   :  { %6515 = vsyncadd [#allocation5], 4294967264 }
 0x6de   :  { %5341 = vsyncpa [#allocation4], 1 }
 0x6df   :  { %5342 = vsyncpa [#allocation7], 1 }
 0x6e0   :  { %5343 = vsyncpa [#allocation5], 1 }

</bundles_post_ra>
